<compile_context>
chip_gen: v5e
topology: v5e:2x2
jax: 0.10.0
libtpu: 0.0.40
codegen_flags: <defaults>
</compile_context>

<pallas_src>
import functools
import math
from collections import OrderedDict

import jax
import jax.numpy as jnp
import numpy as np
from jax.experimental import pallas as pl
from jax.experimental.pallas import tpu as pltpu

# ----------------------------- config ---------------------------------------
ENTITY_DIM = 32
NUM_LAYERS = 1
NUM_HEADS = 2
KEY_SIZE = 16
VALUE_SIZE = 16
RES_BEFORE = 1
RES_AFTER = 1
RES_HIDDEN = 32
OUTPUT_DIM = 64

# synthetic vocab sizes (stand-ins for PokedexEmbedding etc.)
NUM_SPECIES = 32
NUM_ABILITIES = 16
NUM_ITEMS = 16
NUM_ITEM_EFFECTS = 8
NUM_MOVES = 32
NUM_GENDERS = 3
NUM_STATUS = 7
NUM_FORMES = 8
NUM_TYPES = 18      # BattleTypeChart

T, B, N, S, F = 2, 2, 2, 12, 38

_VMEM = pl.BlockSpec(memory_space=pltpu.MemorySpace.VMEM)


def _vmem_specs(n):
    return [pl.BlockSpec(memory_space=pltpu.MemorySpace.VMEM) for _ in range(n)]


# ----------------------------- Pallas kernels --------------------------------
def _embed_combine_kernel(sp_ref, ab_known_ref, it_known_ref, km_sum_ref,
                          moveset_ref, base_ref, ab_mask_ref, it_mask_ref,
                          unk_cnt_ref, ent_mask_ref,
                          w_abit_ref, b_abit_ref, w_um_ref, b_um_ref,
                          o_ref, *, entity_dim):
    """Fused 'unknown' MLPs + where-selects + sums + entity mask."""
    sp = sp_ref[...]                                        # (R, D)
    # ability_unknown / item_unknown share input ReLU(species) -> one matmul
    abit = (jnp.dot(jnp.maximum(sp, 0.0), w_abit_ref[...],
                    preferred_element_type=jnp.float32) + b_abit_ref[...])
    ab_unknown = abit[:, :entity_dim]
    it_unknown = abit[:, entity_dim:]
    # unknown_move = Linear(ReLU(moveset_lin + species))
    um = (jnp.dot(jnp.maximum(moveset_ref[...] + sp, 0.0), w_um_ref[...],
                  preferred_element_type=jnp.float32) + b_um_ref[...])
    ab = jnp.where(ab_mask_ref[...] > 0.0, ab_known_ref[...], ab_unknown)
    it = jnp.where(it_mask_ref[...] > 0.0, it_known_ref[...], it_unknown)
    # sum over 4 moves of where(known, unknown) == masked-known-sum + n*unknown
    moveset_sum = km_sum_ref[...] + unk_cnt_ref[...] * um
    emb = sp + ab + it + moveset_sum + base_ref[...]
    o_ref[...] = emb * ent_mask_ref[...]


def _transformer_tail_kernel(*refs, num_layers, num_rb_before, num_rb_after,
                             num_heads, key_size, value_size):
    """Fused transformer layer(s) + ToVector + move-gate MLP + GLU."""
    idx = 0
    pe_ref = refs[idx]; idx += 1
    m_ref = refs[idx]; idx += 1
    ame_ref = refs[idx]; idx += 1
    layers = []
    for _ in range(num_layers):
        rb_b = [refs[idx + 4 * i: idx + 4 * i + 4] for i in range(num_rb_before)]
        idx += 4 * num_rb_before
        attn = refs[idx: idx + 4]; idx += 4
        rb_a = [refs[idx + 4 * i: idx + 4 * i + 4] for i in range(num_rb_after)]
        idx += 4 * num_rb_after
        layers.append((rb_b, attn, rb_a))
    w_tv1, b_tv1, w_tv2, b_tv2 = refs[idx: idx + 4]; idx += 4
    w_g, b_g = refs[idx: idx + 2]; idx += 2
    pe_out, pooled_out, amo_out = refs[idx: idx + 3]

    x = pe_ref[...]                                         # (Bt, L, D)
    m = m_ref[...]                                          # (Bt, L)
    Bt, L, D = x.shape
    mexp = m[..., None]
    neg = (m[:, None, :] - 1.0) * 1e9                       # 0 valid, -1e9 pad
    scale = 1.0 / math.sqrt(key_size)
    HK = num_heads * key_size
    HV = num_heads * value_size

    def rb_apply(x2, wb):
        w1, b1, w2, b2 = wb
        h = jnp.maximum(x2, 0.0)
        h = jnp.dot(h, w1[...], preferred_element_type=jnp.float32) + b1[...]
        h = jnp.maximum(h, 0.0)
        h = jnp.dot(h, w2[...], preferred_element_type=jnp.float32) + b2[...]
        return x2 + h

    xcur = x
    for rb_b, attn, rb_a in layers:
        x1 = xcur.reshape(Bt * L, D)
        for wb in rb_b:
            x1 = rb_apply(x1, wb)
        # ---- MHA: fused QKV projection, single output projection ----
        wqkv, bqkv, wo, bo = attn
        qkv = (jnp.dot(x1, wqkv[...], preferred_element_type=jnp.float32)
               + bqkv[...])                                 # (Bt*L, 2HK+HV)
        q = qkv[:, :HK].reshape(Bt, L, HK)
        k = qkv[:, HK:2 * HK].reshape(Bt, L, HK)
        v = qkv[:, 2 * HK:].reshape(Bt, L, HV)
        heads = []
        for h_ in range(num_heads):                         # static unroll
            qh = q[..., h_ * key_size:(h_ + 1) * key_size]
            kh = k[..., h_ * key_size:(h_ + 1) * key_size]
            vh = v[..., h_ * value_size:(h_ + 1) * value_size]
            logits = jnp.einsum("blk,bmk->blm", qh, kh,
                                preferred_element_type=jnp.float32) * scale + neg
            logits = logits - jnp.max(logits, axis=-1, keepdims=True)
            probs = jnp.exp(logits)
            probs = probs * pl.reciprocal(
                jnp.sum(probs, axis=-1, keepdims=True), approx=True)
            heads.append(jnp.einsum("blm,bmv->blv", probs, vh,
                                    preferred_element_type=jnp.float32))
        ho = jnp.concatenate(heads, axis=-1).reshape(Bt * L, HV)
        attn_out = (jnp.dot(ho, wo[...], preferred_element_type=jnp.float32)
                    + bo[...]).reshape(Bt, L, D)
        xcur = xcur + attn_out * mexp
        x1 = xcur.reshape(Bt * L, D)
        for wb in rb_a:
            x1 = rb_apply(x1, wb)
        xcur = xcur + x1.reshape(Bt, L, D) * mexp

    pe = xcur * mexp
    pe_out[...] = pe

    # ---- ToVector: Linear(ReLU) -> masked mean pool -> ReLU -> Linear ----
    h2 = jnp.maximum(pe.reshape(Bt * L, D), 0.0)
    h2 = (jnp.dot(h2, w_tv1[...], preferred_element_type=jnp.float32)
          + b_tv1[...]).reshape(Bt, L, -1)
    pooled = jnp.sum(h2 * mexp, axis=1)                     # (Bt, 2D)
    denom = jnp.maximum(jnp.sum(m, axis=1, keepdims=True), 1.0)
    pooled = jnp.maximum(pooled * pl.reciprocal(denom, approx=True), 0.0)
    pooled_out[...] = (jnp.dot(pooled, w_tv2[...],
                               preferred_element_type=jnp.float32) + b_tv2[...])

    # ---- move gate MLP + GLU tail ----
    ame = ame_ref[...]                                      # (Bt, n_moves, D)
    nm = ame.shape[1]
    g = jnp.maximum(ame.reshape(Bt * nm, D), 0.0)
    g = (jnp.dot(g, w_g[...], preferred_element_type=jnp.float32)
         + b_g[...]).reshape(Bt, nm, D)
    amo_out[...] = pe[:, 0:1, :] * jax.nn.sigmoid(g)        # F.glu => a*sigmoid(g)


# ----------------------------- kernel wrappers --------------------------------
def embed_combine(p, sp, ab_known, it_known, km_sum, moveset_lin, base,
                  ab_mask, it_mask, unk_count, ent_mask):
    lead = sp.shape[:-1]
    D = sp.shape[-1]
    flat = lambda a: a.reshape(-1, a.shape[-1]).astype(jnp.float32)
    inputs = [flat(sp), flat(ab_known), flat(it_known), flat(km_sum),
              flat(moveset_lin), flat(base), flat(ab_mask), flat(it_mask),
              flat(unk_count), flat(ent_mask),
              p["w_abit"], p["b_abit"], p["w_um"], p["b_um"]]
    out = pl.pallas_call(
        functools.partial(_embed_combine_kernel, entity_dim=D),
        out_shape=jax.ShapeDtypeStruct((inputs[0].shape[0], D), jnp.float32),
        in_specs=_vmem_specs(len(inputs)),
        out_specs=_VMEM,
    )(*inputs)
    return out.reshape(*lead, D)


def transformer_tail(p, pe, maskf, active_move_emb):
    Bt, L, D = pe.shape
    inputs = [pe.astype(jnp.float32), maskf.astype(jnp.float32),
              active_move_emb.astype(jnp.float32)]
    for layer in p["transformer"]:
        for rb_ in layer["res_before"]:
            inputs += [rb_["w1"], rb_["b1"], rb_["w2"], rb_["b2"]]
        a = layer["attn"]
        inputs += [a["wqkv"], a["bqkv"], a["wo"], a["bo"]]
        for rb_ in layer["res_after"]:
            inputs += [rb_["w1"], rb_["b1"], rb_["w2"], rb_["b2"]]
    inputs += [p["tovector1"]["w"], p["tovector1"]["b"],
               p["tovector2"]["w"], p["tovector2"]["b"],
               p["move_gate"]["w"], p["move_gate"]["b"]]
    kernel = functools.partial(
        _transformer_tail_kernel,
        num_layers=NUM_LAYERS, num_rb_before=RES_BEFORE, num_rb_after=RES_AFTER,
        num_heads=NUM_HEADS, key_size=KEY_SIZE, value_size=VALUE_SIZE)
    out_shapes = (jax.ShapeDtypeStruct((Bt, L, D), jnp.float32),
                  jax.ShapeDtypeStruct((Bt, OUTPUT_DIM), jnp.float32),
                  jax.ShapeDtypeStruct((Bt, active_move_emb.shape[1], D),
                                       jnp.float32))
    return pl.pallas_call(
        kernel,
        out_shape=out_shapes,
        in_specs=_vmem_specs(len(inputs)),
        out_specs=tuple(_vmem_specs(3)),
    )(*inputs)


# ----------------------------- parameters ------------------------------------
def make_params(seed=1234):
    keys = iter(jax.random.split(jax.random.PRNGKey(seed), 64))

    def lin(fan_in, fan_out):
        w = jax.random.normal(next(keys), (fan_in, fan_out),
                              jnp.float32) / np.sqrt(fan_in)
        b = jnp.zeros((1, fan_out), jnp.float32)
        return {"w": w, "b": b}

    def binary_enc_matrix(n):
        bits = int(math.ceil(math.log2(n)))
        ar = jnp.arange(n)[:, None]
        return ((ar >> jnp.arange(bits)[None, :]) & 1).astype(jnp.float32)

    def sqrt_one_hot_matrix(n):
        idx = jnp.floor(jnp.sqrt(jnp.arange(n, dtype=jnp.float32))).astype(jnp.int32)
        return jnp.eye(int(math.isqrt(n - 1)) + 1, dtype=jnp.float32)[idx]

    p = {}
    # ---- raw parameters (same stand-in construction as reference) ----
    species_onehot = jnp.eye(NUM_SPECIES, dtype=jnp.float32)[:, 1:]
    pokedex = lin(NUM_SPECIES - 1, ENTITY_DIM)
    ability_emb = jax.random.normal(
        next(keys), (NUM_ABILITIES, ENTITY_DIM), jnp.float32) * 0.1
    ability_unknown = lin(ENTITY_DIM, ENTITY_DIM)
    item_onehot = jnp.eye(NUM_ITEMS, dtype=jnp.float32)[:, 1:]
    item_effect_onehot = jnp.eye(NUM_ITEM_EFFECTS + 1, dtype=jnp.float32)[:, 1:]
    item_known = lin((NUM_ITEMS - 1) + NUM_ITEM_EFFECTS, ENTITY_DIM)
    item_unknown = lin(ENTITY_DIM, ENTITY_DIM)
    pp_bin = binary_enc_matrix(64)
    move_raw_onehot = jnp.eye(NUM_MOVES, dtype=jnp.float32)[:, 1:]
    move_embedding = lin((NUM_MOVES - 1) + pp_bin.shape[1], ENTITY_DIM)
    moveset_onehot = lin(NUM_MOVES - 1, ENTITY_DIM)
    unknown_move = lin(ENTITY_DIM, ENTITY_DIM)
    active_onehot = jnp.eye(3, dtype=jnp.float32)[:, 1:]
    fainted_onehot = jnp.eye(3, dtype=jnp.float32)[:, 1:]
    gender_onehot = jnp.eye(NUM_GENDERS + 1, dtype=jnp.float32)[:, 1:]
    status_onehot = jnp.eye(NUM_STATUS + 1, dtype=jnp.float32)[:, 1:]
    sleep_onehot = jnp.eye(4, dtype=jnp.float32)[:, 1:]
    toxic_onehot = sqrt_one_hot_matrix(16)[:, 1:]
    forme_onehot = jnp.eye(NUM_FORMES, dtype=jnp.float32)[:, 1:]
    level_onehot = jnp.eye(100, dtype=jnp.float32)
    hp_onehot = jnp.eye(11, dtype=jnp.float32)[:, 1:]
    p["side_emb"] = jax.random.normal(next(keys), (2, ENTITY_DIM), jnp.float32) * 0.1
    tera_onehot = jnp.eye(2, dtype=jnp.float32)
    tt = jnp.eye(NUM_TYPES + 1, dtype=jnp.float32)[:, 1:]
    tt = tt.at[0].set(jnp.ones((NUM_TYPES,), jnp.float32) / NUM_TYPES)
    teratype_onehot = tt
    teratype_lin = lin(NUM_TYPES, ENTITY_DIM)
    onehot_size = 7 + 10 + 2 + 2 + 3 + 100 + (7 + 3 + 3) + 2  # = 139
    onehots_lin = lin(onehot_size, ENTITY_DIM)

    # ---- fold one-hot @ weight into gather tables (exact) ----
    p["tbl_species"] = species_onehot @ pokedex["w"]              # (ns, D)
    p["species_w_sum"] = jnp.sum(pokedex["w"], axis=0, keepdims=True)
    p["b_pokedex"] = pokedex["b"]
    p["tbl_ability"] = ability_emb
    ni = NUM_ITEMS - 1
    p["tbl_item"] = item_onehot @ item_known["w"][:ni]
    p["tbl_item_effect"] = item_effect_onehot @ item_known["w"][ni:]
    p["b_item"] = item_known["b"]
    nmv = NUM_MOVES - 1
    p["tbl_move"] = move_raw_onehot @ move_embedding["w"][:nmv]
    p["tbl_pp"] = pp_bin @ move_embedding["w"][nmv:]
    p["b_move"] = move_embedding["b"]
    p["tbl_moveset"] = move_raw_onehot @ moveset_onehot["w"]
    p["b_moveset"] = moveset_onehot["b"]
    p["tbl_teratype"] = teratype_onehot @ teratype_lin["w"]
    p["b_teratype"] = teratype_lin["b"]
    seg_mats = [("forme", forme_onehot), ("hp", hp_onehot),
                ("active", active_onehot), ("fainted", fainted_onehot),
                ("gender", gender_onehot), ("level", level_onehot),
                ("status", status_onehot), ("sleep", sleep_onehot),
                ("toxic", toxic_onehot), ("tera", tera_onehot)]
    off = 0
    for name, mat in seg_mats:
        w_seg = onehots_lin["w"][off:off + mat.shape[1]]
        p["tbl_" + name] = mat @ w_seg
        off += mat.shape[1]
    assert off == onehots_lin["w"].shape[0]
    p["b_onehots"] = onehots_lin["b"]

    # fused 'unknown' weights for the embed-combine kernel
    p["w_abit"] = jnp.concatenate([ability_unknown["w"], item_unknown["w"]], axis=1)
    p["b_abit"] = jnp.concatenate([ability_unknown["b"], item_unknown["b"]], axis=1)
    p["w_um"] = unknown_move["w"]
    p["b_um"] = unknown_move["b"]

    # transformer (fused QKV), tovector, move gate
    def rb():
        l1, l2 = lin(ENTITY_DIM, RES_HIDDEN), lin(RES_HIDDEN, ENTITY_DIM)
        return {"w1": l1["w"], "b1": l1["b"], "w2": l2["w"], "b2": l2["b"]}

    layers = []
    for _ in range(NUM_LAYERS):
        aq = lin(ENTITY_DIM, NUM_HEADS * KEY_SIZE)
        ak = lin(ENTITY_DIM, NUM_HEADS * KEY_SIZE)
        av = lin(ENTITY_DIM, NUM_HEADS * VALUE_SIZE)
        ao = lin(NUM_HEADS * VALUE_SIZE, ENTITY_DIM)
        layers.append({
            "attn": {"wqkv": jnp.concatenate([aq["w"], ak["w"], av["w"]], axis=1),
                     "bqkv": jnp.concatenate([aq["b"], ak["b"], av["b"]], axis=1),
                     "wo": ao["w"], "bo": ao["b"]},
            "res_before": [rb() for _ in range(RES_BEFORE)],
            "res_after": [rb() for _ in range(RES_AFTER)],
        })
    p["transformer"] = layers
    p["tovector1"] = lin(ENTITY_DIM, 2 * ENTITY_DIM)
    p["tovector2"] = lin(2 * ENTITY_DIM, OUTPUT_DIM)
    p["move_gate"] = lin(ENTITY_DIM, ENTITY_DIM)
    return p


# ----------------------------- forward pass ----------------------------------
def pokemon_embedding_forward(p, x):
    longs = (x + 1.0).astype(jnp.int32)
    species_token = longs[..., 0]

    # embed_species (folded: one-hot @ W replaced by exact table arithmetic)
    known_emb = p["tbl_species"][species_token]                     # (T,B,N,S,D)
    unrevealed = jnp.sum(species_token[..., :6] == 0, axis=-1,
                         keepdims=True)[..., None]                  # (T,B,N,1,1)
    known_sum = jnp.sum(known_emb, axis=-2, keepdims=True)          # (T,B,N,1,D)
    unknown_emb = ((p["species_w_sum"] - known_sum)
                   / jnp.maximum(unrevealed, 1).astype(jnp.float32))
    species_emb = jnp.where((species_token > 0)[..., None],
                            known_emb, unknown_emb) + p["b_pokedex"]

    # ability / item known branches (gathers)
    ability_token = longs[..., 15]
    ab_known = p["tbl_ability"][ability_token]
    item_token = longs[..., 17]
    item_effect_token = longs[..., 19]
    it_known = (p["tbl_item"][item_token]
                + p["tbl_item_effect"][item_effect_token] + p["b_item"])

    # moveset (folded)
    move_tokens = longs[..., 26:30]
    pp_tokens = jnp.minimum(longs[..., 30:34], 63)
    known_move_emb = (p["tbl_move"][move_tokens] + p["tbl_pp"][pp_tokens]
                      + p["b_move"])                                # (T,B,N,S,4,D)
    move_mask = (move_tokens > 0).astype(jnp.float32)[..., None]
    km_sum = jnp.sum(known_move_emb * move_mask, axis=-2)           # (T,B,N,S,D)
    unk_count = jnp.sum(1.0 - move_mask, axis=-2)                   # (T,B,N,S,1)
    moveset_lin = jnp.sum(p["tbl_moveset"][move_tokens], axis=-2) + p["b_moveset"]

    # purely gathered one-hot / embedding terms summed into one base
    hp_idx = jnp.clip(x[..., 5] * 10.0, 0.0, 10.0).astype(jnp.int32)
    level_token = x[..., 13].astype(jnp.int32)
    side = jnp.clip(longs[..., 37] - 1, 0, 1)
    base = (p["tbl_forme"][longs[..., 1]]
            + p["tbl_hp"][hp_idx]
            + p["tbl_active"][longs[..., 12]]
            + p["tbl_fainted"][longs[..., 11]]
            + p["tbl_gender"][longs[..., 14]]
            + p["tbl_level"][jnp.maximum(level_token, 1) - 1]
            + p["tbl_status"][longs[..., 21]]
            + p["tbl_sleep"][longs[..., 22]]
            + p["tbl_toxic"][longs[..., 23]]
            + p["tbl_tera"][(longs[..., 34] > 0).astype(jnp.int32)]
            + p["b_onehots"]
            + p["side_emb"][side]
            + p["tbl_teratype"][longs[..., 35]] + p["b_teratype"])

    mask = jnp.broadcast_to(jnp.arange(S) < 6, species_token.shape)
    ent_mask = mask.astype(jnp.float32)[..., None]
    ab_mask = (ability_token > 0).astype(jnp.float32)[..., None]
    it_mask = (item_token > 0).astype(jnp.float32)[..., None]

    pokemon_emb = embed_combine(p, species_emb, ab_known, it_known, km_sum,
                                moveset_lin, base, ab_mask, it_mask,
                                unk_count, ent_mask)
    active_move_embeddings = known_move_emb[:, :, 0, 0]             # (T,B,4,D)
    return pokemon_emb, mask, active_move_embeddings


def side_encoder_forward(p, side_x):
    pokemon_emb, mask, active_move_emb = pokemon_embedding_forward(p, side_x)
    Td, Bd, Nd, Sd, D = pokemon_emb.shape
    pe = pokemon_emb.reshape(Td * Bd, Nd * Sd, D)
    maskf = mask.reshape(Td * Bd, Nd * Sd).astype(jnp.float32)
    ame = active_move_emb.reshape(Td * Bd, active_move_emb.shape[2], D)

    pe_out, pooled, amo = transformer_tail(p, pe, maskf, ame)

    pe5 = pe_out.reshape(Td, Bd, Nd, Sd, D)
    pokemon_embedding = pooled.reshape(Td, Bd, OUTPUT_DIM)
    active_pokemon_embedding = pe5[:, :, 0, 0]                      # (T, B, D)
    switch_embeddings = pe5[:, :, 0, :6]                            # (T, B, 6, D)
    active_move_embeddings = amo.reshape(Td, Bd, -1, D)             # (T, B, 4, D)
    return OrderedDict(
        pokemon_embedding=pokemon_embedding,
        switch_embeddings=switch_embeddings,
        active_pokemon_embedding=active_pokemon_embedding,
        active_move_embeddings=active_move_embeddings,
    )


# ----------------------------- main ------------------------------------------
def make_input(seed=0):
    key = jax.random.PRNGKey(seed)
    ks = jax.random.split(key, 20)
    base = (T, B, N, S)

    def ri(k, lo, hi, shape=base):
        return jax.random.randint(k, shape, lo, hi + 1).astype(jnp.float32)

    x = jnp.zeros((T, B, N, S, F), jnp.float32)
    x = x.at[..., 0].set(ri(ks[0], -1, NUM_SPECIES - 2))
    x = x.at[..., 1].set(ri(ks[1], -1, NUM_FORMES - 2))
    x = x.at[..., 5].set(jax.random.uniform(ks[2], base))
    x = x.at[..., 11].set(ri(ks[3], -1, 1))
    x = x.at[..., 12].set(ri(ks[4], -1, 1))
    x = x.at[..., 13].set(ri(ks[5], 1, 100))
    x = x.at[..., 14].set(ri(ks[6], -1, 2))
    x = x.at[..., 15].set(ri(ks[7], -1, NUM_ABILITIES - 2))
    x = x.at[..., 17].set(ri(ks[8], -1, NUM_ITEMS - 2))
    x = x.at[..., 19].set(ri(ks[9], -1, NUM_ITEM_EFFECTS - 1))
    x = x.at[..., 21].set(ri(ks[10], -1, NUM_STATUS - 1))
    x = x.at[..., 22].set(ri(ks[11], -1, 2))
    x = x.at[..., 23].set(ri(ks[12], -1, 14))
    x = x.at[..., 26:30].set(ri(ks[13], -1, NUM_MOVES - 2, base + (4,)))
    x = x.at[..., 30:34].set(ri(ks[14], -1, 62, base + (4,)))
    x = x.at[..., 34].set(ri(ks[15], -1, 1))
    x = x.at[..., 35].set(ri(ks[16], -1, NUM_TYPES - 1))
    x = x.at[..., 37].set(ri(ks[17], 0, 1))
    return x


if __name__ == "__main__":
    params = make_params(seed=1234)
    side_x = make_input(seed=0)
    fwd = jax.jit(side_encoder_forward)
    out = fwd(params, side_x)
    out = jax.block_until_ready(out)
    assert out["pokemon_embedding"].shape == (T, B, OUTPUT_DIM)
    assert out["switch_embeddings"].shape == (T, B, 6, ENTITY_DIM)
    assert out["active_pokemon_embedding"].shape == (T, B, ENTITY_DIM)
    assert out["active_move_embeddings"].shape == (T, B, 4, ENTITY_DIM)
    assert all(bool(jnp.all(jnp.isfinite(v))) for v in out.values())
    print("KERNEL_OK")
</pallas_src>

<mosaic_0001>
module attributes {stable_mosaic.version = 11 : i64} {
  func.func @_embed_combine_kernel(%arg0: memref<96x32xf32, #tpu.memory_space<vmem>>, %arg1: memref<96x32xf32, #tpu.memory_space<vmem>>, %arg2: memref<96x32xf32, #tpu.memory_space<vmem>>, %arg3: memref<96x32xf32, #tpu.memory_space<vmem>>, %arg4: memref<96x32xf32, #tpu.memory_space<vmem>>, %arg5: memref<96x32xf32, #tpu.memory_space<vmem>>, %arg6: memref<96x1xf32, #tpu.memory_space<vmem>>, %arg7: memref<96x1xf32, #tpu.memory_space<vmem>>, %arg8: memref<96x1xf32, #tpu.memory_space<vmem>>, %arg9: memref<96x1xf32, #tpu.memory_space<vmem>>, %arg10: memref<32x64xf32, #tpu.memory_space<vmem>>, %arg11: memref<1x64xf32, #tpu.memory_space<vmem>>, %arg12: memref<32x32xf32, #tpu.memory_space<vmem>>, %arg13: memref<1x32xf32, #tpu.memory_space<vmem>>, %arg14: memref<96x32xf32, #tpu.memory_space<vmem>>) attributes {dimension_semantics = [], scalar_prefetch = 0 : i64, scratch_operands = 0 : i64, tpu.core_type = #tpu.core_type<tc>} {
    %c0 = arith.constant 0 : index
    %c0_0 = arith.constant 0 : index
    %0 = vector.load %arg0[%c0, %c0_0] : memref<96x32xf32, #tpu.memory_space<vmem>>, vector<96x32xf32>
    %cst = arith.constant 0.000000e+00 : f32
    %1 = vector.broadcast %cst : f32 to vector<96x32xf32>
    %2 = arith.maximumf %0, %1 : vector<96x32xf32>
    %c0_1 = arith.constant 0 : index
    %c0_2 = arith.constant 0 : index
    %3 = vector.load %arg10[%c0_1, %c0_2] : memref<32x64xf32, #tpu.memory_space<vmem>>, vector<32x64xf32>
    %cst_3 = arith.constant dense<0.000000e+00> : vector<96x64xf32>
    %4 = tpu.matmul %2, %3, %cst_3 {dimension_numbers = #tpu.dot_dimension_numbers<[1], [0], [0], [1], [0, 0, 1, 1], [], []>} : vector<96x32xf32>, vector<32x64xf32>, vector<96x64xf32> -> vector<96x64xf32>
    %c0_4 = arith.constant 0 : index
    %c0_5 = arith.constant 0 : index
    %5 = vector.load %arg11[%c0_4, %c0_5] : memref<1x64xf32, #tpu.memory_space<vmem>>, vector<1x64xf32>
    %6 = vector.broadcast %5 : vector<1x64xf32> to vector<96x64xf32>
    %7 = arith.addf %4, %6 : vector<96x64xf32>
    %8 = vector.extract_strided_slice %7 {offsets = [0, 0], sizes = [96, 32], strides = [1, 1]} : vector<96x64xf32> to vector<96x32xf32>
    %9 = vector.extract_strided_slice %7 {offsets = [0, 32], sizes = [96, 32], strides = [1, 1]} : vector<96x64xf32> to vector<96x32xf32>
    %c0_6 = arith.constant 0 : index
    %c0_7 = arith.constant 0 : index
    %10 = vector.load %arg4[%c0_6, %c0_7] : memref<96x32xf32, #tpu.memory_space<vmem>>, vector<96x32xf32>
    %11 = arith.addf %10, %0 : vector<96x32xf32>
    %cst_8 = arith.constant 0.000000e+00 : f32
    %12 = vector.broadcast %cst_8 : f32 to vector<96x32xf32>
    %13 = arith.maximumf %11, %12 : vector<96x32xf32>
    %c0_9 = arith.constant 0 : index
    %c0_10 = arith.constant 0 : index
    %14 = vector.load %arg12[%c0_9, %c0_10] : memref<32x32xf32, #tpu.memory_space<vmem>>, vector<32x32xf32>
    %cst_11 = arith.constant dense<0.000000e+00> : vector<96x32xf32>
    %15 = tpu.matmul %13, %14, %cst_11 {dimension_numbers = #tpu.dot_dimension_numbers<[1], [0], [0], [1], [0, 0, 1, 1], [], []>} : vector<96x32xf32>, vector<32x32xf32>, vector<96x32xf32> -> vector<96x32xf32>
    %c0_12 = arith.constant 0 : index
    %c0_13 = arith.constant 0 : index
    %16 = vector.load %arg13[%c0_12, %c0_13] : memref<1x32xf32, #tpu.memory_space<vmem>>, vector<1x32xf32>
    %17 = vector.broadcast %16 : vector<1x32xf32> to vector<96x32xf32>
    %18 = arith.addf %15, %17 : vector<96x32xf32>
    %c0_14 = arith.constant 0 : index
    %c0_15 = arith.constant 0 : index
    %19 = vector.load %arg6[%c0_14, %c0_15] : memref<96x1xf32, #tpu.memory_space<vmem>>, vector<96x1xf32>
    %cst_16 = arith.constant 0.000000e+00 : f32
    %20 = vector.broadcast %cst_16 : f32 to vector<96x1xf32>
    %21 = arith.cmpf ogt, %19, %20 : vector<96x1xf32>
    %c0_17 = arith.constant 0 : index
    %c0_18 = arith.constant 0 : index
    %22 = vector.load %arg1[%c0_17, %c0_18] : memref<96x32xf32, #tpu.memory_space<vmem>>, vector<96x32xf32>
    %23 = vector.shape_cast %21 : vector<96x1xi1> to vector<96x1xi1>
    %24 = vector.broadcast %23 : vector<96x1xi1> to vector<96x32xi1>
    %25 = arith.select %24, %22, %8 : vector<96x32xi1>, vector<96x32xf32>
    %c0_19 = arith.constant 0 : index
    %c0_20 = arith.constant 0 : index
    %26 = vector.load %arg7[%c0_19, %c0_20] : memref<96x1xf32, #tpu.memory_space<vmem>>, vector<96x1xf32>
    %cst_21 = arith.constant 0.000000e+00 : f32
    %27 = vector.broadcast %cst_21 : f32 to vector<96x1xf32>
    %28 = arith.cmpf ogt, %26, %27 : vector<96x1xf32>
    %c0_22 = arith.constant 0 : index
    %c0_23 = arith.constant 0 : index
    %29 = vector.load %arg2[%c0_22, %c0_23] : memref<96x32xf32, #tpu.memory_space<vmem>>, vector<96x32xf32>
    %30 = vector.shape_cast %28 : vector<96x1xi1> to vector<96x1xi1>
    %31 = vector.broadcast %30 : vector<96x1xi1> to vector<96x32xi1>
    %32 = arith.select %31, %29, %9 : vector<96x32xi1>, vector<96x32xf32>
    %c0_24 = arith.constant 0 : index
    %c0_25 = arith.constant 0 : index
    %33 = vector.load %arg3[%c0_24, %c0_25] : memref<96x32xf32, #tpu.memory_space<vmem>>, vector<96x32xf32>
    %c0_26 = arith.constant 0 : index
    %c0_27 = arith.constant 0 : index
    %34 = vector.load %arg8[%c0_26, %c0_27] : memref<96x1xf32, #tpu.memory_space<vmem>>, vector<96x1xf32>
    %35 = vector.broadcast %34 : vector<96x1xf32> to vector<96x32xf32>
    %36 = arith.mulf %35, %18 : vector<96x32xf32>
    %37 = arith.addf %33, %36 : vector<96x32xf32>
    %38 = arith.addf %0, %25 : vector<96x32xf32>
    %39 = arith.addf %38, %32 : vector<96x32xf32>
    %40 = arith.addf %39, %37 : vector<96x32xf32>
    %c0_28 = arith.constant 0 : index
    %c0_29 = arith.constant 0 : index
    %41 = vector.load %arg5[%c0_28, %c0_29] : memref<96x32xf32, #tpu.memory_space<vmem>>, vector<96x32xf32>
    %42 = arith.addf %40, %41 : vector<96x32xf32>
    %c0_30 = arith.constant 0 : index
    %c0_31 = arith.constant 0 : index
    %43 = vector.load %arg9[%c0_30, %c0_31] : memref<96x1xf32, #tpu.memory_space<vmem>>, vector<96x1xf32>
    %44 = vector.broadcast %43 : vector<96x1xf32> to vector<96x32xf32>
    %45 = arith.mulf %42, %44 : vector<96x32xf32>
    %c0_32 = arith.constant 0 : index
    %c0_33 = arith.constant 0 : index
    %46 = vector.load %arg14[%c0_32, %c0_33] : memref<96x32xf32, #tpu.memory_space<vmem>>, vector<96x32xf32>
    tpu.vector_store %arg14[%c0_32, %c0_33], %45 {strides = array<i32>} : memref<96x32xf32, #tpu.memory_space<vmem>>, vector<96x32xf32>,
    return
  }
}

module attributes {stable_mosaic.version = 11 : i64} {
  func.func @_transformer_tail_kernel(%arg0: memref<4x24x32xf32, #tpu.memory_space<vmem>>, %arg1: memref<4x24xf32, #tpu.memory_space<vmem>>, %arg2: memref<4x4x32xf32, #tpu.memory_space<vmem>>, %arg3: memref<32x32xf32, #tpu.memory_space<vmem>>, %arg4: memref<1x32xf32, #tpu.memory_space<vmem>>, %arg5: memref<32x32xf32, #tpu.memory_space<vmem>>, %arg6: memref<1x32xf32, #tpu.memory_space<vmem>>, %arg7: memref<32x96xf32, #tpu.memory_space<vmem>>, %arg8: memref<1x96xf32, #tpu.memory_space<vmem>>, %arg9: memref<32x32xf32, #tpu.memory_space<vmem>>, %arg10: memref<1x32xf32, #tpu.memory_space<vmem>>, %arg11: memref<32x32xf32, #tpu.memory_space<vmem>>, %arg12: memref<1x32xf32, #tpu.memory_space<vmem>>, %arg13: memref<32x32xf32, #tpu.memory_space<vmem>>, %arg14: memref<1x32xf32, #tpu.memory_space<vmem>>, %arg15: memref<32x64xf32, #tpu.memory_space<vmem>>, %arg16: memref<1x64xf32, #tpu.memory_space<vmem>>, %arg17: memref<64x64xf32, #tpu.memory_space<vmem>>, %arg18: memref<1x64xf32, #tpu.memory_space<vmem>>, %arg19: memref<32x32xf32, #tpu.memory_space<vmem>>, %arg20: memref<1x32xf32, #tpu.memory_space<vmem>>, %arg21: memref<4x24x32xf32, #tpu.memory_space<vmem>>, %arg22: memref<4x64xf32, #tpu.memory_space<vmem>>, %arg23: memref<4x4x32xf32, #tpu.memory_space<vmem>>) attributes {dimension_semantics = [], scalar_prefetch = 0 : i64, scratch_operands = 0 : i64, tpu.core_type = #tpu.core_type<tc>} {
    %c0 = arith.constant 0 : index
    %c0_0 = arith.constant 0 : index
    %c0_1 = arith.constant 0 : index
    %0 = vector.load %arg0[%c0, %c0_0, %c0_1] : memref<4x24x32xf32, #tpu.memory_space<vmem>>, vector<4x24x32xf32>
    %c0_2 = arith.constant 0 : index
    %c0_3 = arith.constant 0 : index
    %1 = vector.load %arg1[%c0_2, %c0_3] : memref<4x24xf32, #tpu.memory_space<vmem>>, vector<4x24xf32>
    %2 = vector.shape_cast %1 : vector<4x24xf32> to vector<4x24x1xf32>
    %3 = vector.shape_cast %1 : vector<4x24xf32> to vector<4x1x24xf32>
    %cst = arith.constant 1.000000e+00 : f32
    %4 = vector.broadcast %cst : f32 to vector<4x1x24xf32>
    %5 = arith.subf %3, %4 : vector<4x1x24xf32>
    %cst_4 = arith.constant 1.000000e+09 : f32
    %6 = vector.broadcast %cst_4 : f32 to vector<4x1x24xf32>
    %7 = arith.mulf %5, %6 : vector<4x1x24xf32>
    %8 = vector.shape_cast %0 : vector<4x24x32xf32> to vector<96x32xf32>
    %cst_5 = arith.constant 0.000000e+00 : f32
    %9 = vector.broadcast %cst_5 : f32 to vector<96x32xf32>
    %10 = arith.maximumf %8, %9 : vector<96x32xf32>
    %c0_6 = arith.constant 0 : index
    %c0_7 = arith.constant 0 : index
    %11 = vector.load %arg3[%c0_6, %c0_7] : memref<32x32xf32, #tpu.memory_space<vmem>>, vector<32x32xf32>
    %cst_8 = arith.constant dense<0.000000e+00> : vector<96x32xf32>
    %12 = tpu.matmul %10, %11, %cst_8 {dimension_numbers = #tpu.dot_dimension_numbers<[1], [0], [0], [1], [0, 0, 1, 1], [], []>} : vector<96x32xf32>, vector<32x32xf32>, vector<96x32xf32> -> vector<96x32xf32>
    %c0_9 = arith.constant 0 : index
    %c0_10 = arith.constant 0 : index
    %13 = vector.load %arg4[%c0_9, %c0_10] : memref<1x32xf32, #tpu.memory_space<vmem>>, vector<1x32xf32>
    %14 = vector.broadcast %13 : vector<1x32xf32> to vector<96x32xf32>
    %15 = arith.addf %12, %14 : vector<96x32xf32>
    %cst_11 = arith.constant 0.000000e+00 : f32
    %16 = vector.broadcast %cst_11 : f32 to vector<96x32xf32>
    %17 = arith.maximumf %15, %16 : vector<96x32xf32>
    %c0_12 = arith.constant 0 : index
    %c0_13 = arith.constant 0 : index
    %18 = vector.load %arg5[%c0_12, %c0_13] : memref<32x32xf32, #tpu.memory_space<vmem>>, vector<32x32xf32>
    %cst_14 = arith.constant dense<0.000000e+00> : vector<96x32xf32>
    %19 = tpu.matmul %17, %18, %cst_14 {dimension_numbers = #tpu.dot_dimension_numbers<[1], [0], [0], [1], [0, 0, 1, 1], [], []>} : vector<96x32xf32>, vector<32x32xf32>, vector<96x32xf32> -> vector<96x32xf32>
    %c0_15 = arith.constant 0 : index
    %c0_16 = arith.constant 0 : index
    %20 = vector.load %arg6[%c0_15, %c0_16] : memref<1x32xf32, #tpu.memory_space<vmem>>, vector<1x32xf32>
    %21 = vector.broadcast %20 : vector<1x32xf32> to vector<96x32xf32>
    %22 = arith.addf %19, %21 : vector<96x32xf32>
    %23 = arith.addf %8, %22 : vector<96x32xf32>
    %c0_17 = arith.constant 0 : index
    %c0_18 = arith.constant 0 : index
    %24 = vector.load %arg7[%c0_17, %c0_18] : memref<32x96xf32, #tpu.memory_space<vmem>>, vector<32x96xf32>
    %cst_19 = arith.constant dense<0.000000e+00> : vector<96x96xf32>
    %25 = tpu.matmul %23, %24, %cst_19 {dimension_numbers = #tpu.dot_dimension_numbers<[1], [0], [0], [1], [0, 0, 1, 1], [], []>} : vector<96x32xf32>, vector<32x96xf32>, vector<96x96xf32> -> vector<96x96xf32>
    %c0_20 = arith.constant 0 : index
    %c0_21 = arith.constant 0 : index
    %26 = vector.load %arg8[%c0_20, %c0_21] : memref<1x96xf32, #tpu.memory_space<vmem>>, vector<1x96xf32>
    %27 = vector.broadcast %26 : vector<1x96xf32> to vector<96x96xf32>
    %28 = arith.addf %25, %27 : vector<96x96xf32>
    %29 = vector.extract_strided_slice %28 {offsets = [0, 0], sizes = [96, 32], strides = [1, 1]} : vector<96x96xf32> to vector<96x32xf32>
    %30 = vector.shape_cast %29 : vector<96x32xf32> to vector<4x24x32xf32>
    %31 = vector.extract_strided_slice %28 {offsets = [0, 32], sizes = [96, 32], strides = [1, 1]} : vector<96x96xf32> to vector<96x32xf32>
    %32 = vector.shape_cast %31 : vector<96x32xf32> to vector<4x24x32xf32>
    %33 = vector.extract_strided_slice %28 {offsets = [0, 64], sizes = [96, 32], strides = [1, 1]} : vector<96x96xf32> to vector<96x32xf32>
    %34 = vector.shape_cast %33 : vector<96x32xf32> to vector<4x24x32xf32>
    %35 = vector.extract_strided_slice %30 {offsets = [0, 0, 0], sizes = [4, 24, 16], strides = [1, 1, 1]} : vector<4x24x32xf32> to vector<4x24x16xf32>
    %36 = vector.extract_strided_slice %32 {offsets = [0, 0, 0], sizes = [4, 24, 16], strides = [1, 1, 1]} : vector<4x24x32xf32> to vector<4x24x16xf32>
    %37 = vector.extract_strided_slice %34 {offsets = [0, 0, 0], sizes = [4, 24, 16], strides = [1, 1, 1]} : vector<4x24x32xf32> to vector<4x24x16xf32>
    "tpu.trace_start"() <{level = 10 : i32, message = "blk,bmk->blm"}> : () -> ()
    %cst_22 = arith.constant dense<0.000000e+00> : vector<4x24x24xf32>
    %38 = tpu.matmul %35, %36, %cst_22 {dimension_numbers = #tpu.dot_dimension_numbers<[2], [2], [1], [1], [0, 0, 0, 1, 1, 1], [0], [0]>} : vector<4x24x16xf32>, vector<4x24x16xf32>, vector<4x24x24xf32> -> vector<4x24x24xf32>
    "tpu.trace_stop"() : () -> ()
    %cst_23 = arith.constant 2.500000e-01 : f32
    %39 = vector.broadcast %cst_23 : f32 to vector<4x24x24xf32>
    %40 = arith.mulf %38, %39 : vector<4x24x24xf32>
    %41 = vector.broadcast %7 : vector<4x1x24xf32> to vector<4x24x24xf32>
    %42 = arith.addf %40, %41 : vector<4x24x24xf32>
    %cst_24 = arith.constant dense<0xFF800000> : vector<4x24xf32>
    %43 = vector.multi_reduction <maximumf>, %42, %cst_24 [2] : vector<4x24x24xf32> to vector<4x24xf32>
    %44 = vector.shape_cast %43 : vector<4x24xf32> to vector<4x24x1xf32>
    %45 = vector.broadcast %44 : vector<4x24x1xf32> to vector<4x24x24xf32>
    %46 = arith.subf %42, %45 : vector<4x24x24xf32>
    %47 = math.exp %46 : vector<4x24x24xf32>
    %cst_25 = arith.constant dense<0.000000e+00> : vector<4x24xf32>
    %48 = vector.multi_reduction <add>, %47, %cst_25 [2] : vector<4x24x24xf32> to vector<4x24xf32>
    %49 = vector.shape_cast %48 : vector<4x24xf32> to vector<4x24x1xf32>
    %50 = tpu.reciprocal %49 {approx = true} : vector<4x24x1xf32> -> vector<4x24x1xf32>
    %51 = vector.broadcast %50 : vector<4x24x1xf32> to vector<4x24x24xf32>
    %52 = arith.mulf %47, %51 : vector<4x24x24xf32>
    "tpu.trace_start"() <{level = 10 : i32, message = "blm,bmv->blv"}> : () -> ()
    %cst_26 = arith.constant dense<0.000000e+00> : vector<4x24x16xf32>
    %53 = tpu.matmul %52, %37, %cst_26 {dimension_numbers = #tpu.dot_dimension_numbers<[2], [1], [1], [2], [0, 0, 0, 1, 1, 2], [0], [0]>} : vector<4x24x24xf32>, vector<4x24x16xf32>, vector<4x24x16xf32> -> vector<4x24x16xf32>
    "tpu.trace_stop"() : () -> ()
    %54 = vector.extract_strided_slice %30 {offsets = [0, 0, 16], sizes = [4, 24, 16], strides = [1, 1, 1]} : vector<4x24x32xf32> to vector<4x24x16xf32>
    %55 = vector.extract_strided_slice %32 {offsets = [0, 0, 16], sizes = [4, 24, 16], strides = [1, 1, 1]} : vector<4x24x32xf32> to vector<4x24x16xf32>
    %56 = vector.extract_strided_slice %34 {offsets = [0, 0, 16], sizes = [4, 24, 16], strides = [1, 1, 1]} : vector<4x24x32xf32> to vector<4x24x16xf32>
    "tpu.trace_start"() <{level = 10 : i32, message = "blk,bmk->blm"}> : () -> ()
    %cst_27 = arith.constant dense<0.000000e+00> : vector<4x24x24xf32>
    %57 = tpu.matmul %54, %55, %cst_27 {dimension_numbers = #tpu.dot_dimension_numbers<[2], [2], [1], [1], [0, 0, 0, 1, 1, 1], [0], [0]>} : vector<4x24x16xf32>, vector<4x24x16xf32>, vector<4x24x24xf32> -> vector<4x24x24xf32>
    "tpu.trace_stop"() : () -> ()
    %cst_28 = arith.constant 2.500000e-01 : f32
    %58 = vector.broadcast %cst_28 : f32 to vector<4x24x24xf32>
    %59 = arith.mulf %57, %58 : vector<4x24x24xf32>
    %60 = vector.broadcast %7 : vector<4x1x24xf32> to vector<4x24x24xf32>
    %61 = arith.addf %59, %60 : vector<4x24x24xf32>
    %cst_29 = arith.constant dense<0xFF800000> : vector<4x24xf32>
    %62 = vector.multi_reduction <maximumf>, %61, %cst_29 [2] : vector<4x24x24xf32> to vector<4x24xf32>
    %63 = vector.shape_cast %62 : vector<4x24xf32> to vector<4x24x1xf32>
    %64 = vector.broadcast %63 : vector<4x24x1xf32> to vector<4x24x24xf32>
    %65 = arith.subf %61, %64 : vector<4x24x24xf32>
    %66 = math.exp %65 : vector<4x24x24xf32>
    %cst_30 = arith.constant dense<0.000000e+00> : vector<4x24xf32>
    %67 = vector.multi_reduction <add>, %66, %cst_30 [2] : vector<4x24x24xf32> to vector<4x24xf32>
    %68 = vector.shape_cast %67 : vector<4x24xf32> to vector<4x24x1xf32>
    %69 = tpu.reciprocal %68 {approx = true} : vector<4x24x1xf32> -> vector<4x24x1xf32>
    %70 = vector.broadcast %69 : vector<4x24x1xf32> to vector<4x24x24xf32>
    %71 = arith.mulf %66, %70 : vector<4x24x24xf32>
    "tpu.trace_start"() <{level = 10 : i32, message = "blm,bmv->blv"}> : () -> ()
    %cst_31 = arith.constant dense<0.000000e+00> : vector<4x24x16xf32>
    %72 = tpu.matmul %71, %56, %cst_31 {dimension_numbers = #tpu.dot_dimension_numbers<[2], [1], [1], [2], [0, 0, 0, 1, 1, 2], [0], [0]>} : vector<4x24x24xf32>, vector<4x24x16xf32>, vector<4x24x16xf32> -> vector<4x24x16xf32>
    "tpu.trace_stop"() : () -> ()
    %73 = tpu.concatenate %53, %72 in 2 : vector<4x24x16xf32>, vector<4x24x16xf32> -> vector<4x24x32xf32>
    %74 = vector.shape_cast %73 : vector<4x24x32xf32> to vector<96x32xf32>
    %c0_32 = arith.constant 0 : index
    %c0_33 = arith.constant 0 : index
    %75 = vector.load %arg9[%c0_32, %c0_33] : memref<32x32xf32, #tpu.memory_space<vmem>>, vector<32x32xf32>
    %cst_34 = arith.constant dense<0.000000e+00> : vector<96x32xf32>
    %76 = tpu.matmul %74, %75, %cst_34 {dimension_numbers = #tpu.dot_dimension_numbers<[1], [0], [0], [1], [0, 0, 1, 1], [], []>} : vector<96x32xf32>, vector<32x32xf32>, vector<96x32xf32> -> vector<96x32xf32>
    %c0_35 = arith.constant 0 : index
    %c0_36 = arith.constant 0 : index
    %77 = vector.load %arg10[%c0_35, %c0_36] : memref<1x32xf32, #tpu.memory_space<vmem>>, vector<1x32xf32>
    %78 = vector.broadcast %77 : vector<1x32xf32> to vector<96x32xf32>
    %79 = arith.addf %76, %78 : vector<96x32xf32>
    %80 = vector.shape_cast %79 : vector<96x32xf32> to vector<4x24x32xf32>
    %81 = vector.broadcast %2 : vector<4x24x1xf32> to vector<4x24x32xf32>
    %82 = arith.mulf %80, %81 : vector<4x24x32xf32>
    %83 = arith.addf %0, %82 : vector<4x24x32xf32>
    %84 = vector.shape_cast %83 : vector<4x24x32xf32> to vector<96x32xf32>
    %cst_37 = arith.constant 0.000000e+00 : f32
    %85 = vector.broadcast %cst_37 : f32 to vector<96x32xf32>
    %86 = arith.maximumf %84, %85 : vector<96x32xf32>
    %c0_38 = arith.constant 0 : index
    %c0_39 = arith.constant 0 : index
    %87 = vector.load %arg11[%c0_38, %c0_39] : memref<32x32xf32, #tpu.memory_space<vmem>>, vector<32x32xf32>
    %cst_40 = arith.constant dense<0.000000e+00> : vector<96x32xf32>
    %88 = tpu.matmul %86, %87, %cst_40 {dimension_numbers = #tpu.dot_dimension_numbers<[1], [0], [0], [1], [0, 0, 1, 1], [], []>} : vector<96x32xf32>, vector<32x32xf32>, vector<96x32xf32> -> vector<96x32xf32>
    %c0_41 = arith.constant 0 : index
    %c0_42 = arith.constant 0 : index
    %89 = vector.load %arg12[%c0_41, %c0_42] : memref<1x32xf32, #tpu.memory_space<vmem>>, vector<1x32xf32>
    %90 = vector.broadcast %89 : vector<1x32xf32> to vector<96x32xf32>
    %91 = arith.addf %88, %90 : vector<96x32xf32>
    %cst_43 = arith.constant 0.000000e+00 : f32
    %92 = vector.broadcast %cst_43 : f32 to vector<96x32xf32>
    %93 = arith.maximumf %91, %92 : vector<96x32xf32>
    %c0_44 = arith.constant 0 : index
    %c0_45 = arith.constant 0 : index
    %94 = vector.load %arg13[%c0_44, %c0_45] : memref<32x32xf32, #tpu.memory_space<vmem>>, vector<32x32xf32>
    %cst_46 = arith.constant dense<0.000000e+00> : vector<96x32xf32>
    %95 = tpu.matmul %93, %94, %cst_46 {dimension_numbers = #tpu.dot_dimension_numbers<[1], [0], [0], [1], [0, 0, 1, 1], [], []>} : vector<96x32xf32>, vector<32x32xf32>, vector<96x32xf32> -> vector<96x32xf32>
    %c0_47 = arith.constant 0 : index
    %c0_48 = arith.constant 0 : index
    %96 = vector.load %arg14[%c0_47, %c0_48] : memref<1x32xf32, #tpu.memory_space<vmem>>, vector<1x32xf32>
    %97 = vector.broadcast %96 : vector<1x32xf32> to vector<96x32xf32>
    %98 = arith.addf %95, %97 : vector<96x32xf32>
    %99 = arith.addf %84, %98 : vector<96x32xf32>
    %100 = vector.shape_cast %99 : vector<96x32xf32> to vector<4x24x32xf32>
    %101 = vector.broadcast %2 : vector<4x24x1xf32> to vector<4x24x32xf32>
    %102 = arith.mulf %100, %101 : vector<4x24x32xf32>
    %103 = arith.addf %83, %102 : vector<4x24x32xf32>
    %104 = vector.broadcast %2 : vector<4x24x1xf32> to vector<4x24x32xf32>
    %105 = arith.mulf %103, %104 : vector<4x24x32xf32>
    %c0_49 = arith.constant 0 : index
    %c0_50 = arith.constant 0 : index
    %c0_51 = arith.constant 0 : index
    %106 = vector.load %arg21[%c0_49, %c0_50, %c0_51] : memref<4x24x32xf32, #tpu.memory_space<vmem>>, vector<4x24x32xf32>
    tpu.vector_store %arg21[%c0_49, %c0_50, %c0_51], %105 {strides = array<i32>} : memref<4x24x32xf32, #tpu.memory_space<vmem>>, vector<4x24x32xf32>,
    %107 = vector.shape_cast %105 : vector<4x24x32xf32> to vector<96x32xf32>
    %cst_52 = arith.constant 0.000000e+00 : f32
    %108 = vector.broadcast %cst_52 : f32 to vector<96x32xf32>
    %109 = arith.maximumf %107, %108 : vector<96x32xf32>
    %c0_53 = arith.constant 0 : index
    %c0_54 = arith.constant 0 : index
    %110 = vector.load %arg15[%c0_53, %c0_54] : memref<32x64xf32, #tpu.memory_space<vmem>>, vector<32x64xf32>
    %cst_55 = arith.constant dense<0.000000e+00> : vector<96x64xf32>
    %111 = tpu.matmul %109, %110, %cst_55 {dimension_numbers = #tpu.dot_dimension_numbers<[1], [0], [0], [1], [0, 0, 1, 1], [], []>} : vector<96x32xf32>, vector<32x64xf32>, vector<96x64xf32> -> vector<96x64xf32>
    %c0_56 = arith.constant 0 : index
    %c0_57 = arith.constant 0 : index
    %112 = vector.load %arg16[%c0_56, %c0_57] : memref<1x64xf32, #tpu.memory_space<vmem>>, vector<1x64xf32>
    %113 = vector.broadcast %112 : vector<1x64xf32> to vector<96x64xf32>
    %114 = arith.addf %111, %113 : vector<96x64xf32>
    %115 = vector.shape_cast %114 : vector<96x64xf32> to vector<4x24x64xf32>
    %116 = vector.broadcast %2 : vector<4x24x1xf32> to vector<4x24x64xf32>
    %117 = arith.mulf %115, %116 : vector<4x24x64xf32>
    %cst_58 = arith.constant dense<0.000000e+00> : vector<4x64xf32>
    %118 = vector.multi_reduction <add>, %117, %cst_58 [1] : vector<4x24x64xf32> to vector<4x64xf32>
    %cst_59 = arith.constant dense<0.000000e+00> : vector<4xf32>
    %119 = vector.multi_reduction <add>, %1, %cst_59 [1] : vector<4x24xf32> to vector<4xf32>
    %120 = vector.shape_cast %119 : vector<4xf32> to vector<4x1xf32>
    %cst_60 = arith.constant 1.000000e+00 : f32
    %121 = vector.broadcast %cst_60 : f32 to vector<4x1xf32>
    %122 = arith.maximumf %120, %121 : vector<4x1xf32>
    %123 = tpu.reciprocal %122 {approx = true} : vector<4x1xf32> -> vector<4x1xf32>
    %124 = vector.broadcast %123 : vector<4x1xf32> to vector<4x64xf32>
    %125 = arith.mulf %118, %124 : vector<4x64xf32>
    %cst_61 = arith.constant 0.000000e+00 : f32
    %126 = vector.broadcast %cst_61 : f32 to vector<4x64xf32>
    %127 = arith.maximumf %125, %126 : vector<4x64xf32>
    %c0_62 = arith.constant 0 : index
    %c0_63 = arith.constant 0 : index
    %128 = vector.load %arg17[%c0_62, %c0_63] : memref<64x64xf32, #tpu.memory_space<vmem>>, vector<64x64xf32>
    %cst_64 = arith.constant dense<0.000000e+00> : vector<4x64xf32>
    %129 = tpu.matmul %127, %128, %cst_64 {dimension_numbers = #tpu.dot_dimension_numbers<[1], [0], [0], [1], [0, 0, 1, 1], [], []>} : vector<4x64xf32>, vector<64x64xf32>, vector<4x64xf32> -> vector<4x64xf32>
    %c0_65 = arith.constant 0 : index
    %c0_66 = arith.constant 0 : index
    %130 = vector.load %arg18[%c0_65, %c0_66] : memref<1x64xf32, #tpu.memory_space<vmem>>, vector<1x64xf32>
    %131 = vector.broadcast %130 : vector<1x64xf32> to vector<4x64xf32>
    %132 = arith.addf %129, %131 : vector<4x64xf32>
    %c0_67 = arith.constant 0 : index
    %c0_68 = arith.constant 0 : index
    %133 = vector.load %arg22[%c0_67, %c0_68] : memref<4x64xf32, #tpu.memory_space<vmem>>, vector<4x64xf32>
    tpu.vector_store %arg22[%c0_67, %c0_68], %132 {strides = array<i32>} : memref<4x64xf32, #tpu.memory_space<vmem>>, vector<4x64xf32>,
    %c0_69 = arith.constant 0 : index
    %c0_70 = arith.constant 0 : index
    %c0_71 = arith.constant 0 : index
    %134 = vector.load %arg2[%c0_69, %c0_70, %c0_71] : memref<4x4x32xf32, #tpu.memory_space<vmem>>, vector<4x4x32xf32>
    %135 = vector.shape_cast %134 : vector<4x4x32xf32> to vector<16x32xf32>
    %cst_72 = arith.constant 0.000000e+00 : f32
    %136 = vector.broadcast %cst_72 : f32 to vector<16x32xf32>
    %137 = arith.maximumf %135, %136 : vector<16x32xf32>
    %c0_73 = arith.constant 0 : index
    %c0_74 = arith.constant 0 : index
    %138 = vector.load %arg19[%c0_73, %c0_74] : memref<32x32xf32, #tpu.memory_space<vmem>>, vector<32x32xf32>
    %cst_75 = arith.constant dense<0.000000e+00> : vector<16x32xf32>
    %139 = tpu.matmul %137, %138, %cst_75 {dimension_numbers = #tpu.dot_dimension_numbers<[1], [0], [0], [1], [0, 0, 1, 1], [], []>} : vector<16x32xf32>, vector<32x32xf32>, vector<16x32xf32> -> vector<16x32xf32>
    %c0_76 = arith.constant 0 : index
    %c0_77 = arith.constant 0 : index
    %140 = vector.load %arg20[%c0_76, %c0_77] : memref<1x32xf32, #tpu.memory_space<vmem>>, vector<1x32xf32>
    %141 = vector.broadcast %140 : vector<1x32xf32> to vector<16x32xf32>
    %142 = arith.addf %139, %141 : vector<16x32xf32>
    %143 = vector.shape_cast %142 : vector<16x32xf32> to vector<4x4x32xf32>
    %144 = vector.extract_strided_slice %105 {offsets = [0, 0, 0], sizes = [4, 1, 32], strides = [1, 1, 1]} : vector<4x24x32xf32> to vector<4x1x32xf32>
    %145 = arith.negf %143 : vector<4x4x32xf32>
    %146 = math.exp %145 : vector<4x4x32xf32>
    %cst_78 = arith.constant 1.000000e+00 : f32
    %147 = vector.broadcast %cst_78 : f32 to vector<4x4x32xf32>
    %148 = arith.addf %147, %146 : vector<4x4x32xf32>
    %149 = arith.divf %147, %148 : vector<4x4x32xf32>
    %150 = vector.broadcast %144 : vector<4x1x32xf32> to vector<4x4x32xf32>
    %151 = arith.mulf %150, %149 : vector<4x4x32xf32>
    %c0_79 = arith.constant 0 : index
    %c0_80 = arith.constant 0 : index
    %c0_81 = arith.constant 0 : index
    %152 = vector.load %arg23[%c0_79, %c0_80, %c0_81] : memref<4x4x32xf32, #tpu.memory_space<vmem>>, vector<4x4x32xf32>
    tpu.vector_store %arg23[%c0_79, %c0_80, %c0_81], %151 {strides = array<i32>} : memref<4x4x32xf32, #tpu.memory_space<vmem>>, vector<4x4x32xf32>,
    return
  }
}

</mosaic_0001>

<bundles_post_ra>
// kernel: side_encoder_forward.2
= control target key start
LH: loop header
LB: loop body
LE: loop exit
PB: predicated region body
PF: predicated region fallthrough
CT: control target
= control target key end

     0   :  { %v873_v2 = vmov 0   ;;  %vm79_vm3 = vcmask 261120   ;;  %s874_s17 = smov 96   ;;  %s1686_s10 = inlined_call_operand.vmem [shape: f32[32,64], index: 10, kind: input, shape index: {}]   ;;  %s1687_s12 = inlined_call_operand.vmem [shape: f32[32,32], index: 12, kind: input, shape index: {}]   ;;  %s1688_s6 = inlined_call_operand.vmem [shape: f32[96,1], index: 6, kind: input, shape index: {}]   ;;  %s1689_s0 = inlined_call_operand.vmem [shape: f32[96,32], index: 0, kind: input, shape index: {}]   ;;  %s1690_s4 = inlined_call_operand.vmem [shape: f32[96,32], index: 4, kind: input, shape index: {}]   ;;  %s1691_s11 = inlined_call_operand.vmem [shape: f32[1,64], index: 11, kind: input, shape index: {}]   ;;  %s1692_s13 = inlined_call_operand.vmem [shape: f32[1,32], index: 13, kind: input, shape index: {}]   ;;  %s1693_s7 = inlined_call_operand.vmem [shape: f32[96,1], index: 7, kind: input, shape index: {}]   ;;  %s1694_s8 = inlined_call_operand.vmem [shape: f32[96,1], index: 8, kind: input, shape index: {}]   ;;  %s1695_s9 = inlined_call_operand.vmem [shape: f32[96,1], index: 9, kind: input, shape index: {}]   ;;  %s1696_s1 = inlined_call_operand.vmem [shape: f32[96,32], index: 1, kind: input, shape index: {}]   ;;  %s1697_s2 = inlined_call_operand.vmem [shape: f32[96,32], index: 2, kind: input, shape index: {}]   ;;  %s1698_s3 = inlined_call_operand.vmem [shape: f32[96,32], index: 3, kind: input, shape index: {}]   ;;  %s1699_s5 = inlined_call_operand.vmem [shape: f32[96,32], index: 5, kind: input, shape index: {}]   ;;  %s1700_s14 = inlined_call_operand.vmem [shape: f32[96,32], index: 14, kind: output, shape index: {}]  }
   0x1   :  { %v74_v0 = vld [vmem:[%s1686_s10 + $0x18] sm:$0xff]  ;;  %870 = vset.pattern.permute.xlu2 %v873_v2  ;;  %869 = vset.pattern.permute.xlu1 %v873_v2  ;;  %v73_v3 = vld [vmem:[%s1686_s10 + $0x10] sm:$0xff]  ;;  %v306_v5 = vld [vmem:[%s1688_s6 + $0x20] sm:$0xff] }
   0x2   :  { %v208_v1 = vld [vmem:[%s1687_s12 + $0x18] sm:$0xff]  ;;  %128 = vmatpush.msra.mxu0 %v74_v0  ;;  %858 = vmatpush.msra.mxu2 %v74_v0  ;;  %v207_v4 = vld [vmem:[%s1687_s12 + $0x10] sm:$0xff]  ;;  %vm318_vm0 = vcmp.gt.f32.partialorder %v306_v5, 0.0  ;;  %v302_v7 = vld [vmem:[%s1688_s6] sm:$0xff] }
   0x3   :  { %v304_v6 = vld [vmem:[%s1688_s6 + $0x10] sm:$0xff]  ;;  %261 = vmatpush.msra.mxu1 %v208_v1  ;;  %862 = vmatpush.msra.mxu3 %v208_v1  ;;  %v342_v8 = vsel %vm318_vm0, 1, %v873_v2  ;;  %vm314_vm2 = vcmp.gt.f32.partialorder %v302_v7, 0.0  ;;  %v72_v10 = vld [vmem:[%s1686_s10 + $0x8] sm:$0xff]  ;;  %v985_v12 = vld [vmem:[%s1689_s0] sm:$0xff] }
   0x4   :  { %vm316_vm1 = vcmp.gt.f32.partialorder %v304_v6, 0.0  ;;  %868 = vset.pattern.permute.xlu0 %v873_v2  ;;  %129 = vmatpush.msra.mxu0 %v73_v3  ;;  %v206_v11 = vld [vmem:[%s1687_s12 + $0x8] sm:$0xff]  ;;  %v338_v13 = vsel %vm314_vm2, 1, %v873_v2  ;;  %v991_v14 = vld [vmem:[%s1689_s0 + $0x30] sm:$0xff]  ;;  %v169_v15 = vld [vmem:[%s1690_s4] sm:$0xff]  ;;  %v59_v24 = vmax.f32 %v985_v12, 0.0 }
   0x5   :  { %v340_v9 = vsel %vm316_vm1, 1, %v873_v2  ;;  %859 = vmatpush.msra.mxu2 %v73_v3  ;;  %262 = vmatpush.msra.mxu1 %v207_v4  ;;  %v175_v16 = vld [vmem:[%s1690_s4 + $0x30] sm:$0xff]  ;;  %v181_v17 = vadd.f32 %v169_v15, %v985_v12  ;;  %v307_v19 = vld [vmem:[%s1688_s6 + $0x28] sm:$0xff]  ;;  %v305_v20 = vld [vmem:[%s1688_s6 + $0x18] sm:$0xff]  ;;  %v65_v25 = vmax.f32 %v991_v14, 0.0 }
   0x6   :  { %863 = vmatpush.msra.mxu3 %v207_v4  ;;  %363 = vperm.xlu2 %870, %v342_v8   ;;  %v187_v18 = vadd.f32 %v175_v16, %v991_v14  ;;  %v303_v21 = vld [vmem:[%s1688_s6 + $0x8] sm:$0xff]  ;;  %v71_v22 = vld [vmem:[%s1686_s10] sm:$0xff]  ;;  %vm319_vm4 = vcmp.gt.f32.partialorder %v307_v19, 0.0  ;;  %vm317_vm5 = vcmp.gt.f32.partialorder %v305_v20, 0.0  ;;  %v1026_v29 = vld [vmem:[%s1689_s0 + $0x38] sm:$0xff] }
   0x7   :  { %357 = vperm.xlu1 %869, %v340_v9   ;;  %351 = vperm.xlu0 %868, %v338_v13   ;;  %v205_v23 = vld [vmem:[%s1687_s12] sm:$0xff]  ;;  %v193_v26 = vmax.f32 %v181_v17, 0.0  ;;  %vm315_vm6 = vcmp.gt.f32.partialorder %v303_v21, 0.0  ;;  %v1021_v28 = vld [vmem:[%s1689_s0 + $0x8] sm:$0xff]  ;;  %v176_v31 = vld [vmem:[%s1690_s4 + $0x38] sm:$0xff]  ;;  %v343_v32 = vsel %vm319_vm4, 1, %v873_v2 }
   0x8   :  { %130 = vmatpush.msra.mxu0 %v72_v10  ;;  %860 = vmatpush.msra.mxu2 %v72_v10  ;;  %v199_v27 = vmax.f32 %v187_v18, 0.0  ;;  %v170_v30 = vld [vmem:[%s1690_s4 + $0x8] sm:$0xff]  ;;  %v341_v33 = vsel %vm317_vm5, 1, %v873_v2  ;;  %v339_v34 = vsel %vm315_vm6, 1, %v873_v2  ;;  %v188_v36 = vadd.f32 %v176_v31, %v1026_v29  ;;  %v310_v37 = vld [vmem:[%s1688_s6 + $0x40] sm:$0xff]  ;;  %v309_v38 = vld [vmem:[%s1688_s6 + $0x38] sm:$0xff] }
   0x9   :  { %263 = vmatpush.msra.mxu1 %v206_v11  ;;  %864 = vmatpush.msra.mxu3 %v206_v11  ;;  %v182_v35 = vadd.f32 %v170_v30, %v1021_v28  ;;  %v308_v39 = vld [vmem:[%s1688_s6 + $0x30] sm:$0xff]  ;;  %v60_v40 = vmax.f32 %v1021_v28, 0.0  ;;  %v66_v41 = vmax.f32 %v1026_v29, 0.0  ;;  %vm322_vm7 = vcmp.gt.f32.partialorder %v310_v37, 0.0  ;;  %v1062_v45 = vld [vmem:[%s1689_s0 + $0x40] sm:$0xff]  ;;  %v313_v53 = vld [vmem:[%s1688_s6 + $0x58] sm:$0xff] }
   0xa   :  { %131 = vmatpush.msra.mxu0 %v71_v22  ;;  %861 = vmatpush.msra.mxu2 %v71_v22  ;;  %v200_v43 = vmax.f32 %v188_v36, 0.0  ;;  %vm321_vm8 = vcmp.gt.f32.partialorder %v309_v38, 0.0  ;;  %vm320_vm9 = vcmp.gt.f32.partialorder %v308_v39, 0.0  ;;  %v1057_v44 = vld [vmem:[%s1689_s0 + $0x10] sm:$0xff]  ;;  %v177_v47 = vld [vmem:[%s1690_s4 + $0x40] sm:$0xff]  ;;  %v346_v48 = vsel %vm322_vm7, 1, %v873_v2 }
   0xb   :  { %264 = vmatpush.msra.mxu1 %v205_v23  ;;  %865 = vmatpush.msra.mxu3 %v205_v23  ;;  %v194_v42 = vmax.f32 %v182_v35, 0.0  ;;  %v171_v46 = vld [vmem:[%s1690_s4 + $0x10] sm:$0xff]  ;;  %v345_v49 = vsel %vm321_vm8, 1, %v873_v2  ;;  %v344_v50 = vsel %vm320_vm9, 1, %v873_v2  ;;  %v189_v52 = vadd.f32 %v177_v47, %v1062_v45  ;;  %v311_v55 = vld [vmem:[%s1688_s6 + $0x48] sm:$0xff]  ;;  %v1093_v60 = vld [vmem:[%s1689_s0 + $0x18] sm:$0xff] }
   0xc   :  { %834 = vmatmul.msk.f32.vlgmr.msra.gmra.mxu0 %vm79_vm3, %v59_v24  ;;  %840 = vmatmul.msk.f32.vlgmr.msra.gmra.mxu2 %vm79_vm3, %v65_v25  ;;  %v183_v51 = vadd.f32 %v171_v46, %v1057_v44  ;;  %v312_v54 = vld [vmem:[%s1688_s6 + $0x50] sm:$0xff]  ;;  %v61_v56 = vmax.f32 %v1057_v44, 0.0  ;;  %v67_v57 = vmax.f32 %v1062_v45, 0.0  ;;  %vm325_vm10 = vcmp.gt.f32.partialorder %v313_v53, 0.0  ;;  %v1098_v61 = vld [vmem:[%s1689_s0 + $0x48] sm:$0xff]  ;;  %v172_v62 = vld [vmem:[%s1690_s4 + $0x18] sm:$0xff] }
   0xd   :  { %846 = vmatmul.msk.f32.vlgmr.msra.gmra.mxu1 %vm79_vm3, %v193_v26  ;;  %852 = vmatmul.msk.f32.vlgmr.msra.gmra.mxu3 %vm79_vm3, %v199_v27  ;;  %v201_v59 = vmax.f32 %v189_v52, 0.0  ;;  %vm324_vm11 = vcmp.gt.f32.partialorder %v312_v54, 0.0  ;;  %vm323_vm12 = vcmp.gt.f32.partialorder %v311_v55, 0.0  ;;  %1704 = vst [vmem:[#allocation2_spill] sm:$0xff] %v1098_v61  ;;  %v178_v63 = vld [vmem:[%s1690_s4 + $0x48] sm:$0xff]  ;;  %v349_v0 = vsel %vm325_vm10, 1, %v873_v2 }
   0xe   :  { %366 = vperm.xlu2 %870, %v343_v32   ;;  %v195_v58 = vmax.f32 %v183_v51, 0.0  ;;  %v348_v1 = vsel %vm324_vm11, 1, %v873_v2  ;;  %v347_v3 = vsel %vm323_vm12, 1, %v873_v2  ;;  %v184_v4 = vadd.f32 %v172_v62, %v1093_v60  ;;  %v412_v6 = vld [vmem:[%s1693_s7 + $0x10] sm:$0xff]  ;;  %v411_v7 = vld [vmem:[%s1693_s7 + $0x8] sm:$0xff]  ;;  %v410_v8 = vld [vmem:[%s1693_s7] sm:$0xff] }
   0xf   :  { %360 = vperm.xlu1 %869, %v341_v33   ;;  %354 = vperm.xlu0 %868, %v339_v34   ;;  %v190_v5 = vadd.f32 %v178_v63, %v1098_v61  ;;  %v62_v9 = vmax.f32 %v1093_v60, 0.0  ;;  %v68_v10 = vmax.f32 %v1098_v61, 0.0  ;;  %vm424_vm13 = vcmp.gt.f32.partialorder %v412_v6, 0.0  ;;  %v1129_v15 = vld [vmem:[%s1689_s0 + $0x20] sm:$0xff]  ;;  %v1134_v16 = vld [vmem:[%s1689_s0 + $0x50] sm:$0xff]  ;;  %v415_v24 = vld [vmem:[%s1693_s7 + $0x28] sm:$0xff] }
  0x10   :  { %v196_v11 = vmax.f32 %v184_v4, 0.0  ;;  %vm423_vm14 = vcmp.gt.f32.partialorder %v411_v7, 0.0  ;;  %vm422_vm15 = vcmp.gt.f32.partialorder %v410_v8, 0.0  ;;  %1705 = vst [vmem:[#allocation3_spill] sm:$0xff] %v1129_v15  ;;  %v173_v17 = vld [vmem:[%s1690_s4 + $0x20] sm:$0xff]  ;;  %v179_v18 = vld [vmem:[%s1690_s4 + $0x50] sm:$0xff] }
  0x11   :  { %v202_v13 = vmax.f32 %v190_v5, 0.0  ;;  %1706 = vst [vmem:[#allocation4_spill] sm:$0xff] %v1134_v16  ;;  %v448_v19 = vsel %vm424_vm13, 1, %v873_v2  ;;  %v447_v20 = vsel %vm423_vm14, 1, %v873_v2  ;;  %v446_v21 = vsel %vm422_vm15, 1, %v873_v2  ;;  %v414_v25 = vld [vmem:[%s1693_s7 + $0x20] sm:$0xff] }
  0x12   :  { %v185_v22 = vadd.f32 %v173_v17, %v1129_v15  ;;  %v191_v23 = vadd.f32 %v179_v18, %v1134_v16  ;;  %v413_v26 = vld [vmem:[%s1693_s7 + $0x18] sm:$0xff]  ;;  %v63_v27 = vmax.f32 %v1129_v15, 0.0  ;;  %v69_v30 = vmax.f32 %v1134_v16, 0.0  ;;  %v1165_v33 = vld [vmem:[%s1689_s0 + $0x28] sm:$0xff]  ;;  %v416_v46 = vld [vmem:[%s1693_s7 + $0x30] sm:$0xff] }
  0x13   :  { %vm427_vm0 = vcmp.gt.f32.partialorder %v415_v24, 0.0  ;;  %vm426_vm1 = vcmp.gt.f32.partialorder %v414_v25, 0.0  ;;  %vm425_vm2 = vcmp.gt.f32.partialorder %v413_v26, 0.0  ;;  %v1170_v34 = vld [vmem:[%s1689_s0 + $0x58] sm:$0xff]  ;;  %v174_v35 = vld [vmem:[%s1690_s4 + $0x28] sm:$0xff]  ;;  %v64_v47 = vmax.f32 %v1165_v33, 0.0 }
  0x14   :  { %835 = vmatmul.msk.f32.gmra.mxu0 %vm79_vm3, %v60_v40  ;;  %841 = vmatmul.msk.f32.gmra.mxu2 %vm79_vm3, %v66_v41  ;;  %v197_v31 = vmax.f32 %v185_v22, 0.0  ;;  %v203_v32 = vmax.f32 %v191_v23, 0.0  ;;  %v180_v36 = vld [vmem:[%s1690_s4 + $0x58] sm:$0xff]  ;;  %v451_v37 = vsel %vm427_vm0, 1, %v873_v2  ;;  %v450_v38 = vsel %vm426_vm1, 1, %v873_v2  ;;  %v420_v55 = vld [vmem:[%s1693_s7 + $0x50] sm:$0xff] }
  0x15   :  { %847 = vmatmul.msk.f32.gmra.mxu1 %vm79_vm3, %v194_v42  ;;  %853 = vmatmul.msk.f32.gmra.mxu3 %vm79_vm3, %v200_v43  ;;  %v449_v39 = vsel %vm425_vm2, 1, %v873_v2  ;;  %v186_v40 = vadd.f32 %v174_v35, %v1165_v33  ;;  %v192_v41 = vadd.f32 %v180_v36, %v1170_v34  ;;  %v418_v42 = vld [vmem:[%s1693_s7 + $0x40] sm:$0xff]  ;;  %v417_v43 = vld [vmem:[%s1693_s7 + $0x38] sm:$0xff]  ;;  %vm428_vm6 = vcmp.gt.f32.partialorder %v416_v46, 0.0  ;;  %v580_v62 = vld [vmem:[%s1694_s8 + $0x10] sm:$0xff] }
  0x16   :  { %375 = vperm.xlu2 %870, %v346_v48   ;;  %v70_v48 = vmax.f32 %v1170_v34, 0.0  ;;  %vm430_vm4 = vcmp.gt.f32.partialorder %v418_v42, 0.0  ;;  %vm429_vm5 = vcmp.gt.f32.partialorder %v417_v43, 0.0  ;;  %v452_v53 = vsel %vm428_vm6, 1, %v873_v2  ;;  %v421_v54 = vld [vmem:[%s1693_s7 + $0x58] sm:$0xff]  ;;  %v579_v63 = vld [vmem:[%s1694_s8 + $0x8] sm:$0xff] }
  0x17   :  { %372 = vperm.xlu1 %869, %v345_v49   ;;  %369 = vperm.xlu0 %868, %v344_v50   ;;  %v198_v49 = vmax.f32 %v186_v40, 0.0  ;;  %v204_v50 = vmax.f32 %v192_v41, 0.0  ;;  %v454_v51 = vsel %vm430_vm4, 1, %v873_v2  ;;  %v453_v52 = vsel %vm429_vm5, 1, %v873_v2  ;;  %v586_v4 = vld [vmem:[%s1694_s8 + $0x40] sm:$0xff]  ;;  %v585_v5 = vld [vmem:[%s1694_s8 + $0x38] sm:$0xff] }
  0x18   :  { %vm433_vm7 = vcmp.gt.f32.partialorder %v421_v54, 0.0  ;;  %vm432_vm8 = vcmp.gt.f32.partialorder %v420_v55, 0.0  ;;  %v584_v6 = vld [vmem:[%s1694_s8 + $0x30] sm:$0xff]  ;;  %v589_v7 = vld [vmem:[%s1694_s8 + $0x58] sm:$0xff]  ;;  %v734_v17 = vld [vmem:[%s1695_s9] sm:$0xff] }
  0x19   :  { %v588_v8 = vld [vmem:[%s1694_s8 + $0x50] sm:$0xff]  ;;  %v739_v18 = vld [vmem:[%s1695_s9 + $0x28] sm:$0xff]  ;;  %v742_v22 = vld [vmem:[%s1695_s9 + $0x40] sm:$0xff] }
  0x1a   :  { %v741_v23 = vld [vmem:[%s1695_s9 + $0x38] sm:$0xff]  ;;  %v740_v24 = vld [vmem:[%s1695_s9 + $0x30] sm:$0xff]  ;;  %v1289_v35 = vld [vmem:[%s1691_s11] ss:$0 sm:$0xff] }
  0x1b   :  { %v332_v46 = vld [vmem:[%s1696_s1 + $0x30] sm:$0xff] }
  0x1c   :  { %836 = vmatmul.msk.f32.gmra.mxu0 %vm79_vm3, %v61_v56  ;;  %842 = vmatmul.msk.f32.gmra.mxu2 %vm79_vm3, %v67_v57  ;;  %v419_v56 = vld [vmem:[%s1693_s7 + $0x48] sm:$0xff]  ;;  %v457_v57 = vsel %vm433_vm7, 1, %v873_v2  ;;  %v436_v16 = vld [vmem:[%s1697_s2 + $0x10] sm:$0xff] }
  0x1d   :  { %848 = vmatmul.msk.f32.gmra.mxu1 %vm79_vm3, %v195_v58  ;;  %854 = vmatmul.msk.f32.gmra.mxu3 %vm79_vm3, %v201_v59  ;;  %vm431_vm9 = vcmp.gt.f32.partialorder %v419_v56, 0.0  ;;  %v456_v58 = vsel %vm432_vm8, 1, %v873_v2  ;;  %v712_v15 = vld [vmem:[%s1699_s5 + $0x10] sm:$0xff] }
  0x1e   :  { %384 = vperm.xlu2 %870, %v349_v0   ;;  %v455_v59 = vsel %vm431_vm9, 1, %v873_v2  ;;  %v578_v0 = vld [vmem:[%s1694_s8] sm:$0xff]  ;;  %v583_v2 = vld [vmem:[%s1694_s8 + $0x28] sm:$0xff] }
  0x1f   :  { %381 = vperm.xlu1 %869, %v348_v1   ;;  %378 = vperm.xlu0 %868, %v347_v3   ;;  %v582_v1 = vld [vmem:[%s1694_s8 + $0x20] sm:$0xff]  ;;  %v581_v3 = vld [vmem:[%s1694_s8 + $0x18] sm:$0xff] }
  0x24   :  { %837 = vmatmul.msk.f32.gmra.mxu0 %vm79_vm3, %v62_v9  ;;  %843 = vmatmul.msk.f32.gmra.mxu2 %vm79_vm3, %v68_v10  ;;  %v587_v9 = vld [vmem:[%s1694_s8 + $0x48] sm:$0xff] }
  0x25   :  { %849 = vmatmul.msk.f32.gmra.mxu1 %vm79_vm3, %v196_v11  ;;  %855 = vmatmul.msk.f32.gmra.mxu3 %vm79_vm3, %v202_v13  ;;  %v736_v11 = vld [vmem:[%s1695_s9 + $0x10] sm:$0xff]  ;;  %v735_v13 = vld [vmem:[%s1695_s9 + $0x8] sm:$0xff] }
  0x26   :  { %465 = vperm.xlu2 %870, %v448_v19  }
  0x27   :  { %462 = vperm.xlu1 %869, %v447_v20   ;;  %459 = vperm.xlu0 %868, %v446_v21   ;;  %v738_v20 = vld [vmem:[%s1695_s9 + $0x20] sm:$0xff]  ;;  %v737_v21 = vld [vmem:[%s1695_s9 + $0x18] sm:$0xff] }
  0x2c   :  { %838 = vmatmul.msk.f32.gmra.mxu0 %vm79_vm3, %v63_v27  ;;  %844 = vmatmul.msk.f32.gmra.mxu2 %vm79_vm3, %v69_v30 }
  0x2d   :  { %850 = vmatmul.msk.f32.gmra.mxu1 %vm79_vm3, %v197_v31  ;;  %856 = vmatmul.msk.f32.gmra.mxu3 %vm79_vm3, %v203_v32 }
  0x2e   :  { %474 = vperm.xlu2 %870, %v451_v37  }
  0x2f   :  { %471 = vperm.xlu1 %869, %v450_v38   ;;  %468 = vperm.xlu0 %868, %v449_v39   ;;  %v326_v39 = vld [vmem:[%s1696_s1] sm:$0xff] }
  0x34   :  { %839 = vmatmul.msk.f32.gmra.mxu0 %vm79_vm3, %v64_v47  ;;  %845 = vmatmul.msk.f32.gmra.mxu2 %vm79_vm3, %v70_v48 }
  0x35   :  { %851 = vmatmul.msk.f32.gmra.mxu1 %vm79_vm3, %v198_v49  ;;  %857 = vmatmul.msk.f32.gmra.mxu3 %vm79_vm3, %v204_v50 }
  0x36   :  { %483 = vperm.xlu2 %870, %v454_v51  }
  0x37   :  { %480 = vperm.xlu1 %869, %v453_v52   ;;  %477 = vperm.xlu0 %868, %v452_v53   ;;  %v327_v52 = vld [vmem:[%s1696_s1 + $0x8] sm:$0xff] }
  0x3e   :  { %492 = vperm.xlu2 %870, %v457_v57   ;;  %v333_v57 = vld [vmem:[%s1696_s1 + $0x38] sm:$0xff] }
  0x3f   :  { %489 = vperm.xlu1 %869, %v456_v58   ;;  %486 = vperm.xlu0 %868, %v455_v59  }
  0x46   :  { %602 = vperm.xlu2 %870, %v580_v62  }
  0x47   :  { %597 = vperm.xlu1 %869, %v579_v63   ;;  %592 = vperm.xlu0 %868, %v578_v0  }
  0x4e   :  { %617 = vperm.xlu2 %870, %v583_v2   ;;  %v328_v2 = vld [vmem:[%s1696_s1 + $0x10] sm:$0xff] }
  0x4f   :  { %612 = vperm.xlu1 %869, %v582_v1   ;;  %607 = vperm.xlu0 %868, %v581_v3  }
  0x56   :  { %632 = vperm.xlu2 %870, %v586_v4  }
  0x57   :  { %627 = vperm.xlu1 %869, %v585_v5   ;;  %622 = vperm.xlu0 %868, %v584_v6   ;;  %v334_v6 = vld [vmem:[%s1696_s1 + $0x40] sm:$0xff] }
  0x5e   :  { %647 = vperm.xlu2 %870, %v589_v7  }
  0x5f   :  { %642 = vperm.xlu1 %869, %v588_v8   ;;  %637 = vperm.xlu0 %868, %v587_v9  }
  0x60   :  { %v1253_v10 = vpop.permute.xlu2 %363 }
  0x61   :  { %vm390_vm2 = vcmp.eq.s32.totalorder %v1253_v10, 1 }
  0x66   :  { %758 = vperm.xlu2 %870, %v736_v11  }
  0x67   :  { %753 = vperm.xlu1 %869, %v735_v13   ;;  %748 = vperm.xlu0 %868, %v734_v17   ;;  %v329_v13 = vld [vmem:[%s1696_s1 + $0x18] sm:$0xff] }
  0x68   :  { %v1267_v19 = vpop.permute.xlu2 %366 }
  0x69   :  { %vm391_vm5 = vcmp.eq.s32.totalorder %v1267_v19, 1  ;;  %v744_v19 = vld [vmem:[%s1695_s9 + $0x50] sm:$0xff] }
  0x6e   :  { %773 = vperm.xlu2 %870, %v739_v18  }
  0x6f   :  { %768 = vperm.xlu1 %869, %v738_v20   ;;  %763 = vperm.xlu0 %868, %v737_v21  }
  0x70   :  { %v376_v25 = vpop.permute.xlu2 %375 }
  0x71   :  { %vm394_vm15 = vcmp.eq.s32.totalorder %v376_v25, 1 }
  0x76   :  { %788 = vperm.xlu2 %870, %v742_v22   ;;  %v335_v22 = vld [vmem:[%s1696_s1 + $0x48] sm:$0xff] }
  0x77   :  { %783 = vperm.xlu1 %869, %v741_v23   ;;  %778 = vperm.xlu0 %868, %v740_v24  }
  0x78   :  { %v1284_v30 = vpop.permute.xlu2 %384 }
  0x79   :  { %v358_v26 = vpop.permute.xlu1 %357  ;;  %v352_v27 = vpop.permute.xlu0 %351  ;;  %vm397_vm6 = vcmp.eq.s32.totalorder %v1284_v30, 1 }
  0x7a   :  { %vm386_vm10 = vcmp.eq.s32.totalorder %v352_v27, 1  ;;  %vm388_vm14 = vcmp.eq.s32.totalorder %v358_v26, 1 }
  0x80   :  { %v1294_v40 = vpop.permute.xlu2 %465 }
  0x81   :  { %v361_v31 = vpop.permute.xlu1 %360  ;;  %v355_v32 = vpop.permute.xlu0 %354  ;;  %vm496_vm7 = vcmp.eq.s32.totalorder %v1294_v40, 1 }
  0x82   :  { %vm387_vm12 = vcmp.eq.s32.totalorder %v355_v32, 1  ;;  %vm389_vm0 = vcmp.eq.s32.totalorder %v361_v31, 1  ;;  %v330_v31 = vld [vmem:[%s1696_s1 + $0x20] sm:$0xff] }
  0x88   :  { %v1310_v54 = vpop.permute.xlu2 %474 }
  0x89   :  { %v373_v36 = vpop.permute.xlu1 %372  ;;  %v370_v37 = vpop.permute.xlu0 %369 }
  0x8a   :  { %v133_v38 = vpop.f32.mrf.mxu0  ;;  %vm392_vm11 = vcmp.eq.s32.totalorder %v370_v37, 1  ;;  %vm393_vm13 = vcmp.eq.s32.totalorder %v373_v36, 1 }
  0x8b   :  { %v134_v41 = vadd.f32 %v1289_v35, %v133_v38 }
  0x8d   :  { %v1297_v42 = vsel %vm386_vm10, %v326_v39, %v134_v41  ;;  %518 = vrot.lane.b32.xlu0 %v134_v41, %s874_s17  ;;  %v336_v39 = vld [vmem:[%s1696_s1 + $0x50] sm:$0xff] }
  0x8f   :  { %v151_v43 = vpop.f32.mrf.mxu2 }
  0x90   :  { %v152_v47 = vadd.f32 %v1289_v35, %v151_v43  ;;  %v1334_v4 = vpop.permute.xlu2 %483 }
  0x91   :  { %v382_v48 = vpop.permute.xlu1 %381  ;;  %v379_v49 = vpop.permute.xlu0 %378  ;;  %vm502_vm8 = vcmp.eq.s32.totalorder %v1334_v4, 1 }
  0x92   :  { %v1304_v50 = vsel %vm392_vm11, %v332_v46, %v152_v47  ;;  %v136_v51 = vpop.f32.mrf.mxu0  ;;  %vm395_vm1 = vcmp.eq.s32.totalorder %v379_v49, 1  ;;  %vm396_vm4 = vcmp.eq.s32.totalorder %v382_v48, 1 }
  0x93   :  { %v137_v53 = vadd.f32 %v1289_v35, %v136_v51 }
  0x95   :  { %v1312_v55 = vsel %vm387_vm12, %v327_v52, %v137_v53  ;;  %520 = vrot.lane.b32.xlu1 %v137_v53, %s874_s17  ;;  %530 = vrot.lane.b32.xlu0 %v152_v47, %s874_s17  ;;  %v331_v47 = vld [vmem:[%s1696_s1 + $0x28] sm:$0xff]  ;;  %vm499_vm12 = vcmp.eq.s32.totalorder %v1310_v54, 1 }
  0x96   :  { %v743_v52 = vld [vmem:[%s1695_s9 + $0x48] sm:$0xff] }
  0x97   :  { %v154_v56 = vpop.f32.mrf.mxu2 }
  0x98   :  { %v155_v58 = vadd.f32 %v1289_v35, %v154_v56  ;;  %v1358_v24 = vpop.permute.xlu2 %492  ;;  %v337_v56 = vld [vmem:[%s1696_s1 + $0x58] sm:$0xff] }
  0x99   :  { %v1320_v59 = vpop.permute.xlu0 %459  ;;  %v1324_v63 = vpop.permute.xlu1 %462 }
  0x9a   :  { %v1322_v62 = vsel %vm393_vm13, %v333_v57, %v155_v58  ;;  %v139_v0 = vpop.f32.mrf.mxu0  ;;  %vm494_vm9 = vcmp.eq.s32.totalorder %v1320_v59, 1  ;;  %v710_v59 = vld [vmem:[%s1699_s5] sm:$0xff]  ;;  %vm495_vm10 = vcmp.eq.s32.totalorder %v1324_v63, 1  ;;  %v711_v63 = vld [vmem:[%s1699_s5 + $0x8] sm:$0xff] }
  0x9b   :  { %v140_v1 = vadd.f32 %v1289_v35, %v139_v0 }
  0x9d   :  { %v1330_v3 = vsel %vm388_vm14, %v328_v2, %v140_v1  ;;  %522 = vrot.lane.b32.xlu2 %v140_v1, %s874_s17  ;;  %532 = vrot.lane.b32.xlu1 %v155_v58, %s874_s17  ;;  %vm505_vm14 = vcmp.eq.s32.totalorder %v1358_v24, 1 }
  0x9f   :  { %v157_v5 = vpop.f32.mrf.mxu2 }
  0xa0   :  { %v158_v7 = vadd.f32 %v1289_v35, %v157_v5  ;;  %v603_v49 = vpop.permute.xlu2 %602 }
  0xa1   :  { %v1340_v8 = vpop.permute.xlu0 %468  ;;  %v1348_v18 = vpop.permute.xlu1 %471 }
  0xa2   :  { %v1342_v9 = vsel %vm394_vm15, %v334_v6, %v158_v7  ;;  %v142_v11 = vpop.f32.mrf.mxu0  ;;  %1707 = vst [vmem:[#allocation5_spill] sm:$0xff] %v1348_v18  ;;  %vm497_vm15 = vcmp.eq.s32.totalorder %v1340_v8, 1 }
  0xa3   :  { %v143_v17 = vadd.f32 %v1289_v35, %v142_v11 }
  0xa5   :  { %v1350_v20 = vsel %vm389_vm0, %v329_v13, %v143_v17  ;;  %534 = vrot.lane.b32.xlu2 %v158_v7, %s874_s17  ;;  %524 = vrot.lane.b32.xlu0 %v143_v17, %s874_s17  ;;  %v266_v17 = vpop.f32.mrf.mxu1 }
  0xa6   :  { %v677_v24 = vadd.f32 %v1350_v20, %v1093_v60  ;;  %v713_v60 = vld [vmem:[%s1699_s5 + $0x18] sm:$0xff] }
  0xa7   :  { %v160_v21 = vpop.f32.mrf.mxu2  ;;  %v721_v20 = vld [vmem:[%s1699_s5 + $0x58] sm:$0xff] }
  0xa8   :  { %v161_v23 = vadd.f32 %v1289_v35, %v160_v21  ;;  %v1407_v1 = vpop.permute.xlu2 %617 }
  0xa9   :  { %v1360_v25 = vpop.permute.xlu0 %477  ;;  %v1373_v37 = vpop.permute.xlu1 %480 }
  0xaa   :  { %v1362_v26 = vsel %vm395_vm1, %v335_v22, %v161_v23  ;;  %v145_v27 = vpop.f32.mrf.mxu0  ;;  %vm500_vm11 = vcmp.eq.s32.totalorder %v1360_v25, 1  ;;  %v716_v25 = vld [vmem:[%s1699_s5 + $0x30] sm:$0xff]  ;;  %vm501_vm13 = vcmp.eq.s32.totalorder %v1373_v37, 1 }
  0xab   :  { %1708 = vst [vmem:[#allocation6_spill] sm:$0xff] %v1362_v26  ;;  %v146_v32 = vadd.f32 %v1289_v35, %v145_v27  ;;  %v284_v27 = vpop.f32.mrf.mxu3 }
  0xad   :  { %v1369_v36 = vsel %vm390_vm2, %v330_v31, %v146_v32  ;;  %526 = vrot.lane.b32.xlu1 %v146_v32, %s874_s17  ;;  %536 = vrot.lane.b32.xlu0 %v161_v23, %s874_s17  ;;  %v269_v31 = vpop.f32.mrf.mxu1 }
  0xae   :  { %1709 = vst [vmem:[#allocation7_spill] sm:$0xff] %v1369_v36 }
  0xaf   :  { %v163_v38 = vpop.f32.mrf.mxu2 }
  0xb0   :  { %v164_v41 = vadd.f32 %v1289_v35, %v163_v38  ;;  %v633_v30 = vpop.permute.xlu2 %632 }
  0xb1   :  { %v1379_v43 = vpop.permute.xlu0 %486  ;;  %v1398_v57 = vpop.permute.xlu1 %489 }
  0xb2   :  { %1710 = vst [vmem:[#allocation8_spill] sm:$0xff] %v1379_v43  ;;  %v1381_v46 = vsel %vm396_vm4, %v336_v39, %v164_v41  ;;  %v148_v10 = vpop.f32.mrf.mxu0 }
  0xb3   :  { %1711 = vst [vmem:[#allocation9_spill] sm:$0xff] %v1381_v46  ;;  %v149_v51 = vadd.f32 %v1289_v35, %v148_v10 }
  0xb4   :  { %1712 = vst [vmem:[#allocation10_spill] sm:$0xff] %v1398_v57  ;;  %v568_v57 = vld [vmem:[%s1698_s3 + $0x10] sm:$0xff] }
  0xb5   :  { %v1391_v53 = vsel %vm391_vm5, %v331_v47, %v149_v51  ;;  %528 = vrot.lane.b32.xlu2 %v149_v51, %s874_s17  ;;  %538 = vrot.lane.b32.xlu1 %v164_v41, %s874_s17  ;;  %v1433_v41 = vpop.f32.mrf.mxu3  ;;  %v272_v10 = vpop.f32.mrf.mxu1  ;;  %v1440_v51 = vld [vmem:[%s1692_s13] ss:$0 sm:$0xff] }
  0xb6   :  { %793 = vperm.xlu0 %868, %v743_v52  }
  0xb7   :  { %v166_v48 = vpop.f32.mrf.mxu2 }
  0xb8   :  { %v167_v58 = vadd.f32 %v1289_v35, %v166_v48  ;;  %v745_v35 = vld [vmem:[%s1695_s9 + $0x58] sm:$0xff]  ;;  %v1421_v13 = vpop.permute.xlu2 %647 }
  0xb9   :  { %v593_v2 = vpop.permute.xlu0 %592  ;;  %v1410_v5 = vpop.permute.xlu1 %597 }
  0xba   :  { %v1402_v0 = vsel %vm397_vm6, %v337_v56, %v167_v58 }
  0xbd   :  { %540 = vrot.lane.b32.xlu2 %v167_v58, %s874_s17  ;;  %798 = vperm.xlu1 %869, %v744_v19   ;;  %v290_v56 = vpop.f32.mrf.mxu3  ;;  %v273_v58 = vadd.f32 %v1440_v51, %v272_v10  ;;  %v1447_v19 = vpop.f32.mrf.mxu1  ;;  %v676_v10 = vadd.f32 %v1330_v3, %v1057_v44  ;;  %v442_v44 = vld [vmem:[%s1697_s2 + $0x40] sm:$0xff] }
  0xbe   :  { %v566_v3 = vld [vmem:[%s1698_s3] sm:$0xff]  ;;  %v276_v54 = vadd.f32 %v1440_v51, %v1447_v19 }
  0xbf   :  { %v652_v46 = vmul.f32 %v603_v49, %v273_v58  ;;  %v291_v49 = vadd.f32 %v1440_v51, %v290_v56 }
  0xc0   :  { %v759_v23 = vpop.permute.xlu2 %758 }
  0xc1   :  { %v1415_v6 = vpop.permute.xlu0 %607  ;;  %v1417_v7 = vpop.permute.xlu1 %612  ;;  %v664_v58 = vadd.f32 %v652_v46, %v568_v57  ;;  %v658_v18 = vmul.f32 %v633_v30, %v291_v49  ;;  %v682_v46 = vadd.f32 %v1342_v9, %v1062_v45  ;;  %v285_v30 = vadd.f32 %v1440_v51, %v284_v27  ;;  %v718_v45 = vld [vmem:[%s1699_s5 + $0x40] sm:$0xff]  ;;  %v435_v49 = vld [vmem:[%s1697_s2 + $0x8] sm:$0xff] }
  0xc2   :  { %1713 = vst [vmem:[#allocation11_spill] sm:$0xff] %v1417_v7 }
  0xc5   :  { %803 = vperm.xlu2 %870, %v745_v35   ;;  %v1464_v36 = vpop.f32.mrf.mxu3  ;;  %v1469_v40 = vpop.f32.mrf.mxu1 }
  0xc8   :  { %v1431_v39 = vpop.permute.xlu2 %773 }
  0xc9   :  { %v1419_v11 = vpop.permute.xlu0 %622  ;;  %v1423_v21 = vpop.permute.xlu1 %627 }
  0xd0   :  { %v1444_v48 = vpop.permute.xlu2 %788 }
  0xd1   :  { %v1425_v22 = vpop.permute.xlu0 %637  ;;  %v1427_v32 = vpop.permute.xlu1 %642 }
  0xd2   :  { %1714 = vst [vmem:[#allocation12_spill] sm:$0xff] %v1425_v22 }
  0xd3   :  { %1715 = vst [vmem:[#allocation13_spill] sm:$0xff] %v1427_v32 }
  0xd9   :  { %v1429_v38 = vpop.permute.xlu0 %748  ;;  %v1435_v47 = vpop.permute.xlu1 %753 }
  0xe1   :  { %v1442_v52 = vpop.permute.xlu0 %763  ;;  %v1449_v35 = vpop.permute.xlu1 %768 }
  0xe2   :  { %1716 = vst [vmem:[#allocation14_spill] sm:$0xff] %v1442_v52 }
  0xe3   :  { %1717 = vst [vmem:[#allocation15_spill] sm:$0xff] %v1449_v35  ;;  %v267_v35 = vadd.f32 %v1440_v51, %v266_v17  ;;  %v270_v17 = vadd.f32 %v1440_v51, %v269_v31 }
  0xe5   :  { %v650_v22 = vmul.f32 %v593_v2, %v267_v35 }
  0xe9   :  { %v1458_v32 = vpop.permute.xlu0 %778 }
  0xf7   :  { %v523_v26 = vpop.permute.xlu2 %522 }
  0xf8   :  { %v556_v61 = vsel %vm496_vm7, %v436_v16, %v523_v26  ;;  %v574_v16 = vld [vmem:[%s1698_s3 + $0x40] sm:$0xff]  ;;  %v1483_v26 = vpop.permute.xlu1 %783 }
  0xf9   :  { %v688_v43 = vadd.f32 %v676_v10, %v556_v61  ;;  %v434_v61 = vld [vmem:[%s1697_s2] sm:$0xff]  ;;  %v670_v35 = vadd.f32 %v658_v18, %v574_v16  ;;  %v662_v10 = vadd.f32 %v650_v22, %v566_v3  ;;  %v281_v18 = vpop.f32.mrf.mxu1  ;;  %v651_v22 = vmul.f32 %v1410_v5, %v270_v17  ;;  %v572_v5 = vld [vmem:[%s1698_s3 + $0x30] sm:$0xff]  ;;  %v571_v17 = vld [vmem:[%s1698_s3 + $0x28] sm:$0xff] }
  0xfb   :  { %v700_v52 = vadd.f32 %v688_v43, %v664_v58  ;;  %v440_v58 = vld [vmem:[%s1697_s2 + $0x30] sm:$0xff] }
  0xfd   :  { %v724_v7 = vadd.f32 %v712_v15, %v700_v52  ;;  %v674_v15 = vadd.f32 %v1297_v42, %v985_v12 }
  0xff   :  { %v808_v43 = vmul.f32 %v759_v23, %v724_v7  ;;  %v535_v57 = vpop.permute.xlu2 %534  ;;  %v519_v2 = vpop.permute.xlu0 %518  ;;  %v656_v23 = vmul.f32 %v1419_v11, %v285_v30  ;;  %v675_v11 = vadd.f32 %v1312_v55, %v1021_v28 }
 0x100   :  { %v562_v52 = vsel %vm502_vm8, %v442_v44, %v535_v57  ;;  %v554_v56 = vsel %vm494_vm9, %v434_v61, %v519_v2  ;;  %v1503_v7 = vpop.f32.mrf.mxu3  ;;  %v567_v44 = vld [vmem:[%s1698_s3 + $0x8] sm:$0xff]  ;;  %v680_v61 = vadd.f32 %v1304_v50, %v991_v14  ;;  %v282_v57 = vadd.f32 %v1440_v51, %v281_v18 }
 0x101   :  { %820 = vst.msk [vmem:[%s1700_s14 + $0x10] sm:$0xff] %vm79_vm3, %v808_v43  ;;  %v694_v12 = vadd.f32 %v682_v46, %v562_v52  ;;  %v686_v42 = vadd.f32 %v674_v15, %v554_v56  ;;  %v288_v46 = vadd.f32 %v1440_v51, %v1433_v41  ;;  %v663_v55 = vadd.f32 %v651_v22, %v567_v44 }
 0x102   :  { %v668_v30 = vadd.f32 %v656_v23, %v572_v5  ;;  %v445_v5 = vld [vmem:[%s1697_s2 + $0x58] sm:$0xff] }
 0x103   :  { %v706_v4 = vadd.f32 %v694_v12, %v670_v35  ;;  %v698_v9 = vadd.f32 %v686_v42, %v662_v10  ;;  %v657_v52 = vmul.f32 %v1423_v21, %v288_v46  ;;  %v439_v10 = vld [vmem:[%s1697_s2 + $0x28] sm:$0xff]  ;;  %v441_v12 = vld [vmem:[%s1697_s2 + $0x38] sm:$0xff]  ;;  %v681_v21 = vadd.f32 %v1322_v62, %v1026_v29 }
 0x105   :  { %v730_v27 = vadd.f32 %v718_v45, %v706_v4  ;;  %v722_v31 = vadd.f32 %v710_v59, %v698_v9  ;;  %v679_v4 = vadd.f32 %v1391_v53, %v1165_v33  ;;  %v715_v33 = vld [vmem:[%s1699_s5 + $0x28] sm:$0xff]  ;;  %v717_v53 = vld [vmem:[%s1699_s5 + $0x38] sm:$0xff] }
 0x107   :  { %v814_v16 = vmul.f32 %v1444_v48, %v730_v27  ;;  %v806_v3 = vmul.f32 %v1429_v38, %v722_v31  ;;  %v521_v15 = vpop.permute.xlu1 %520  ;;  %v531_v43 = vpop.permute.xlu0 %530  ;;  %v655_v48 = vmul.f32 %v1407_v1, %v282_v57  ;;  %v573_v1 = vld [vmem:[%s1698_s3 + $0x38] sm:$0xff] }
 0x108   :  { %v555_v2 = vsel %vm495_vm10, %v435_v49, %v521_v15  ;;  %v560_v28 = vsel %vm500_vm11, %v440_v58, %v531_v43  ;;  %v299_v42 = vpop.f32.mrf.mxu3  ;;  %v669_v29 = vadd.f32 %v657_v52, %v573_v1  ;;  %v653_v49 = vmul.f32 %v1415_v6, %v276_v54  ;;  %v569_v6 = vld [vmem:[%s1698_s3 + $0x18] sm:$0xff]  ;;  %v1721_v52 = vld [vmem:[#allocation14_spill] sm:$0xff] }
 0x109   :  { %826 = vst.msk [vmem:[%s1700_s14 + $0x40] sm:$0xff] %vm79_vm3, %v814_v16  ;;  %v687_v14 = vadd.f32 %v675_v11, %v555_v2  ;;  %v692_v50 = vadd.f32 %v680_v61, %v560_v28  ;;  %v667_v22 = vadd.f32 %v655_v48, %v571_v17  ;;  %v300_v31 = vadd.f32 %v1440_v51, %v299_v42  ;;  %v437_v11 = vld [vmem:[%s1697_s2 + $0x18] sm:$0xff]  ;;  %v575_v17 = vld [vmem:[%s1698_s3 + $0x48] sm:$0xff] }
 0x10a   :  { %818 = vst.msk [vmem:[%s1700_s14] sm:$0xff] %vm79_vm3, %v806_v3  ;;  %v685_v3 = vadd.f32 %v1402_v0, %v1170_v34  ;;  %v279_v43 = vadd.f32 %v1440_v51, %v1469_v40  ;;  %v665_v28 = vadd.f32 %v653_v49, %v569_v6  ;;  %v294_v34 = vadd.f32 %v1440_v51, %v1464_v36  ;;  %v438_v36 = vld [vmem:[%s1697_s2 + $0x20] sm:$0xff]  ;;  %v1720_v48 = vld [vmem:[#allocation5_spill] sm:$0xff]  ;;  %v576_v49 = vld [vmem:[%s1698_s3 + $0x50] sm:$0xff] }
 0x10b   :  { %v699_v38 = vadd.f32 %v687_v14, %v663_v55  ;;  %v704_v41 = vadd.f32 %v692_v50, %v668_v30  ;;  %v661_v19 = vmul.f32 %v1421_v13, %v300_v31  ;;  %v577_v13 = vld [vmem:[%s1698_s3 + $0x58] sm:$0xff]  ;;  %v1718_v55 = vld [vmem:[#allocation11_spill] sm:$0xff]  ;;  %vm498_vm0 = vcmp.eq.s32.totalorder %v1720_v48, 1 }
 0x10c   :  { %v654_v30 = vmul.f32 %v1718_v55, %v279_v43  ;;  %v1731_v6 = vld [vmem:[#allocation9_spill] sm:$0xff] }
 0x10d   :  { %v723_v56 = vadd.f32 %v711_v63, %v699_v38  ;;  %v728_v35 = vadd.f32 %v716_v25, %v704_v41  ;;  %v673_v2 = vadd.f32 %v661_v19, %v577_v13  ;;  %v570_v63 = vld [vmem:[%s1698_s3 + $0x20] sm:$0xff]  ;;  %v1719_v25 = vld [vmem:[#allocation12_spill] sm:$0xff]  ;;  %v443_v41 = vld [vmem:[%s1697_s2 + $0x48] sm:$0xff] }
 0x10e   :  { %v659_v38 = vmul.f32 %v1719_v25, %v294_v34  ;;  %v444_v19 = vld [vmem:[%s1697_s2 + $0x50] sm:$0xff] }
 0x10f   :  { %v807_v45 = vmul.f32 %v1435_v47, %v723_v56  ;;  %v812_v59 = vmul.f32 %v1458_v32, %v728_v35  ;;  %v529_v9 = vpop.permute.xlu2 %528  ;;  %v533_v18 = vpop.permute.xlu1 %532  ;;  %v1730_v13 = vld [vmem:[#allocation4_spill] sm:$0xff] }
 0x110   :  { %v559_v23 = vsel %vm499_vm12, %v439_v10, %v529_v9  ;;  %v561_v27 = vsel %vm501_vm13, %v441_v12, %v533_v18  ;;  %v1722_v10 = vld [vmem:[#allocation3_spill] sm:$0xff]  ;;  %v1726_v9 = vld [vmem:[#allocation6_spill] sm:$0xff] }
 0x111   :  { %819 = vst.msk [vmem:[%s1700_s14 + $0x8] sm:$0xff] %vm79_vm3, %v807_v45  ;;  %v691_v62 = vadd.f32 %v679_v4, %v559_v23  ;;  %v693_v37 = vadd.f32 %v681_v21, %v561_v27  ;;  %v1723_v12 = vld [vmem:[#allocation7_spill] sm:$0xff]  ;;  %v1724_v21 = vld [vmem:[#allocation8_spill] sm:$0xff]  ;;  %v1725_v4 = vld [vmem:[#allocation2_spill] sm:$0xff]  ;;  %v666_v23 = vadd.f32 %v654_v30, %v570_v63 }
 0x112   :  { %824 = vst.msk [vmem:[%s1700_s14 + $0x30] sm:$0xff] %vm79_vm3, %v812_v59  ;;  %v678_v42 = vadd.f32 %v1723_v12, %v1722_v10  ;;  %vm503_vm1 = vcmp.eq.s32.totalorder %v1724_v21, 1  ;;  %v683_v18 = vadd.f32 %v1726_v9, %v1725_v4 }
 0x113   :  { %v703_v32 = vadd.f32 %v691_v62, %v667_v22  ;;  %v705_v47 = vadd.f32 %v693_v37, %v669_v29  ;;  %v297_v22 = vadd.f32 %v1440_v51, %v1503_v7  ;;  %v671_v29 = vadd.f32 %v659_v38, %v575_v17  ;;  %v714_v62 = vld [vmem:[%s1699_s5 + $0x20] sm:$0xff]  ;;  %v719_v7 = vld [vmem:[%s1699_s5 + $0x48] sm:$0xff] }
 0x115   :  { %v727_v58 = vadd.f32 %v715_v33, %v703_v32  ;;  %v729_v44 = vadd.f32 %v717_v53, %v705_v47  ;;  %v1727_v53 = vld [vmem:[#allocation13_spill] sm:$0xff] }
 0x116   :  { %v660_v32 = vmul.f32 %v1727_v53, %v297_v22 }
 0x117   :  { %v811_v61 = vmul.f32 %v1431_v39, %v727_v58  ;;  %v813_v16 = vmul.f32 %v1483_v26, %v729_v44  ;;  %v541_v15 = vpop.permute.xlu2 %540  ;;  %v525_v8 = vpop.permute.xlu0 %524  ;;  %v1728_v44 = vld [vmem:[#allocation10_spill] sm:$0xff] }
 0x118   :  { %v565_v46 = vsel %vm505_vm14, %v445_v5, %v541_v15  ;;  %v557_v57 = vsel %vm497_vm15, %v437_v11, %v525_v8  ;;  %vm504_vm2 = vcmp.eq.s32.totalorder %v1728_v44, 1  ;;  %v1729_v5 = vld [vmem:[#allocation15_spill] sm:$0xff] }
 0x119   :  { %823 = vst.msk [vmem:[%s1700_s14 + $0x28] sm:$0xff] %vm79_vm3, %v811_v61  ;;  %v697_v39 = vadd.f32 %v685_v3, %v565_v46  ;;  %v689_v26 = vadd.f32 %v677_v24, %v557_v57  ;;  %v684_v61 = vadd.f32 %v1731_v6, %v1730_v13  ;;  %v672_v24 = vadd.f32 %v660_v32, %v576_v49  ;;  %v720_v46 = vld [vmem:[%s1699_s5 + $0x50] sm:$0xff] }
 0x11a   :  { %825 = vst.msk [vmem:[%s1700_s14 + $0x38] sm:$0xff] %vm79_vm3, %v813_v16 }
 0x11b   :  { %v701_v0 = vadd.f32 %v689_v26, %v665_v28  ;;  %v709_v40 = vadd.f32 %v697_v39, %v673_v2 }
 0x11d   :  { %v725_v14 = vadd.f32 %v713_v60, %v701_v0  ;;  %v733_v50 = vadd.f32 %v721_v20, %v709_v40 }
 0x11f   :  { %v809_v56 = vmul.f32 %v1721_v52, %v725_v14  ;;  %v804_v35 = vpop.permute.xlu2 %803  ;;  %v527_v1 = vpop.permute.xlu1 %526 }
 0x120   :  { %v817_v45 = vmul.f32 %v804_v35, %v733_v50  ;;  %v558_v59 = vsel %vm498_vm0, %v438_v36, %v527_v1  ;;  %v537_v54 = vpop.permute.xlu0 %536 }
 0x121   :  { %821 = vst.msk [vmem:[%s1700_s14 + $0x18] sm:$0xff] %vm79_vm3, %v809_v56  ;;  %v690_v27 = vadd.f32 %v678_v42, %v558_v59  ;;  %v563_v31 = vsel %vm503_vm1, %v443_v41, %v537_v54 }
 0x122   :  { %829 = vst.msk [vmem:[%s1700_s14 + $0x58] sm:$0xff] %vm79_vm3, %v817_v45  ;;  %v695_v37 = vadd.f32 %v683_v18, %v563_v31 }
 0x123   :  { %v702_v51 = vadd.f32 %v690_v27, %v666_v23 }
 0x124   :  { %v707_v33 = vadd.f32 %v695_v37, %v671_v29 }
 0x125   :  { %v726_v47 = vadd.f32 %v714_v62, %v702_v51 }
 0x126   :  { %v731_v58 = vadd.f32 %v719_v7, %v707_v33 }
 0x127   :  { %v810_v11 = vmul.f32 %v1729_v5, %v726_v47  ;;  %v539_v16 = vpop.permute.xlu1 %538 }
 0x128   :  { %v564_v3 = vsel %vm504_vm2, %v444_v19, %v539_v16  ;;  %v794_v15 = vpop.permute.xlu0 %793 }
 0x129   :  { %822 = vst.msk [vmem:[%s1700_s14 + $0x20] sm:$0xff] %vm79_vm3, %v810_v11  ;;  %v696_v8 = vadd.f32 %v684_v61, %v564_v3  ;;  %v815_v43 = vmul.f32 %v794_v15, %v731_v58 }
 0x12b   :  { %827 = vst.msk [vmem:[%s1700_s14 + $0x48] sm:$0xff] %vm79_vm3, %v815_v43  ;;  %v708_v57 = vadd.f32 %v696_v8, %v672_v24 }
 0x12d   :  { %v732_v2 = vadd.f32 %v720_v46, %v708_v57 }
 0x12f   :  { %v799_v28 = vpop.permute.xlu1 %798 }
 0x130   :  { %v816_v39 = vmul.f32 %v799_v28, %v732_v2 }
 0x132   :  { %828 = vst.msk [vmem:[%s1700_s14 + $0x50] sm:$0xff] %vm79_vm3, %v816_v39 }

// kernel: side_encoder_forward.3
= control target key start
LH: loop header
LB: loop body
LE: loop exit
PB: predicated region body
PF: predicated region fallthrough
CT: control target
= control target key end

     0   :  { %s4228_s0 = inlined_call_operand.vmem [shape: f32[4,24,32], index: 0, kind: input, shape index: {}]   ;;  %s4229_s1 = inlined_call_operand.vmem [shape: f32[4,24], index: 1, kind: input, shape index: {}]   ;;  %s4230_s2 = inlined_call_operand.vmem [shape: f32[4,4,32], index: 2, kind: input, shape index: {}]   ;;  %s4231_s3 = inlined_call_operand.vmem [shape: f32[32,32], index: 3, kind: input, shape index: {}]   ;;  %s4232_s4 = inlined_call_operand.vmem [shape: f32[1,32], index: 4, kind: input, shape index: {}]   ;;  %s4233_s5 = inlined_call_operand.vmem [shape: f32[32,32], index: 5, kind: input, shape index: {}]   ;;  %s4234_s6 = inlined_call_operand.vmem [shape: f32[1,32], index: 6, kind: input, shape index: {}]   ;;  %s4235_s7 = inlined_call_operand.vmem [shape: f32[32,96], index: 7, kind: input, shape index: {}]   ;;  %s4236_s8 = inlined_call_operand.vmem [shape: f32[1,96], index: 8, kind: input, shape index: {}]   ;;  %s4237_s9 = inlined_call_operand.vmem [shape: f32[32,32], index: 9, kind: input, shape index: {}]   ;;  %s4238_s10 = inlined_call_operand.vmem [shape: f32[1,32], index: 10, kind: input, shape index: {}]   ;;  %s4239_s11 = inlined_call_operand.vmem [shape: f32[32,32], index: 11, kind: input, shape index: {}]   ;;  %s4240_s12 = inlined_call_operand.vmem [shape: f32[1,32], index: 12, kind: input, shape index: {}]   ;;  %s4241_s13 = inlined_call_operand.vmem [shape: f32[32,32], index: 13, kind: input, shape index: {}]   ;;  %s4242_s14 = inlined_call_operand.vmem [shape: f32[1,32], index: 14, kind: input, shape index: {}]   ;;  %s4243_s15 = inlined_call_operand.vmem [shape: f32[32,64], index: 15, kind: input, shape index: {}]   ;;  %s4244_s16 = inlined_call_operand.vmem [shape: f32[1,64], index: 16, kind: input, shape index: {}]   ;;  %s4245_s17 = inlined_call_operand.vmem [shape: f32[64,64], index: 17, kind: input, shape index: {}]   ;;  %s4246_s18 = inlined_call_operand.vmem [shape: f32[1,64], index: 18, kind: input, shape index: {}]   ;;  %s4247_s19 = inlined_call_operand.vmem [shape: f32[32,32], index: 19, kind: input, shape index: {}]   ;;  %s4248_s20 = inlined_call_operand.vmem [shape: f32[1,32], index: 20, kind: input, shape index: {}]   ;;  %s4249_s21 = inlined_call_operand.vmem [shape: f32[4,24,32], index: 21, kind: output, shape index: {0}]   ;;  %s4250_s22 = inlined_call_operand.hbm [shape: f32[4,64], index: 22, kind: output, shape index: {1}]   ;;  %s4251_s23 = inlined_call_operand.hbm [shape: f32[4,4,32], index: 23, kind: output, shape index: {2}]  }
   0x1   :  { %4258 = sst [smem:[#allocation8_spill]] %s4228_s0 }
   0x2   :  { %4259 = sst [smem:[#allocation9_spill]] %s4229_s1 }
   0x3   :  { %4260 = sst [smem:[#allocation10_spill]] %s4230_s2 }
   0x4   :  { %4261 = sst [smem:[#allocation11_spill]] %s4231_s3 }
   0x5   :  { %4262 = sst [smem:[#allocation12_spill]] %s4232_s4 }
   0x6   :  { %4263 = sst [smem:[#allocation13_spill]] %s4233_s5 }
   0x7   :  { %4264 = sst [smem:[#allocation14_spill]] %s4234_s6 }
   0x8   :  { %4265 = sst [smem:[#allocation15_spill]] %s4235_s7 }
   0x9   :  { %29 = vsyncpa [#allocation3], 0  ;;  %s4266_s24 = sld [smem:[#allocation11_spill]]  ;;  %vm197_vm0 = vcmask 261120  }
   0xa   :  { %s4267_s2 = sld [smem:[#allocation8_spill]] }
   0xf   :  { %v192_v0 = vld [vmem:[%s4266_s24 + $0x18] sm:$0xff]  ;;  %v191_v1 = vld [vmem:[%s4266_s24 + $0x10] sm:$0xff]  ;;  %v190_v3 = vld [vmem:[%s4266_s24 + $0x8] sm:$0xff] }
  0x10   :  { %246 = vmatpush.msra.mxu0 %v192_v0  ;;  %v3031_v2 = vld [vmem:[%s4267_s2] sm:$0xff] }
  0x11   :  { %v189_v4 = vld [vmem:[%s4266_s24] sm:$0xff]  ;;  %v177_v5 = vmax.f32 %v3031_v2, 0.0 }
  0x12   :  { %247 = vmatpush.msra.mxu0 %v191_v1 }
  0x14   :  { %248 = vmatpush.msra.mxu0 %v190_v3 }
  0x15   :  { %30 = vsyncpa [#allocation5], 0  ;;  %v3044_v6 = vld [vmem:[%s4267_s2 + $0x8] sm:$0xff]  ;;  %v3051_v8 = vld [vmem:[%s4267_s2 + $0x10] sm:$0xff]  ;;  %s4268_s0 = sld [smem:[#allocation13_spill]]  ;;  %s2895_s5 = smov 80  }
  0x16   :  { %249 = vmatpush.msra.mxu0 %v189_v4  ;;  %v178_v7 = vmax.f32 %v3044_v6, 0.0  ;;  %v179_v9 = vmax.f32 %v3051_v8, 0.0  ;;  %v3058_v10 = vld [vmem:[%s4267_s2 + $0x18] sm:$0xff]  ;;  %v3065_v12 = vld [vmem:[%s4267_s2 + $0x20] sm:$0xff]  ;;  %v3072_v14 = vld [vmem:[%s4267_s2 + $0x28] sm:$0xff]  ;;  %s4269_s25 = sld [smem:[#allocation12_spill]] }
  0x17   :  { %2460 = vmatmul.msk.f32.vlgmr.msra.gmra.mxu0 %vm197_vm0, %v177_v5  ;;  %v180_v11 = vmax.f32 %v3058_v10, 0.0  ;;  %v181_v13 = vmax.f32 %v3065_v12, 0.0  ;;  %v182_v15 = vmax.f32 %v3072_v14, 0.0  ;;  %v3079_v16 = vld [vmem:[%s4267_s2 + $0x30] sm:$0xff]  ;;  %v3086_v18 = vld [vmem:[%s4267_s2 + $0x38] sm:$0xff]  ;;  %v3096_v21 = vld [vmem:[%s4267_s2 + $0x40] sm:$0xff] }
  0x18   :  { %v183_v17 = vmax.f32 %v3079_v16, 0.0  ;;  %v184_v19 = vmax.f32 %v3086_v18, 0.0  ;;  %v185_v22 = vmax.f32 %v3096_v21, 0.0  ;;  %v3103_v23 = vld [vmem:[%s4267_s2 + $0x48] sm:$0xff]  ;;  %v3110_v25 = vld [vmem:[%s4267_s2 + $0x50] sm:$0xff]  ;;  %v3117_v27 = vld [vmem:[%s4267_s2 + $0x58] sm:$0xff] }
  0x19   :  { %v186_v24 = vmax.f32 %v3103_v23, 0.0  ;;  %v187_v26 = vmax.f32 %v3110_v25, 0.0  ;;  %v188_v28 = vmax.f32 %v3117_v27, 0.0  ;;  %s4270_s1 = sld [smem:[#allocation15_spill]]  ;;  %vm514_vm1 = vcmask 130048   ;;  %s2897_s7 = smov 48  }
  0x1a   :  { %s4271_s30 = sld [smem:[#allocation14_spill]]  ;;  %vm730_vm2 = vcmask 195584   ;;  %s2898_s28 = smov 16   ;;  %vm2196_vm3 = vcmask 191488   ;;  %vm2413_vm8 = vcmask 257024  }
  0x1b   :  { %v302_v20 = vld [vmem:[%s4268_s0 + $0x18] sm:$0xff]  ;;  %v301_v29 = vld [vmem:[%s4268_s0 + $0x10] sm:$0xff]  ;;  %v300_v30 = vld [vmem:[%s4268_s0 + $0x8] sm:$0xff]  ;;  %s4272_s27 = sld [smem:[#allocation9_spill]] }
  0x1c   :  { %355 = vmatpush.msra.mxu1 %v302_v20  ;;  %2623 = vmatpush.msra.mxu2 %v302_v20  ;;  %v299_v31 = vld [vmem:[%s4268_s0] sm:$0xff]  ;;  %s2893_s0 = smov 96  }
  0x1d   :  { %v2705_v32 = vld [vmem:[%s4269_s25] ss:$0 sm:$0xff] }
  0x1e   :  { %356 = vmatpush.msra.mxu1 %v301_v29  ;;  %2624 = vmatpush.msra.mxu2 %v301_v29 }
  0x1f   :  { %2461 = vmatmul.msk.f32.gmra.mxu0 %vm197_vm0, %v178_v7  ;;  %v411_v57 = vld [vmem:[%s4270_s1 + $0x18] sm:$0xff] }
  0x20   :  { %357 = vmatpush.msra.mxu1 %v300_v30  ;;  %2625 = vmatpush.msra.mxu2 %v300_v30 }
  0x22   :  { %358 = vmatpush.msra.mxu1 %v299_v31  ;;  %2626 = vmatpush.msra.mxu2 %v299_v31 }
  0x24   :  { %464 = vmatpush.msrb.mxu2 %v411_v57 }
  0x27   :  { %2462 = vmatmul.msk.f32.gmra.mxu0 %vm197_vm0, %v179_v9  ;;  %v410_v9 = vld [vmem:[%s4270_s1 + $0x10] sm:$0xff] }
  0x28   :  { %465 = vmatpush.msrb.mxu2 %v410_v9 }
  0x2f   :  { %2463 = vmatmul.msk.f32.gmra.mxu0 %vm197_vm0, %v180_v11  ;;  %v409_v11 = vld [vmem:[%s4270_s1 + $0x8] sm:$0xff] }
  0x30   :  { %466 = vmatpush.msrb.mxu2 %v409_v11 }
  0x37   :  { %2464 = vmatmul.msk.f32.gmra.mxu0 %vm197_vm0, %v181_v13  ;;  %v408_v13 = vld [vmem:[%s4270_s1] sm:$0xff]  ;;  %s2896_s1 = smov 112  }
  0x38   :  { %467 = vmatpush.msrb.mxu2 %v408_v13 }
  0x3f   :  { %2465 = vmatmul.msk.f32.gmra.mxu0 %vm197_vm0, %v182_v15  ;;  %v2706_v15 = vld [vmem:[%s4271_s30] ss:$0 sm:$0xff] }
  0x47   :  { %2466 = vmatmul.msk.f32.gmra.mxu0 %vm197_vm0, %v183_v17 }
  0x4f   :  { %2467 = vmatmul.msk.f32.gmra.mxu0 %vm197_vm0, %v184_v19 }
  0x57   :  { %2468 = vmatmul.msk.f32.gmra.mxu0 %vm197_vm0, %v185_v22 }
  0x5f   :  { %2469 = vmatmul.msk.f32.gmra.mxu0 %vm197_vm0, %v186_v24 }
  0x67   :  { %2470 = vmatmul.msk.f32.gmra.mxu0 %vm197_vm0, %v187_v26 }
  0x6f   :  { %2471 = vmatmul.msk.f32.gmra.mxu0 %vm197_vm0, %v188_v28 }
  0x94   :  { %v251_v33 = vpop.f32.mrf.mxu0 }
  0x95   :  { %v252_v34 = vadd.f32 %v2705_v32, %v251_v33 }
  0x97   :  { %v287_v35 = vmax.f32 %v252_v34, 0.0 }
  0x99   :  { %2472 = vmatmul.msk.f32.vlgmr.msra.gmra.mxu1 %vm197_vm0, %v287_v35 }
  0x9c   :  { %v254_v36 = vpop.f32.mrf.mxu0 }
  0x9d   :  { %v255_v37 = vadd.f32 %v2705_v32, %v254_v36 }
  0x9f   :  { %v288_v38 = vmax.f32 %v255_v37, 0.0 }
  0xa1   :  { %2473 = vmatmul.msk.f32.gmra.mxu1 %vm197_vm0, %v288_v38 }
  0xa4   :  { %v257_v39 = vpop.f32.mrf.mxu0 }
  0xa5   :  { %v258_v40 = vadd.f32 %v2705_v32, %v257_v39 }
  0xa7   :  { %v289_v41 = vmax.f32 %v258_v40, 0.0 }
  0xa9   :  { %2474 = vmatmul.msk.f32.gmra.mxu1 %vm197_vm0, %v289_v41 }
  0xac   :  { %v260_v42 = vpop.f32.mrf.mxu0 }
  0xad   :  { %v261_v43 = vadd.f32 %v2705_v32, %v260_v42 }
  0xaf   :  { %v290_v44 = vmax.f32 %v261_v43, 0.0 }
  0xb1   :  { %2475 = vmatmul.msk.f32.gmra.mxu1 %vm197_vm0, %v290_v44 }
  0xb4   :  { %v263_v45 = vpop.f32.mrf.mxu0 }
  0xb5   :  { %v264_v46 = vadd.f32 %v2705_v32, %v263_v45 }
  0xb7   :  { %v291_v47 = vmax.f32 %v264_v46, 0.0 }
  0xb9   :  { %2476 = vmatmul.msk.f32.gmra.mxu1 %vm197_vm0, %v291_v47 }
  0xbc   :  { %v266_v48 = vpop.f32.mrf.mxu0 }
  0xbd   :  { %v267_v49 = vadd.f32 %v2705_v32, %v266_v48 }
  0xbf   :  { %v292_v50 = vmax.f32 %v267_v49, 0.0 }
  0xc1   :  { %2477 = vmatmul.msk.f32.gmra.mxu1 %vm197_vm0, %v292_v50 }
  0xc4   :  { %v269_v51 = vpop.f32.mrf.mxu0 }
  0xc5   :  { %v270_v52 = vadd.f32 %v2705_v32, %v269_v51 }
  0xc7   :  { %v293_v53 = vmax.f32 %v270_v52, 0.0 }
  0xc9   :  { %2478 = vmatmul.msk.f32.gmra.mxu1 %vm197_vm0, %v293_v53 }
  0xcc   :  { %v272_v54 = vpop.f32.mrf.mxu0 }
  0xcd   :  { %v273_v55 = vadd.f32 %v2705_v32, %v272_v54 }
  0xcf   :  { %v294_v56 = vmax.f32 %v273_v55, 0.0 }
  0xd1   :  { %2479 = vmatmul.msk.f32.gmra.mxu1 %vm197_vm0, %v294_v56 }
  0xd4   :  { %v275_v58 = vpop.f32.mrf.mxu0 }
  0xd5   :  { %v276_v59 = vadd.f32 %v2705_v32, %v275_v58 }
  0xd7   :  { %v295_v60 = vmax.f32 %v276_v59, 0.0 }
  0xd9   :  { %2480 = vmatmul.msk.f32.gmra.mxu1 %vm197_vm0, %v295_v60 }
  0xdc   :  { %v278_v61 = vpop.f32.mrf.mxu0 }
  0xdd   :  { %v279_v62 = vadd.f32 %v2705_v32, %v278_v61 }
  0xdf   :  { %v296_v63 = vmax.f32 %v279_v62, 0.0 }
  0xe1   :  { %2481 = vmatmul.msk.f32.gmra.mxu1 %vm197_vm0, %v296_v63 }
  0xe4   :  { %v281_v0 = vpop.f32.mrf.mxu0 }
  0xe5   :  { %v282_v1 = vadd.f32 %v2705_v32, %v281_v0 }
  0xe7   :  { %v297_v3 = vmax.f32 %v282_v1, 0.0 }
  0xe9   :  { %2482 = vmatmul.msk.f32.gmra.mxu1 %vm197_vm0, %v297_v3 }
  0xec   :  { %v284_v4 = vpop.f32.mrf.mxu0 }
  0xed   :  { %v285_v5 = vadd.f32 %v2705_v32, %v284_v4 }
  0xef   :  { %v298_v7 = vmax.f32 %v285_v5, 0.0 }
  0xf1   :  { %2483 = vmatmul.msk.f32.vlgmr.msra.gmra.mxu2 %vm197_vm0, %v298_v7 }
 0x116   :  { %v360_v17 = vpop.f32.mrf.mxu1 }
 0x117   :  { %v361_v19 = vadd.f32 %v2706_v15, %v360_v17 }
 0x119   :  { %v396_v20 = vadd.f32 %v361_v19, %v3031_v2 }
 0x11b   :  { %2484 = vmatmul.msk.f32.vlgmr.msrb.gmra.mxu2 %vm197_vm0, %v396_v20 }
 0x11e   :  { %v363_v22 = vpop.f32.mrf.mxu1 }
 0x11f   :  { %v364_v24 = vadd.f32 %v2706_v15, %v363_v22 }
 0x121   :  { %v397_v26 = vadd.f32 %v364_v24, %v3044_v6 }
 0x123   :  { %2485 = vmatmul.msk.f32.gmra.mxu2 %vm197_vm0, %v397_v26 }
 0x126   :  { %v366_v28 = vpop.f32.mrf.mxu1 }
 0x127   :  { %v367_v29 = vadd.f32 %v2706_v15, %v366_v28 }
 0x129   :  { %v398_v30 = vadd.f32 %v367_v29, %v3051_v8 }
 0x12b   :  { %2486 = vmatmul.msk.f32.gmra.mxu2 %vm197_vm0, %v398_v30 }
 0x12e   :  { %v369_v31 = vpop.f32.mrf.mxu1 }
 0x12f   :  { %v370_v32 = vadd.f32 %v2706_v15, %v369_v31 }
 0x131   :  { %v399_v33 = vadd.f32 %v370_v32, %v3058_v10 }
 0x133   :  { %2487 = vmatmul.msk.f32.gmra.mxu2 %vm197_vm0, %v399_v33 }
 0x136   :  { %v372_v2 = vpop.f32.mrf.mxu1 }
 0x137   :  { %v373_v34 = vadd.f32 %v2706_v15, %v372_v2 }
 0x139   :  { %v400_v35 = vadd.f32 %v373_v34, %v3065_v12 }
 0x13b   :  { %2488 = vmatmul.msk.f32.gmra.mxu2 %vm197_vm0, %v400_v35 }
 0x13e   :  { %v375_v6 = vpop.f32.mrf.mxu1 }
 0x13f   :  { %v376_v36 = vadd.f32 %v2706_v15, %v375_v6 }
 0x141   :  { %v401_v37 = vadd.f32 %v376_v36, %v3072_v14 }
 0x143   :  { %2489 = vmatmul.msk.f32.gmra.mxu2 %vm197_vm0, %v401_v37 }
 0x146   :  { %v378_v8 = vpop.f32.mrf.mxu1 }
 0x147   :  { %v379_v38 = vadd.f32 %v2706_v15, %v378_v8 }
 0x149   :  { %v402_v39 = vadd.f32 %v379_v38, %v3079_v16 }
 0x14b   :  { %2490 = vmatmul.msk.f32.gmra.mxu2 %vm197_vm0, %v402_v39 }
 0x14e   :  { %v381_v10 = vpop.f32.mrf.mxu1 }
 0x14f   :  { %v382_v40 = vadd.f32 %v2706_v15, %v381_v10 }
 0x151   :  { %v403_v41 = vadd.f32 %v382_v40, %v3086_v18 }
 0x153   :  { %2491 = vmatmul.msk.f32.gmra.mxu2 %vm197_vm0, %v403_v41 }
 0x156   :  { %v384_v12 = vpop.f32.mrf.mxu1 }
 0x157   :  { %v385_v42 = vadd.f32 %v2706_v15, %v384_v12 }
 0x159   :  { %v404_v43 = vadd.f32 %v385_v42, %v3096_v21  ;;  %v2707_v21 = vld [vmem:[%s4236_s8] ss:$0 sm:$0xff]  ;;  %s2894_s8 = smov 64  }
 0x15b   :  { %2492 = vmatmul.msk.f32.gmra.mxu2 %vm197_vm0, %v404_v43 }
 0x15e   :  { %v387_v14 = vpop.f32.mrf.mxu1 }
 0x15f   :  { %v388_v44 = vadd.f32 %v2706_v15, %v387_v14 }
 0x161   :  { %v405_v45 = vadd.f32 %v388_v44, %v3103_v23 }
 0x163   :  { %2493 = vmatmul.msk.f32.gmra.mxu2 %vm197_vm0, %v405_v45 }
 0x166   :  { %v390_v16 = vpop.f32.mrf.mxu1 }
 0x167   :  { %v391_v46 = vadd.f32 %v2706_v15, %v390_v16 }
 0x169   :  { %v406_v47 = vadd.f32 %v391_v46, %v3110_v25 }
 0x16b   :  { %2494 = vmatmul.msk.f32.gmra.mxu2 %vm197_vm0, %v406_v47 }
 0x174   :  { %v393_v18 = vpop.f32.mrf.mxu2 }
 0x175   :  { %v394_v48 = vadd.f32 %v2706_v15, %v393_v18 }
 0x177   :  { %v407_v49 = vadd.f32 %v394_v48, %v3117_v27 }
 0x179   :  { %2495 = vmatmul.msk.f32.gmra.mxu2 %vm197_vm0, %v407_v49 }
 0x19e   :  { %v469_v50 = vpop.f32.mrf.mxu2 }
 0x19f   :  { %v3187_v23 = vadd.f32 %v2707_v21, %v469_v50 }
 0x1a1   :  { %508 = vrot.lane.b32.xlu1 %v3187_v23, %s2893_s0 }
 0x1a6   :  { %v472_v25 = vpop.f32.mrf.mxu2 }
 0x1a7   :  { %v3195_v53 = vadd.f32 %v2707_v21, %v472_v25 }
 0x1ae   :  { %v475_v51 = vpop.f32.mrf.mxu2 }
 0x1af   :  { %v3191_v52 = vadd.f32 %v2707_v21, %v475_v51  ;;  %v85_v51 = vld [vmem:[%s4272_s27] sm:$0xf] }
 0x1b1   :  { %512 = vrot.lane.b32.xlu0 %v3191_v52, %s2893_s0  ;;  %v3227_v4 = vpack.i.bf16 %v3195_v53, %v3191_v52 }
 0x1b6   :  { %v478_v27 = vpop.f32.mrf.mxu2 }
 0x1b7   :  { %v3203_v57 = vadd.f32 %v2707_v21, %v478_v27 }
 0x1b9   :  { %510 = vrot.lane.b32.xlu0 %v3195_v53, %s2893_s0 }
 0x1be   :  { %v481_v54 = vpop.f32.mrf.mxu2 }
 0x1bf   :  { %v3199_v55 = vadd.f32 %v2707_v21, %v481_v54 }
 0x1c1   :  { %558 = vrot.lane.b32.xlu2 %v3199_v55, %s2893_s0  ;;  %v3255_v15 = vpack.i.bf16 %v3203_v57, %v3199_v55 }
 0x1c6   :  { %v484_v56 = vpop.f32.mrf.mxu2 }
 0x1c7   :  { %v3205_v58 = vadd.f32 %v2707_v21, %v484_v56 }
 0x1c9   :  { %556 = vrot.lane.b32.xlu2 %v3203_v57, %s2893_s0  ;;  %560 = vrot.lane.b32.xlu1 %v3205_v58, %s2893_s0  ;;  %v3243_v9 = vpack.i.bf16 %v3205_v58, %v3187_v23 }
 0x1ce   :  { %v487_v59 = vpop.f32.mrf.mxu2 }
 0x1cf   :  { %v3211_v60 = vadd.f32 %v2707_v21, %v487_v59 }
 0x1d1   :  { %603 = vrot.lane.b32.xlu2 %v3211_v60, %s2893_s0 }
 0x1d6   :  { %v490_v61 = vpop.f32.mrf.mxu2 }
 0x1d7   :  { %v3215_v62 = vadd.f32 %v2707_v21, %v490_v61 }
 0x1d9   :  { %605 = vrot.lane.b32.xlu1 %v3215_v62, %s2893_s0 }
 0x1de   :  { %v493_v63 = vpop.f32.mrf.mxu2 }
 0x1df   :  { %v3219_v0 = vadd.f32 %v2707_v21, %v493_v63 }
 0x1e1   :  { %607 = vrot.lane.b32.xlu0 %v3219_v0, %s2893_s0  ;;  %v3265_v17 = vpack.i.bf16 %v3215_v62, %v3219_v0 }
 0x1e6   :  { %v496_v1 = vpop.f32.mrf.mxu2 }
 0x1e7   :  { %v3223_v3 = vadd.f32 %v2707_v21, %v496_v1  ;;  %v163_v1 = vrot.slane %v85_v51, 1 }
 0x1e9   :  { %650 = vrot.lane.b32.xlu2 %v3223_v3, %s2893_s0  ;;  %2637 = vrot.lane.b32.xlu0 %v3227_v4, %s2894_s8 }
 0x1ee   :  { %v499_v5 = vpop.f32.mrf.mxu2 }
 0x1ef   :  { %v3233_v7 = vadd.f32 %v2707_v21, %v499_v5 }
 0x1f1   :  { %1049 = vrot.lane.b32.xlu2 %v3191_v52, %s2895_s5  ;;  %1047 = vrot.lane.b32.xlu0 %v3195_v53, %s2895_s5 }
 0x1f2   :  { %652 = vrot.lane.b32.xlu1 %v3233_v7, %s2893_s0 }
 0x1f9   :  { %1041 = vrot.lane.b32.xlu2 %v3195_v53, %s2896_s1  ;;  %1045 = vrot.lane.b32.xlu0 %v3187_v23, %s2895_s5 }
 0x1fa   :  { %2642 = vrot.lane.b32.xlu1 %v3243_v9, %s2894_s8 }
 0x1fc   :  { %v502_v11 = vpop.f32.mrf.mxu2 }
 0x1fd   :  { %v3251_v13 = vadd.f32 %v2707_v21, %v502_v11  ;;  %v2457_v11 = vadd.f32 -1.0, %v163_v1 }
 0x1ff   :  { %v3281_v19 = vpack.i.bf16 %v3251_v13, %v3211_v60 }
 0x201   :  { %1099 = vrot.lane.b32.xlu2 %v3205_v58, %s2895_s5  ;;  %654 = vrot.lane.b32.xlu0 %v3251_v13, %s2893_s0  ;;  %s2900_s0 = smov 4  }
 0x202   :  { %2647 = vrot.lane.b32.xlu1 %v3255_v15, %s2894_s8 }
 0x209   :  { %1097 = vrot.lane.b32.xlu2 %v3199_v55, %s2895_s5  ;;  %1039 = vrot.lane.b32.xlu0 %v3187_v23, %s2896_s1 }
 0x20a   :  { %2652 = vrot.lane.b32.xlu1 %v3265_v17, %s2894_s8 }
 0x211   :  { %1095 = vrot.lane.b32.xlu2 %v3203_v57, %s2895_s5  ;;  %1043 = vrot.lane.b32.xlu0 %v3191_v52, %s2896_s1 }
 0x212   :  { %1089 = vrot.lane.b32.xlu1 %v3203_v57, %s2896_s1 }
 0x213   :  { %v509_v26 = vpop.permute.xlu1 %508 }
 0x219   :  { %2657 = vrot.lane.b32.xlu2 %v3281_v19, %s2894_s8  ;;  %1149 = vrot.lane.b32.xlu0 %v3219_v0, %s2895_s5 }
 0x21b   :  { %v559_v22 = vpop.permute.xlu2 %558 }
 0x221   :  { %1147 = vrot.lane.b32.xlu0 %v3215_v62, %s2895_s5 }
 0x223   :  { %v513_v20 = vpop.permute.xlu0 %512  ;;  %v557_v28 = vpop.permute.xlu2 %556 }
 0x224   :  { %2496 = vmatpush.xpose.msk.msra.mxu3 %vm514_vm1, %v513_v20 }
 0x229   :  { %1091 = vrot.lane.b32.xlu0 %v3199_v55, %s2896_s1 }
 0x22b   :  { %v511_v24 = vpop.permute.xlu0 %510  ;;  %v604_v29 = vpop.permute.xlu2 %603 }
 0x22c   :  { %2497 = vmatpush.xpose.msk.msra.mxu3 %vm514_vm1, %v511_v24 }
 0x230   :  { %2498 = vmatpush.xpose.msk.msra.mxu3 %vm514_vm1, %v509_v26  ;;  %v174_v26 = vmul.f32 1e+09, %v2457_v11 }
 0x233   :  { %2499 = vmatmul.msk.f32.vlgmr.msra.gmra.mxu3 %vm514_vm1, %v3187_v23 }
 0x23b   :  { %2500 = vmatmul.msk.f32.gmra.mxu3 %vm514_vm1, %v3195_v53  ;;  %v561_v30 = vpop.permute.xlu1 %560 }
 0x23c   :  { %2502 = vmatpush.xpose.msk.msrb.mxu3 %vm514_vm1, %v561_v30 }
 0x240   :  { %2503 = vmatpush.xpose.msk.msrb.mxu3 %vm514_vm1, %v559_v22 }
 0x243   :  { %v651_v31 = vpop.permute.xlu2 %650  ;;  %2501 = vmatmul.msk.f32.gmra.mxu3 %vm514_vm1, %v3191_v52  ;;  %v2456_v52 = vadd.f32 -1.0, %v85_v51 }
 0x244   :  { %2504 = vmatpush.xpose.msk.msrb.mxu3 %vm514_vm1, %v557_v28 }
 0x245   :  { %v173_v27 = vmul.f32 1e+09, %v2456_v52 }
 0x247   :  { %v3344_v53 = vperm.slane %v173_v27, 0 }
 0x24b   :  { %v1050_v32 = vpop.permute.xlu2 %1049  ;;  %2505 = vmatmul.msk.f32.vlgmr.msrb.gmra.mxu3 %vm514_vm1, %v3203_v57  ;;  %v606_v34 = vpop.permute.xlu1 %605 }
 0x253   :  { %v3305_v33 = vpop.permute.xlu2 %1041  ;;  %v608_v2 = vpop.permute.xlu0 %607  ;;  %2506 = vmatmul.msk.f32.gmra.mxu3 %vm514_vm1, %v3199_v55 }
 0x254   :  { %2508 = vmatpush.xpose.msk.msra.mxu3 %vm514_vm1, %v608_v2 }
 0x258   :  { %2509 = vmatpush.xpose.msk.msra.mxu3 %vm514_vm1, %v606_v34 }
 0x25b   :  { %v1100_v35 = vpop.permute.xlu2 %1099  ;;  %v2638_v6 = vpop.permute.xlu0 %2637  ;;  %2507 = vmatmul.msk.f32.gmra.mxu3 %vm514_vm1, %v3205_v58 }
 0x25c   :  { %2510 = vmatpush.xpose.msk.msra.mxu3 %vm514_vm1, %v604_v29  ;;  %v2639_v36 = vunpack.i.l.bf16 %v2638_v6  ;;  %v2640_v37 = vunpack.i.h.bf16 %v2638_v6  ;;  %v3361_v29 = vperm.slane %v174_v26, 0 }
 0x25e   :  { %894 = vmatpush.msrb.mxu0 %v2639_v36  ;;  %v164_v36 = vrot.slane %v85_v51, 2 }
 0x260   :  { %895 = vmatpush.msrb.mxu0 %v2640_v37 }
 0x263   :  { %v1048_v8 = vpop.permute.xlu0 %1047  ;;  %2511 = vmatmul.msk.f32.vlgmr.msra.gmra.mxu3 %vm514_vm1, %v3211_v60  ;;  %v1098_v38 = vpop.permute.xlu2 %1097 }
 0x264   :  { %v653_v39 = vpop.permute.xlu1 %652 }
 0x26b   :  { %v1046_v10 = vpop.permute.xlu0 %1045  ;;  %2512 = vmatmul.msk.f32.gmra.mxu3 %vm514_vm1, %v3215_v62  ;;  %v1096_v42 = vpop.permute.xlu2 %1095 }
 0x26c   :  { %v2643_v40 = vpop.permute.xlu1 %2642 }
 0x26d   :  { %v2644_v41 = vunpack.i.l.bf16 %v2643_v40  ;;  %v2645_v12 = vunpack.i.h.bf16 %v2643_v40 }
 0x26f   :  { %896 = vmatpush.msrb.mxu0 %v2644_v41  ;;  %938 = vmatpush.msrb.mxu1 %v2645_v12 }
 0x271   :  { %2532 = vmatpush.xpose.msk.msra.mxu0 %vm514_vm1, %v1050_v32 }
 0x273   :  { %v655_v43 = vpop.permute.xlu0 %654  ;;  %2513 = vmatmul.msk.f32.gmra.mxu3 %vm514_vm1, %v3219_v0  ;;  %v2658_v16 = vpop.permute.xlu2 %2657 }
 0x274   :  { %v2648_v14 = vpop.permute.xlu1 %2647  ;;  %2514 = vmatpush.xpose.msk.msrb.mxu3 %vm514_vm1, %v655_v43  ;;  %v2660_v46 = vunpack.i.h.bf16 %v2658_v16  ;;  %v2659_v21 = vunpack.i.l.bf16 %v2658_v16 }
 0x275   :  { %2533 = vmatpush.xpose.msk.msra.mxu0 %vm514_vm1, %v1048_v8  ;;  %v2649_v44 = vunpack.i.l.bf16 %v2648_v14  ;;  %v2650_v45 = vunpack.i.h.bf16 %v2648_v14  ;;  %v2458_v8 = vadd.f32 -1.0, %v164_v36 }
 0x277   :  { %939 = vmatpush.msrb.mxu1 %v2649_v44  ;;  %v175_v40 = vmul.f32 1e+09, %v2458_v8 }
 0x278   :  { %2515 = vmatpush.xpose.msk.msrb.mxu3 %vm514_vm1, %v653_v39 }
 0x279   :  { %2534 = vmatpush.xpose.msk.msra.mxu0 %vm514_vm1, %v1046_v10  ;;  %940 = vmatpush.msrb.mxu1 %v2650_v45  ;;  %v3378_v12 = vperm.slane %v175_v40, 0 }
 0x27b   :  { %2538 = vmatpush.xpose.msk.msra.mxu1 %vm514_vm1, %v1100_v35  ;;  %v3326_v47 = vpop.permute.xlu0 %1039 }
 0x27c   :  { %v2653_v18 = vpop.permute.xlu1 %2652  ;;  %2516 = vmatpush.xpose.msk.msrb.mxu3 %vm514_vm1, %v651_v31 }
 0x27d   :  { %v2654_v48 = vunpack.i.l.bf16 %v2653_v18  ;;  %v2655_v49 = vunpack.i.h.bf16 %v2653_v18 }
 0x27f   :  { %2539 = vmatpush.xpose.msk.msra.mxu1 %vm514_vm1, %v1098_v38  ;;  %982 = vmatpush.msra.mxu2 %v2654_v48  ;;  %v165_v48 = vrot.slane %v85_v51, 3 }
 0x280   :  { %1026 = vmatpush.msra.mxu3 %v2660_v46 }
 0x281   :  { %2517 = vmatmul.msk.f32.vlgmr.msrb.gmra.mxu3 %vm514_vm1, %v3223_v3  ;;  %983 = vmatpush.msra.mxu2 %v2655_v49 }
 0x283   :  { %2540 = vmatpush.xpose.msk.msra.mxu1 %vm514_vm1, %v1096_v42  ;;  %984 = vmatpush.msra.mxu2 %v2659_v21  ;;  %v3333_v50 = vpop.permute.xlu0 %1043 }
 0x289   :  { %2518 = vmatmul.msk.f32.gmra.mxu3 %vm514_vm1, %v3233_v7 }
 0x28b   :  { %v1150_v23 = vpop.permute.xlu0 %1149 }
 0x28c   :  { %2544 = vmatpush.xpose.msk.msrb.mxu2 %vm514_vm1, %v1150_v23 }
 0x291   :  { %2519 = vmatmul.msk.f32.gmra.mxu3 %vm514_vm1, %v3251_v13 }
 0x293   :  { %v1148_v25 = vpop.permute.xlu0 %1147 }
 0x294   :  { %2545 = vmatpush.xpose.msk.msrb.mxu2 %vm514_vm1, %v1148_v25  ;;  %v2459_v25 = vadd.f32 -1.0, %v165_v48 }
 0x296   :  { %v176_v27 = vmul.f32 1e+09, %v2459_v25 }
 0x2b6   :  { %v544_v54 = vpop.f32.mrf.mxu3 }
 0x2b7   :  { %v694_v55 = vmul.f32 0.25, %v544_v54  ;;  %v3395_v54 = vperm.slane %v176_v27, 0 }
 0x2b9   :  { %v3347_v56 = vadd.f32 %v3344_v53, %v694_v55 }
 0x2bb   :  { %v731_v57 = vsel %vm730_vm2, %v3347_v56, -inf }
 0x2bc   :  { %732 = vmax.xlane.f32.xlu0 %v731_v57 }
 0x2be   :  { %v547_v59 = vpop.f32.mrf.mxu3 }
 0x2bf   :  { %v695_v61 = vmul.f32 0.25, %v547_v59 }
 0x2c1   :  { %v3352_v63 = vadd.f32 %v3344_v53, %v695_v61 }
 0x2c3   :  { %v734_v5 = vsel %vm730_vm2, %v3352_v63, -inf }
 0x2c4   :  { %735 = vmax.xlane.f32.xlu1 %v734_v5 }
 0x2c6   :  { %v550_v20 = vpop.f32.mrf.mxu3 }
 0x2c7   :  { %v696_v22 = vmul.f32 0.25, %v550_v20 }
 0x2c9   :  { %v3357_v24 = vadd.f32 %v3344_v53, %v696_v22 }
 0x2cb   :  { %v737_v28 = vsel %vm730_vm2, %v3357_v24, -inf }
 0x2cc   :  { %738 = vmax.xlane.f32.xlu2 %v737_v28 }
 0x2ce   :  { %v591_v30 = vpop.f32.mrf.mxu3 }
 0x2cf   :  { %v697_v31 = vmul.f32 0.25, %v591_v30  ;;  %v3418_v30 = vpop.permute.xlu0 %1091 }
 0x2d1   :  { %v3364_v32 = vadd.f32 %v3361_v29, %v697_v31  ;;  %v3420_v31 = vpop.permute.xlu1 %1089 }
 0x2d3   :  { %v740_v2 = vsel %vm730_vm2, %v3364_v32, -inf }
 0x2d4   :  { %741 = vmax.xlane.f32.xlu2 %v740_v2 }
 0x2d6   :  { %v594_v34 = vpop.f32.mrf.mxu3 }
 0x2d7   :  { %v698_v35 = vmul.f32 0.25, %v594_v34 }
 0x2d9   :  { %v3369_v6 = vadd.f32 %v3361_v29, %v698_v35 }
 0x2db   :  { %v743_v37 = vsel %vm730_vm2, %v3369_v6, -inf }
 0x2dc   :  { %744 = vmax.xlane.f32.xlu0 %v743_v37 }
 0x2de   :  { %v597_v38 = vpop.f32.mrf.mxu3 }
 0x2df   :  { %v699_v39 = vmul.f32 0.25, %v597_v38 }
 0x2e1   :  { %v3374_v10 = vadd.f32 %v3361_v29, %v699_v39 }
 0x2e3   :  { %v746_v41 = vsel %vm730_vm2, %v3374_v10, -inf }
 0x2e4   :  { %747 = vmax.xlane.f32.xlu2 %v746_v41 }
 0x2e6   :  { %v638_v42 = vpop.f32.mrf.mxu3 }
 0x2e7   :  { %v700_v43 = vmul.f32 0.25, %v638_v42 }
 0x2e9   :  { %v3381_v14 = vadd.f32 %v3378_v12, %v700_v43 }
 0x2eb   :  { %v749_v44 = vsel %vm730_vm2, %v3381_v14, -inf }
 0x2ec   :  { %750 = vmax.xlane.f32.xlu1 %v749_v44 }
 0x2ee   :  { %v641_v45 = vpop.f32.mrf.mxu3 }
 0x2ef   :  { %v701_v16 = vmul.f32 0.25, %v641_v45 }
 0x2f1   :  { %v3386_v46 = vadd.f32 %v3378_v12, %v701_v16 }
 0x2f3   :  { %v752_v18 = vsel %vm730_vm2, %v3386_v46, -inf }
 0x2f4   :  { %753 = vmax.xlane.f32.xlu0 %v752_v18 }
 0x2f6   :  { %v644_v49 = vpop.f32.mrf.mxu3 }
 0x2f7   :  { %v702_v21 = vmul.f32 0.25, %v644_v49 }
 0x2f9   :  { %v3391_v23 = vadd.f32 %v3378_v12, %v702_v21 }
 0x2fb   :  { %v755_v52 = vsel %vm730_vm2, %v3391_v23, -inf }
 0x2fc   :  { %756 = vmax.xlane.f32.xlu1 %v755_v52 }
 0x304   :  { %v685_v55 = vpop.f32.mrf.mxu3 }
 0x305   :  { %v703_v57 = vmul.f32 0.25, %v685_v55 }
 0x307   :  { %v3398_v59 = vadd.f32 %v3395_v54, %v703_v57 }
 0x308   :  { %1145 = vrot.lane.b32.xlu0 %v3211_v60, %s2895_s5 }
 0x309   :  { %v758_v51 = vsel %vm730_vm2, %v3398_v59, -inf }
 0x30a   :  { %759 = vmax.xlane.f32.xlu1 %v758_v51 }
 0x30c   :  { %v688_v61 = vpop.f32.mrf.mxu3 }
 0x30d   :  { %v704_v1 = vmul.f32 0.25, %v688_v61 }
 0x30f   :  { %v3405_v5 = vadd.f32 %v3395_v54, %v704_v1 }
 0x310   :  { %1139 = vrot.lane.b32.xlu0 %v3211_v60, %s2896_s1  ;;  %v3424_v60 = vpack.i.bf16 %v3223_v3, %v3233_v7 }
 0x311   :  { %v761_v11 = vsel %vm730_vm2, %v3405_v5, -inf }
 0x312   :  { %762 = vmax.xlane.f32.xlu2 %v761_v11 }
 0x314   :  { %v691_v20 = vpop.f32.mrf.mxu3 }
 0x315   :  { %v705_v22 = vmul.f32 0.25, %v691_v20 }
 0x317   :  { %v3412_v26 = vadd.f32 %v3395_v54, %v705_v22 }
 0x318   :  { %1093 = vrot.lane.b32.xlu0 %v3205_v58, %s2896_s1 }
 0x319   :  { %v764_v28 = vsel %vm730_vm2, %v3412_v26, -inf }
 0x31a   :  { %765 = vmax.xlane.f32.xlu1 %v764_v28 }
 0x32f   :  { %v733_v2 = vpop.xlane.xlu0 %732 }
 0x330   :  { %v767_v34 = vsub.f32 %v3347_v56, %v733_v2 }
 0x332   :  { %v779_v35 = vmul.f32 1.442695, %v767_v34 }
 0x333   :  { %2662 = vrot.lane.b32.xlu1 %v3424_v60, %s2894_s8 }
 0x334   :  { %2714 = vpow2.f32 %v779_v35 }
 0x337   :  { %v736_v36 = vpop.xlane.xlu1 %735 }
 0x338   :  { %v768_v58 = vsub.f32 %v3352_v63, %v736_v36 }
 0x33a   :  { %v3430_v37 = vpop.eup %2714  ;;  %v781_v8 = vmul.f32 1.442695, %v768_v58 }
 0x33b   :  { %v803_v38 = vsel %vm730_vm2, %v3430_v37, 0.0 }
 0x33c   :  { %2716 = vpow2.f32 %v781_v8  ;;  %804 = vadd.xlane.f32.xlu2 %v803_v38 }
 0x33f   :  { %v739_v39 = vpop.xlane.xlu2 %738 }
 0x340   :  { %v769_v40 = vsub.f32 %v3357_v24, %v739_v39 }
 0x342   :  { %v3435_v56 = vpop.eup %2716  ;;  %v783_v41 = vmul.f32 1.442695, %v769_v40 }
 0x343   :  { %v806_v42 = vsel %vm730_vm2, %v3435_v56, 0.0 }
 0x344   :  { %2718 = vpow2.f32 %v783_v41  ;;  %807 = vadd.xlane.f32.xlu2 %v806_v42 }
 0x347   :  { %v742_v63 = vpop.xlane.xlu2 %741 }
 0x348   :  { %v770_v43 = vsub.f32 %v3364_v32, %v742_v63 }
 0x34a   :  { %v3440_v44 = vpop.eup %2718  ;;  %v785_v45 = vmul.f32 1.442695, %v770_v43 }
 0x34b   :  { %v809_v16 = vsel %vm730_vm2, %v3440_v44, 0.0 }
 0x34c   :  { %2720 = vpow2.f32 %v785_v45  ;;  %810 = vadd.xlane.f32.xlu0 %v809_v16 }
 0x34f   :  { %v745_v24 = vpop.xlane.xlu0 %744 }
 0x350   :  { %v771_v18 = vsub.f32 %v3369_v6, %v745_v24 }
 0x352   :  { %v3445_v48 = vpop.eup %2720  ;;  %v787_v49 = vmul.f32 1.442695, %v771_v18 }
 0x353   :  { %v812_v21 = vsel %vm730_vm2, %v3445_v48, 0.0 }
 0x354   :  { %2722 = vpow2.f32 %v787_v49  ;;  %813 = vadd.xlane.f32.xlu2 %v812_v21 }
 0x35a   :  { %v3449_v32 = vpop.eup %2722 }
 0x35b   :  { %v815_v25 = vsel %vm730_vm2, %v3449_v32, 0.0 }
 0x35c   :  { %816 = vadd.xlane.f32.xlu2 %v815_v25 }
 0x35f   :  { %v751_v52 = vpop.xlane.xlu1 %750 }
 0x360   :  { %v773_v27 = vsub.f32 %v3381_v14, %v751_v52  ;;  %1141 = vrot.lane.b32.xlu0 %v3215_v62, %s2896_s1 }
 0x362   :  { %v791_v6 = vmul.f32 1.442695, %v773_v27 }
 0x364   :  { %2724 = vpow2.f32 %v791_v6 }
 0x367   :  { %v754_v55 = vpop.xlane.xlu0 %753 }
 0x368   :  { %v774_v57 = vsub.f32 %v3386_v46, %v754_v55  ;;  %v748_v46 = vpop.xlane.xlu2 %747 }
 0x369   :  { %v772_v28 = vsub.f32 %v3374_v10, %v748_v46 }
 0x36a   :  { %v3457_v51 = vpop.eup %2724  ;;  %v793_v61 = vmul.f32 1.442695, %v774_v57 }
 0x36b   :  { %v821_v1 = vsel %vm730_vm2, %v3457_v51, 0.0 }
 0x36c   :  { %2726 = vpow2.f32 %v793_v61  ;;  %822 = vadd.xlane.f32.xlu2 %v821_v1 }
 0x36f   :  { %v757_v11 = vpop.xlane.xlu1 %756 }
 0x370   :  { %v775_v20 = vsub.f32 %v3391_v23, %v757_v11  ;;  %v789_v23 = vmul.f32 1.442695, %v772_v28 }
 0x372   :  { %v3462_v14 = vpop.eup %2726  ;;  %v795_v22 = vmul.f32 1.442695, %v775_v20 }
 0x373   :  { %v824_v62 = vsel %vm730_vm2, %v3462_v14, 0.0 }
 0x374   :  { %2728 = vpow2.f32 %v795_v22  ;;  %825 = vadd.xlane.f32.xlu1 %v824_v62 }
 0x375   :  { %2730 = vpow2.f32 %v789_v23 }
 0x37a   :  { %v3467_v2 = vpop.eup %2728  ;;  %v1146_v34 = vpop.permute.xlu0 %1145 }
 0x37b   :  { %2546 = vmatpush.xpose.msk.msrb.mxu2 %vm514_vm1, %v1146_v34  ;;  %v827_v35 = vsel %vm730_vm2, %v3467_v2, 0.0  ;;  %v3475_v8 = vpop.eup %2730 }
 0x37c   :  { %828 = vadd.xlane.f32.xlu1 %v827_v35  ;;  %v818_v38 = vsel %vm730_vm2, %v3475_v8, 0.0 }
 0x37d   :  { %v760_v41 = vpop.xlane.xlu1 %759 }
 0x384   :  { %1199 = vrot.lane.b32.xlu2 %v3251_v13, %s2895_s5 }
 0x385   :  { %v763_v36 = vpop.xlane.xlu2 %762 }
 0x386   :  { %v777_v58 = vsub.f32 %v3405_v5, %v763_v36  ;;  %v776_v5 = vsub.f32 %v3398_v59, %v760_v41  ;;  %v1140_v59 = vpop.permute.xlu0 %1139 }
 0x388   :  { %v799_v10 = vmul.f32 1.442695, %v777_v58  ;;  %v797_v63 = vmul.f32 1.442695, %v776_v5 }
 0x38a   :  { %2732 = vpow2.f32 %v799_v10  ;;  %819 = vadd.xlane.f32.xlu0 %v818_v38 }
 0x38b   :  { %2734 = vpow2.f32 %v797_v63 }
 0x38d   :  { %v766_v42 = vpop.xlane.xlu1 %765 }
 0x38e   :  { %v778_v43 = vsub.f32 %v3412_v26, %v766_v42  ;;  %v1094_v27 = vpop.permute.xlu0 %1093 }
 0x390   :  { %v3479_v39 = vpop.eup %2732  ;;  %v801_v18 = vmul.f32 1.442695, %v778_v43 }
 0x391   :  { %v833_v40 = vsel %vm730_vm2, %v3479_v39, 0.0  ;;  %v3489_v49 = vpop.eup %2734 }
 0x392   :  { %834 = vadd.xlane.f32.xlu1 %v833_v40  ;;  %2736 = vpow2.f32 %v801_v18 }
 0x398   :  { %v3497_v21 = vpop.eup %2736 }
 0x399   :  { %v836_v25 = vsel %vm730_vm2, %v3497_v21, 0.0 }
 0x39e   :  { %1143 = vrot.lane.b32.xlu0 %v3219_v0, %s2896_s1  ;;  %v830_v0 = vsel %vm730_vm2, %v3489_v49, 0.0 }
 0x3a5   :  { %v2663_v45 = vpop.permute.xlu1 %2662 }
 0x3a6   :  { %v2664_v16 = vunpack.i.l.bf16 %v2663_v45  ;;  %v2665_v24 = vunpack.i.h.bf16 %v2663_v45  ;;  %1197 = vrot.lane.b32.xlu0 %v3233_v7, %s2895_s5 }
 0x3a8   :  { %1027 = vmatpush.msra.mxu3 %v2664_v16 }
 0x3aa   :  { %1028 = vmatpush.msra.mxu3 %v2665_v24 }
 0x3ab   :  { %1189 = vrot.lane.b32.xlu1 %v3223_v3, %s2896_s1 }
 0x3ad   :  { %831 = vadd.xlane.f32.xlu2 %v830_v0 }
 0x3ae   :  { %1195 = vrot.lane.b32.xlu0 %v3223_v3, %s2895_s5 }
 0x3af   :  { %v805_v26 = vpop.xlane.xlu2 %804 }
 0x3b0   :  { %2738 = vrcp.f32 %v805_v26 }
 0x3b5   :  { %837 = vadd.xlane.f32.xlu2 %v836_v25 }
 0x3b6   :  { %v2739_v52 = vpop.eup %2738  ;;  %1193 = vrot.lane.b32.xlu0 %v3251_v13, %s2896_s1 }
 0x3b7   :  { %v808_v6 = vpop.xlane.xlu2 %807  ;;  %v851_v55 = vmul.f32 %v2739_v52, %v3430_v37 }
 0x3b8   :  { %2740 = vrcp.f32 %v808_v6 }
 0x3b9   :  { %2520 = vmatmul.msk.f32.vlgmr.msrb.gmra.mxu0 %vm730_vm2, %v851_v55 }
 0x3be   :  { %v2741_v3 = vpop.eup %2740  ;;  %2667 = vrot.lane.b32.xlu0 %v3227_v4, %s2897_s7 }
 0x3bf   :  { %v811_v57 = vpop.xlane.xlu0 %810  ;;  %v852_v61 = vmul.f32 %v2741_v3, %v3435_v56 }
 0x3c0   :  { %2742 = vrcp.f32 %v811_v57 }
 0x3c1   :  { %2521 = vmatmul.msk.f32.gmra.mxu0 %vm730_vm2, %v852_v61 }
 0x3c6   :  { %v2743_v1 = vpop.eup %2742 }
 0x3c7   :  { %v814_v13 = vpop.xlane.xlu2 %813  ;;  %v853_v11 = vmul.f32 %v2743_v1, %v3440_v44 }
 0x3c8   :  { %2744 = vrcp.f32 %v814_v13 }
 0x3c9   :  { %2522 = vmatmul.msk.f32.gmra.mxu0 %vm730_vm2, %v853_v11 }
 0x3cd   :  { %1191 = vrot.lane.b32.xlu2 %v3233_v7, %s2896_s1 }
 0x3ce   :  { %v2745_v37 = vpop.eup %2744 }
 0x3cf   :  { %v817_v20 = vpop.xlane.xlu2 %816  ;;  %v854_v4 = vmul.f32 %v2745_v37, %v3445_v48 }
 0x3d0   :  { %2746 = vrcp.f32 %v817_v20 }
 0x3d1   :  { %2523 = vmatmul.msk.f32.vlgmr.msrb.gmra.mxu1 %vm730_vm2, %v854_v4  ;;  %2535 = vmatmul.msk.f32.vlgmr.msra.gmra.mxu0 %vm514_vm1, %v3326_v47 }
 0x3d6   :  { %v2747_v56 = vpop.eup %2746 }
 0x3d7   :  { %v855_v22 = vmul.f32 %v2747_v56, %v3449_v32 }
 0x3d9   :  { %2524 = vmatmul.msk.f32.gmra.mxu1 %vm730_vm2, %v855_v22  ;;  %2536 = vmatmul.msk.f32.gmra.mxu0 %vm514_vm1, %v3305_v33  ;;  %v1142_v33 = vpop.permute.xlu0 %1141 }
 0x3df   :  { %v823_v44 = vpop.xlane.xlu2 %822 }
 0x3e0   :  { %2748 = vrcp.f32 %v823_v44 }
 0x3e1   :  { %2537 = vmatmul.msk.f32.gmra.mxu0 %vm514_vm1, %v3333_v50 }
 0x3e6   :  { %v2749_v7 = vpop.eup %2748 }
 0x3e7   :  { %v857_v48 = vmul.f32 %v2749_v7, %v3457_v51  ;;  %v1200_v62 = vpop.permute.xlu2 %1199  ;;  %v826_v46 = vpop.xlane.xlu1 %825 }
 0x3e8   :  { %2750 = vrcp.f32 %v826_v46  ;;  %2550 = vmatpush.xpose.msk.msrb.mxu3 %vm514_vm1, %v1200_v62 }
 0x3e9   :  { %2526 = vmatmul.msk.f32.vlgmr.msra.gmra.mxu2 %vm730_vm2, %v857_v48 }
 0x3ee   :  { %v2751_v47 = vpop.eup %2750 }
 0x3ef   :  { %v829_v32 = vpop.xlane.xlu1 %828  ;;  %v858_v28 = vmul.f32 %v2751_v47, %v3462_v14 }
 0x3f0   :  { %2752 = vrcp.f32 %v829_v32 }
 0x3f1   :  { %2527 = vmatmul.msk.f32.gmra.mxu2 %vm730_vm2, %v858_v28 }
 0x3f6   :  { %v2753_v34 = vpop.eup %2752 }
 0x3f7   :  { %v859_v50 = vmul.f32 %v2753_v34, %v3467_v2 }
 0x3f9   :  { %2528 = vmatmul.msk.f32.gmra.mxu2 %vm730_vm2, %v859_v50 }
 0x3fd   :  { %v820_v51 = vpop.xlane.xlu0 %819 }
 0x3fe   :  { %2754 = vrcp.f32 %v820_v51 }
 0x401   :  { %2547 = vmatmul.msk.f32.vlgmr.msrb.gmra.mxu2 %vm514_vm1, %v1140_v59 }
 0x404   :  { %v2755_v35 = vpop.eup %2754 }
 0x405   :  { %v856_v23 = vmul.f32 %v2755_v35, %v3475_v8  ;;  %v835_v8 = vpop.xlane.xlu1 %834 }
 0x407   :  { %2525 = vmatmul.msk.f32.gmra.mxu1 %vm730_vm2, %v856_v23 }
 0x409   :  { %2548 = vmatmul.msk.f32.gmra.mxu2 %vm514_vm1, %v1142_v33 }
 0x40f   :  { %2541 = vmatmul.msk.f32.vlgmr.msra.gmra.mxu1 %vm514_vm1, %v3420_v31 }
 0x410   :  { %v1144_v14 = vpop.permute.xlu0 %1143 }
 0x411   :  { %2549 = vmatmul.msk.f32.gmra.mxu2 %vm514_vm1, %v1144_v14 }
 0x417   :  { %2542 = vmatmul.msk.f32.gmra.mxu1 %vm514_vm1, %v3418_v30 }
 0x418   :  { %v1198_v2 = vpop.permute.xlu0 %1197 }
 0x419   :  { %2551 = vmatpush.xpose.msk.msrb.mxu3 %vm514_vm1, %v1198_v2 }
 0x41d   :  { %v1190_v18 = vpop.permute.xlu1 %1189 }
 0x41f   :  { %2543 = vmatmul.msk.f32.gmra.mxu1 %vm514_vm1, %v1094_v27 }
 0x420   :  { %v1196_v36 = vpop.permute.xlu0 %1195  ;;  %v832_v58 = vpop.xlane.xlu2 %831 }
 0x421   :  { %2756 = vrcp.f32 %v832_v58  ;;  %2552 = vmatpush.xpose.msk.msrb.mxu3 %vm514_vm1, %v1196_v36 }
 0x422   :  { %2758 = vrcp.f32 %v835_v8 }
 0x427   :  { %v2757_v10 = vpop.eup %2756 }
 0x428   :  { %v860_v31 = vmul.f32 %v2757_v10, %v3489_v49  ;;  %v1194_v38 = vpop.permute.xlu0 %1193  ;;  %v838_v40 = vpop.xlane.xlu2 %837 }
 0x429   :  { %v2759_v30 = vpop.eup %2758  ;;  %2760 = vrcp.f32 %v838_v40 }
 0x42a   :  { %2529 = vmatmul.msk.f32.vlgmr.msra.gmra.mxu3 %vm730_vm2, %v860_v31  ;;  %v861_v5 = vmul.f32 %v2759_v30, %v3479_v39 }
 0x42f   :  { %v2761_v43 = vpop.eup %2760 }
 0x430   :  { %v2668_v41 = vpop.permute.xlu0 %2667  ;;  %v862_v16 = vmul.f32 %v2761_v43, %v3497_v21  ;;  %v1192_v39 = vpop.permute.xlu2 %1191 }
 0x431   :  { %v2669_v42 = vunpack.i.l.bf16 %v2668_v41  ;;  %v2670_v63 = vunpack.i.h.bf16 %v2668_v41 }
 0x432   :  { %2530 = vmatmul.msk.f32.gmra.mxu3 %vm730_vm2, %v861_v5 }
 0x433   :  { %1426 = vmatpush.msrb.mxu0 %v2669_v42 }
 0x435   :  { %1427 = vmatpush.msrb.mxu0 %v2670_v63 }
 0x436   :  { %v3546_v45 = vpop.f32.mrf.mxu0 }
 0x43a   :  { %2531 = vmatmul.msk.f32.gmra.mxu3 %vm730_vm2, %v862_v16 }
 0x43e   :  { %v3550_v24 = vpop.f32.mrf.mxu0 }
 0x442   :  { %2553 = vmatmul.msk.f32.vlgmr.msrb.gmra.mxu3 %vm514_vm1, %v1190_v18 }
 0x446   :  { %v3553_v49 = vpop.f32.mrf.mxu0 }
 0x44a   :  { %2554 = vmatmul.msk.f32.gmra.mxu3 %vm514_vm1, %v1192_v39 }
 0x44e   :  { %v1080_v0 = vpop.f32.mrf.mxu0  ;;  %v3571_v1 = vpop.f32.mrf.mxu1 }
 0x44f   :  { %v1239_v59 = vmul.f32 0.25, %v1080_v0 }
 0x451   :  { %v1251_v26 = vadd.f32 %v1239_v59, %v3344_v53 }
 0x452   :  { %2555 = vmatmul.msk.f32.gmra.mxu3 %vm514_vm1, %v1194_v38 }
 0x453   :  { %v1263_v21 = vsel %vm730_vm2, %v1251_v26, -inf }
 0x454   :  { %1264 = vmax.xlane.f32.xlu2 %v1263_v21 }
 0x456   :  { %v1083_v25 = vpop.f32.mrf.mxu0  ;;  %v3575_v11 = vpop.f32.mrf.mxu1 }
 0x457   :  { %v1240_v52 = vmul.f32 0.25, %v1083_v25 }
 0x459   :  { %v3560_v27 = vadd.f32 %v1240_v52, %v3344_v53 }
 0x45b   :  { %v1266_v6 = vsel %vm730_vm2, %v3560_v27, -inf }
 0x45c   :  { %1267 = vmax.xlane.f32.xlu0 %v1266_v6 }
 0x45e   :  { %v1086_v55 = vpop.f32.mrf.mxu0 }
 0x45f   :  { %v1241_v3 = vmul.f32 0.25, %v1086_v55 }
 0x461   :  { %v3565_v57 = vadd.f32 %v1241_v3, %v3344_v53 }
 0x463   :  { %v1269_v61 = vsel %vm730_vm2, %v3565_v57, -inf }
 0x464   :  { %1270 = vmax.xlane.f32.xlu1 %v1269_v61 }
 0x46c   :  { %2672 = vrot.lane.b32.xlu2 %v3243_v9, %s2897_s7  ;;  %v3573_v13 = vpop.f32.mrf.mxu2 }
 0x474   :  { %v3579_v37 = vpop.f32.mrf.mxu2 }
 0x47c   :  { %v3583_v20 = vpop.f32.mrf.mxu2 }
 0x47d   :  { %2677 = vrot.lane.b32.xlu1 %v3255_v15, %s2897_s7 }
 0x484   :  { %v3581_v53 = vpop.f32.mrf.mxu1  ;;  %v1180_v9 = vpop.f32.mrf.mxu2 }
 0x485   :  { %v1245_v62 = vmul.f32 0.25, %v1180_v9 }
 0x487   :  { %v3596_v33 = vadd.f32 %v1245_v62, %v3378_v12 }
 0x489   :  { %v1281_v35 = vsel %vm730_vm2, %v3596_v33, -inf }
 0x48c   :  { %v1130_v4 = vpop.f32.mrf.mxu1  ;;  %v1183_v47 = vpop.f32.mrf.mxu2 }
 0x48d   :  { %v1242_v56 = vmul.f32 0.25, %v1130_v4  ;;  %v1246_v50 = vmul.f32 0.25, %v1183_v47 }
 0x48f   :  { %v3586_v22 = vadd.f32 %v1242_v56, %v3361_v29  ;;  %v3606_v23 = vadd.f32 %v1246_v50, %v3378_v12 }
 0x491   :  { %v1272_v7 = vsel %vm730_vm2, %v3586_v22, -inf  ;;  %v1284_v36 = vsel %vm730_vm2, %v3606_v23, -inf }
 0x494   :  { %v1133_v44 = vpop.f32.mrf.mxu1  ;;  %v1186_v14 = vpop.f32.mrf.mxu2 }
 0x495   :  { %v1243_v48 = vmul.f32 0.25, %v1133_v44  ;;  %1273 = vmax.xlane.f32.xlu2 %v1272_v7  ;;  %v1247_v2 = vmul.f32 0.25, %v1186_v14 }
 0x497   :  { %v3591_v15 = vadd.f32 %v1243_v48, %v3361_v29  ;;  %v3613_v58 = vadd.f32 %v1247_v2, %v3378_v12 }
 0x499   :  { %v1275_v46 = vsel %vm730_vm2, %v3591_v15, -inf  ;;  %v1287_v8 = vsel %vm730_vm2, %v3613_v58, -inf }
 0x49a   :  { %1276 = vmax.xlane.f32.xlu0 %v1275_v46 }
 0x49c   :  { %v1136_v32 = vpop.f32.mrf.mxu1 }
 0x49d   :  { %v1244_v28 = vmul.f32 0.25, %v1136_v32 }
 0x49f   :  { %v3599_v34 = vadd.f32 %v1244_v28, %v3361_v29 }
 0x4a1   :  { %v1278_v51 = vsel %vm730_vm2, %v3599_v34, -inf }
 0x4a2   :  { %1279 = vmax.xlane.f32.xlu2 %v1278_v51  ;;  %1282 = vmax.xlane.f32.xlu0 %v1281_v35 }
 0x4aa   :  { %1285 = vmax.xlane.f32.xlu2 %v1284_v36 }
 0x4ad   :  { %v3610_v29 = vpop.f32.mrf.mxu3 }
 0x4b2   :  { %1288 = vmax.xlane.f32.xlu2 %v1287_v8 }
 0x4b5   :  { %v3617_v10 = vpop.f32.mrf.mxu3 }
 0x4bd   :  { %v3619_v31 = vpop.f32.mrf.mxu3 }
 0x4c5   :  { %v1230_v38 = vpop.f32.mrf.mxu3 }
 0x4c6   :  { %v1248_v40 = vmul.f32 0.25, %v1230_v38 }
 0x4c7   :  { %v1265_v30 = vpop.xlane.xlu2 %1264 }
 0x4c8   :  { %v1299_v41 = vsub.f32 %v1251_v26, %v1265_v30  ;;  %v3622_v5 = vadd.f32 %v1248_v40, %v3395_v54 }
 0x4ca   :  { %v1311_v42 = vmul.f32 1.442695, %v1299_v41  ;;  %v1290_v12 = vsel %vm730_vm2, %v3622_v5, -inf }
 0x4cb   :  { %1291 = vmax.xlane.f32.xlu1 %v1290_v12 }
 0x4cc   :  { %2762 = vpow2.f32 %v1311_v42 }
 0x4cd   :  { %v1233_v63 = vpop.f32.mrf.mxu3 }
 0x4ce   :  { %v1249_v43 = vmul.f32 0.25, %v1233_v63 }
 0x4cf   :  { %v2673_v16 = vpop.permute.xlu2 %2672  ;;  %v1268_v18 = vpop.xlane.xlu0 %1267 }
 0x4d0   :  { %v2675_v39 = vunpack.i.h.bf16 %v2673_v16  ;;  %v2674_v0 = vunpack.i.l.bf16 %v2673_v16  ;;  %v1300_v59 = vsub.f32 %v3560_v27, %v1268_v18  ;;  %v3628_v21 = vadd.f32 %v1249_v43, %v3395_v54 }
 0x4d2   :  { %v3630_v26 = vpop.eup %2762  ;;  %v1313_v25 = vmul.f32 1.442695, %v1300_v59  ;;  %1428 = vmatpush.msrb.mxu0 %v2674_v0  ;;  %1470 = vmatpush.msrb.mxu1 %v2675_v39  ;;  %v1293_v52 = vsel %vm730_vm2, %v3628_v21, -inf }
 0x4d3   :  { %1294 = vmax.xlane.f32.xlu0 %v1293_v52  ;;  %v1335_v6 = vsel %vm730_vm2, %v3630_v26, 0.0 }
 0x4d4   :  { %2764 = vpow2.f32 %v1313_v25  ;;  %1336 = vadd.xlane.f32.xlu1 %v1335_v6 }
 0x4d5   :  { %v1236_v55 = vpop.f32.mrf.mxu3 }
 0x4d6   :  { %v1250_v3 = vmul.f32 0.25, %v1236_v55 }
 0x4d7   :  { %v1271_v27 = vpop.xlane.xlu1 %1270 }
 0x4d8   :  { %v1301_v61 = vsub.f32 %v3565_v57, %v1271_v27  ;;  %v3638_v4 = vadd.f32 %v1250_v3, %v3395_v54 }
 0x4da   :  { %v3640_v56 = vpop.eup %2764  ;;  %v1315_v9 = vmul.f32 1.442695, %v1301_v61  ;;  %v1296_v44 = vsel %vm730_vm2, %v3638_v4, -inf }
 0x4db   :  { %1297 = vmax.xlane.f32.xlu2 %v1296_v44  ;;  %v1338_v7 = vsel %vm730_vm2, %v3640_v56, 0.0 }
 0x4dc   :  { %2766 = vpow2.f32 %v1315_v9  ;;  %1339 = vadd.xlane.f32.xlu1 %v1338_v7 }
 0x4e2   :  { %v3646_v48 = vpop.eup %2766 }
 0x4e3   :  { %v1341_v57 = vsel %vm730_vm2, %v3646_v48, 0.0 }
 0x4e4   :  { %1342 = vadd.xlane.f32.xlu1 %v1341_v57 }
 0x4e7   :  { %2687 = vrot.lane.b32.xlu0 %v3281_v19, %s2897_s7 }
 0x4ef   :  { %v2678_v54 = vpop.permute.xlu1 %2677 }
 0x4f0   :  { %v2679_v62 = vunpack.i.l.bf16 %v2678_v54  ;;  %v2680_v46 = vunpack.i.h.bf16 %v2678_v54 }
 0x4f2   :  { %1471 = vmatpush.msrb.mxu1 %v2679_v62 }
 0x4f3   :  { %2682 = vrot.lane.b32.xlu2 %v3265_v17, %s2897_s7 }
 0x4f4   :  { %1472 = vmatpush.msrb.mxu1 %v2680_v46 }
 0x508   :  { %v1274_v47 = vpop.xlane.xlu2 %1273 }
 0x509   :  { %v1302_v32 = vsub.f32 %v3586_v22, %v1274_v47 }
 0x50b   :  { %v1317_v28 = vmul.f32 1.442695, %v1302_v32 }
 0x50d   :  { %2768 = vpow2.f32 %v1317_v28  ;;  %v1277_v50 = vpop.xlane.xlu0 %1276 }
 0x50e   :  { %v1303_v51 = vsub.f32 %v3591_v15, %v1277_v50 }
 0x510   :  { %v1319_v35 = vmul.f32 1.442695, %v1303_v51 }
 0x512   :  { %2770 = vpow2.f32 %v1319_v35 }
 0x513   :  { %v3656_v14 = vpop.eup %2768 }
 0x514   :  { %v1344_v19 = vsel %vm730_vm2, %v3656_v14, 0.0 }
 0x515   :  { %v1280_v2 = vpop.xlane.xlu2 %1279  ;;  %v1283_v36 = vpop.xlane.xlu0 %1282  ;;  %1345 = vadd.xlane.f32.xlu1 %v1344_v19 }
 0x516   :  { %v1304_v17 = vsub.f32 %v3599_v34, %v1280_v2  ;;  %v1305_v22 = vsub.f32 %v3596_v33, %v1283_v36 }
 0x518   :  { %v1321_v8 = vmul.f32 1.442695, %v1304_v17  ;;  %v3662_v38 = vpop.eup %2770  ;;  %v1323_v40 = vmul.f32 1.442695, %v1305_v22 }
 0x519   :  { %v1347_v15 = vsel %vm730_vm2, %v3662_v38, 0.0 }
 0x51a   :  { %2772 = vpow2.f32 %v1321_v8 }
 0x51b   :  { %2774 = vpow2.f32 %v1323_v40 }
 0x51d   :  { %v1286_v30 = vpop.xlane.xlu2 %1285  ;;  %1348 = vadd.xlane.f32.xlu1 %v1347_v15 }
 0x51e   :  { %v1306_v42 = vsub.f32 %v3606_v23, %v1286_v30 }
 0x520   :  { %v3666_v41 = vpop.eup %2772  ;;  %v1325_v12 = vmul.f32 1.442695, %v1306_v42 }
 0x521   :  { %v1350_v34 = vsel %vm730_vm2, %v3666_v41, 0.0  ;;  %v3671_v63 = vpop.eup %2774 }
 0x522   :  { %1351 = vadd.xlane.f32.xlu0 %v1350_v34  ;;  %2776 = vpow2.f32 %v1325_v12  ;;  %v1353_v18 = vsel %vm730_vm2, %v3671_v63, 0.0 }
 0x525   :  { %v1289_v33 = vpop.xlane.xlu2 %1288 }
 0x526   :  { %v1307_v43 = vsub.f32 %v3613_v58, %v1289_v33 }
 0x528   :  { %v1327_v16 = vmul.f32 1.442695, %v1307_v43  ;;  %v3676_v39 = vpop.eup %2776 }
 0x529   :  { %v1356_v59 = vsel %vm730_vm2, %v3676_v39, 0.0 }
 0x52a   :  { %2778 = vpow2.f32 %v1327_v16  ;;  %1354 = vadd.xlane.f32.xlu0 %v1353_v18 }
 0x530   :  { %v3678_v23 = vpop.eup %2778 }
 0x531   :  { %v1359_v0 = vsel %vm730_vm2, %v3678_v23, 0.0 }
 0x532   :  { %1360 = vadd.xlane.f32.xlu2 %v1359_v0  ;;  %1357 = vadd.xlane.f32.xlu0 %v1356_v59 }
 0x53e   :  { %v1292_v58 = vpop.xlane.xlu1 %1291 }
 0x53f   :  { %v1308_v25 = vsub.f32 %v3622_v5, %v1292_v58 }
 0x541   :  { %v1329_v52 = vmul.f32 1.442695, %v1308_v25 }
 0x543   :  { %2780 = vpow2.f32 %v1329_v52 }
 0x546   :  { %2692 = vrot.lane.b32.xlu0 %v3424_v60, %s2897_s7  ;;  %v1295_v6 = vpop.xlane.xlu0 %1294 }
 0x547   :  { %v1309_v55 = vsub.f32 %v3628_v21, %v1295_v6  ;;  %v1337_v3 = vpop.xlane.xlu1 %1336 }
 0x548   :  { %2782 = vrcp.f32 %v1337_v3 }
 0x549   :  { %v3688_v27 = vpop.eup %2780  ;;  %v1331_v61 = vmul.f32 1.442695, %v1309_v55 }
 0x54a   :  { %v1362_v9 = vsel %vm730_vm2, %v3688_v27, 0.0 }
 0x54b   :  { %2784 = vpow2.f32 %v1331_v61  ;;  %1363 = vadd.xlane.f32.xlu1 %v1362_v9 }
 0x54e   :  { %v2783_v44 = vpop.eup %2782  ;;  %v1298_v5 = vpop.xlane.xlu2 %1297 }
 0x54f   :  { %v1383_v7 = vmul.f32 %v2783_v44, %v3630_v26  ;;  %v1340_v57 = vpop.xlane.xlu1 %1339  ;;  %v1310_v19 = vsub.f32 %v3638_v4, %v1298_v5 }
 0x550   :  { %2786 = vrcp.f32 %v1340_v57 }
 0x551   :  { %v3693_v60 = vpop.eup %2784  ;;  %2556 = vmatmul.msk.f32.vlgmr.msrb.gmra.mxu0 %vm730_vm2, %v1383_v7  ;;  %v1333_v36 = vmul.f32 1.442695, %v1310_v19 }
 0x552   :  { %v1365_v21 = vsel %vm730_vm2, %v3693_v60, 0.0 }
 0x553   :  { %1366 = vadd.xlane.f32.xlu1 %v1365_v21  ;;  %v1633_v21 = vld [vmem:[%s4237_s9 + $0x10] sm:$0xff] }
 0x556   :  { %v2787_v54 = vpop.eup %2786  ;;  %v2683_v62 = vpop.permute.xlu2 %2682 }
 0x557   :  { %v2684_v46 = vunpack.i.l.bf16 %v2683_v62  ;;  %v1343_v47 = vpop.xlane.xlu1 %1342  ;;  %v1384_v32 = vmul.f32 %v2787_v54, %v3640_v56  ;;  %v2685_v28 = vunpack.i.h.bf16 %v2683_v62  ;;  %v1632_v54 = vld [vmem:[%s4237_s9 + $0x8] sm:$0xff] }
 0x558   :  { %2788 = vrcp.f32 %v1343_v47  ;;  %v87_v47 = vlaneseq }
 0x559   :  { %1514 = vmatpush.msra.mxu2 %v2684_v46  ;;  %v2688_v26 = vpop.permute.xlu0 %2687  ;;  %2557 = vmatmul.msk.f32.gmra.mxu0 %vm730_vm2, %v1384_v32  ;;  %2790 = vpow2.f32 %v1333_v36  ;;  %v1631_v46 = vld [vmem:[%s4237_s9] sm:$0xff] }
 0x55a   :  { %v2690_v50 = vunpack.i.h.bf16 %v2688_v26  ;;  %v2689_v51 = vunpack.i.l.bf16 %v2688_v26 }
 0x55b   :  { %1515 = vmatpush.msra.mxu2 %v2685_v28  ;;  %v88_v28 = vshrl.u32 %v87_v47, 7 }
 0x55c   :  { %1558 = vmatpush.msra.mxu3 %v2690_v50 }
 0x55d   :  { %1516 = vmatpush.msra.mxu2 %v2689_v51  ;;  %2696 = vset.pattern.permute.xlu1 %v88_v28  ;;  %v95_v50 = vadd.s32 8, %v88_v28 }
 0x55e   :  { %v2789_v35 = vpop.eup %2788 }
 0x55f   :  { %v1385_v2 = vmul.f32 %v2789_v35, %v3646_v48  ;;  %v2791_v56 = vpop.eup %2790  ;;  %2697 = vset.pattern.permute.xlu0 %v95_v50 }
 0x560   :  { %v1368_v17 = vsel %vm730_vm2, %v2791_v56, 0.0 }
 0x561   :  { %2558 = vmatmul.msk.f32.gmra.mxu0 %vm730_vm2, %v1385_v2 }
 0x570   :  { %1369 = vadd.xlane.f32.xlu0 %v1368_v17  ;;  %v3752_v17 = vld [vmem:[%s4272_s27] sm:$0xf] }
 0x588   :  { %v1346_v8 = vpop.xlane.xlu1 %1345 }
 0x589   :  { %2792 = vrcp.f32 %v1346_v8  ;;  %v86_v8 = vperm.slane %v3752_v17, 0 }
 0x58f   :  { %v2793_v22 = vpop.eup %2792 }
 0x590   :  { %v1386_v40 = vmul.f32 %v2793_v22, %v3656_v14  ;;  %v1349_v15 = vpop.xlane.xlu1 %1348  ;;  %v101_v22 = vadd.s32 16, %v88_v28 }
 0x591   :  { %2794 = vrcp.f32 %v1349_v15 }
 0x592   :  { %2559 = vmatmul.msk.f32.vlgmr.msrb.gmra.mxu1 %vm730_vm2, %v1386_v40  ;;  %2698 = vset.pattern.permute.xlu2 %v101_v22 }
 0x595   :  { %v1352_v4 = vpop.xlane.xlu0 %1351 }
 0x596   :  { %2796 = vrcp.f32 %v1352_v4 }
 0x597   :  { %v2795_v30 = vpop.eup %2794 }
 0x598   :  { %v1387_v48 = vmul.f32 %v2795_v30, %v3662_v38 }
 0x59a   :  { %2560 = vmatmul.msk.f32.gmra.mxu1 %vm730_vm2, %v1387_v48  ;;  %v124_v48 = vperm.slane %v3752_v17, 2 }
 0x59c   :  { %v2797_v42 = vpop.eup %2796 }
 0x59d   :  { %v1355_v34 = vpop.xlane.xlu0 %1354  ;;  %v1388_v12 = vmul.f32 %v2797_v42, %v3666_v41 }
 0x59e   :  { %2798 = vrcp.f32 %v1355_v34 }
 0x5a2   :  { %2561 = vmatmul.msk.f32.gmra.mxu1 %vm730_vm2, %v1388_v12 }
 0x5a4   :  { %v2799_v33 = vpop.eup %2798 }
 0x5a5   :  { %v1389_v14 = vmul.f32 %v2799_v33, %v3671_v63  ;;  %v1358_v43 = vpop.xlane.xlu0 %1357  ;;  %v1361_v16 = vpop.xlane.xlu2 %1360 }
 0x5a6   :  { %2800 = vrcp.f32 %v1358_v43 }
 0x5a7   :  { %2562 = vmatmul.msk.f32.vlgmr.msra.gmra.mxu2 %vm730_vm2, %v1389_v14  ;;  %2802 = vrcp.f32 %v1361_v16 }
 0x5ac   :  { %v2801_v18 = vpop.eup %2800 }
 0x5ad   :  { %v1390_v38 = vmul.f32 %v2801_v18, %v3676_v39  ;;  %v2803_v0 = vpop.eup %2802 }
 0x5ae   :  { %v1391_v59 = vmul.f32 %v2803_v0, %v3678_v23  ;;  %v143_v0 = vperm.slane %v3752_v17, 3 }
 0x5af   :  { %2563 = vmatmul.msk.f32.gmra.mxu2 %vm730_vm2, %v1390_v38  ;;  %v1764_v38 = vld [vmem:[%s4239_s11] sm:$0xff] }
 0x5b7   :  { %2564 = vmatmul.msk.f32.gmra.mxu2 %vm730_vm2, %v1391_v59 }
 0x5b8   :  { %v2693_v41 = vpop.permute.xlu0 %2692 }
 0x5b9   :  { %v2694_v58 = vunpack.i.l.bf16 %v2693_v41  ;;  %v2695_v25 = vunpack.i.h.bf16 %v2693_v41 }
 0x5bb   :  { %1559 = vmatpush.msra.mxu3 %v2694_v58 }
 0x5bd   :  { %1560 = vmatpush.msra.mxu3 %v2695_v25  ;;  %v3799_v25 = vld [vmem:[%s4238_s10] ss:$0 sm:$0xff]  ;;  %s2437_s10 = sshll.u32 %s4251_s23, 4  ;;  %s2438_s10 = int_to_ptr.hbm [resolvable:$true] %s2437_s10 }
 0x5be   :  { %v1364_v63 = vpop.xlane.xlu1 %1363 }
 0x5bf   :  { %2804 = vrcp.f32 %v1364_v63 }
 0x5c5   :  { %v2805_v52 = vpop.eup %2804 }
 0x5c6   :  { %v1392_v6 = vmul.f32 %v2805_v52, %v3688_v27  ;;  %v1367_v55 = vpop.xlane.xlu1 %1366 }
 0x5c7   :  { %2806 = vrcp.f32 %v1367_v55 }
 0x5c8   :  { %2565 = vmatmul.msk.f32.vlgmr.msra.gmra.mxu3 %vm730_vm2, %v1392_v6 }
 0x5cd   :  { %v2807_v39 = vpop.eup %2806 }
 0x5ce   :  { %v1430_v3 = vpop.f32.mrf.mxu0  ;;  %v1393_v23 = vmul.f32 %v2807_v39, %v3693_v60  ;;  %v1634_v60 = vld [vmem:[%s4237_s9 + $0x18] sm:$0xff]  ;;  %s2901_s9 = smov [#allocation2]  }
 0x5cf   :  { %1583 = vrot.lane.b32.xlu1 %v1430_v3, %s2898_s28  ;;  %1687 = vmatpush.msra.mxu0 %v1634_v60 }
 0x5d0   :  { %2566 = vmatmul.msk.f32.gmra.mxu3 %vm730_vm2, %v1393_v23 }
 0x5d1   :  { %1688 = vmatpush.msra.mxu0 %v1633_v21 }
 0x5d3   :  { %1689 = vmatpush.msra.mxu0 %v1632_v54 }
 0x5d5   :  { %1690 = vmatpush.msra.mxu0 %v1631_v46 }
 0x5d6   :  { %v1433_v61 = vpop.f32.mrf.mxu0 }
 0x5d7   :  { %1585 = vrot.lane.b32.xlu2 %v1433_v61, %s2898_s28 }
 0x5de   :  { %v1436_v9 = vpop.f32.mrf.mxu0 }
 0x5df   :  { %1587 = vrot.lane.b32.xlu1 %v1436_v9, %s2898_s28 }
 0x5e3   :  { %v1370_v27 = vpop.xlane.xlu0 %1369 }
 0x5e4   :  { %2808 = vrcp.f32 %v1370_v27 }
 0x5ea   :  { %v2809_v44 = vpop.eup %2808 }
 0x5eb   :  { %v1394_v5 = vmul.f32 %v2809_v44, %v2791_v56 }
 0x5ed   :  { %2567 = vmatmul.msk.f32.gmra.mxu3 %vm730_vm2, %v1394_v5 }
 0x60f   :  { %v1474_v7 = vpop.f32.mrf.mxu1 }
 0x610   :  { %1589 = vrot.lane.b32.xlu1 %v1474_v7, %s2898_s28  ;;  %v2830_v7 = vld [vmem:[%s4267_s2 + $0x8] sm:$0xff] }
 0x617   :  { %v1477_v57 = vpop.f32.mrf.mxu1 }
 0x618   :  { %1591 = vrot.lane.b32.xlu0 %v1477_v57, %s2898_s28 }
 0x61f   :  { %v1480_v62 = vpop.f32.mrf.mxu1 }
 0x620   :  { %1593 = vrot.lane.b32.xlu1 %v1480_v62, %s2898_s28 }
 0x62a   :  { %v1518_v32 = vpop.f32.mrf.mxu2 }
 0x62b   :  { %1595 = vrot.lane.b32.xlu2 %v1518_v32, %s2898_s28 }
 0x631   :  { %v1586_v2 = vpop.permute.xlu2 %1585 }
 0x632   :  { %v1521_v26 = vpop.f32.mrf.mxu2  ;;  %v1620_v36 = vsel %vm514_vm1, %v3550_v24, %v1586_v2  ;;  %v105_v24 = vperm.slane %v3752_v17, 1 }
 0x633   :  { %1597 = vrot.lane.b32.xlu1 %v1521_v26, %s2898_s28 }
 0x63a   :  { %v1524_v51 = vpop.f32.mrf.mxu2 }
 0x63b   :  { %1599 = vrot.lane.b32.xlu2 %v1524_v51, %s2898_s28  ;;  %v2832_v51 = vld [vmem:[%s4267_s2 + $0x18] sm:$0xff] }
 0x641   :  { %v1584_v35 = vpop.permute.xlu1 %1583 }
 0x642   :  { %v1619_v19 = vsel %vm514_vm1, %v3546_v45, %v1584_v35 }
 0x643   :  { %2568 = vmatmul.msk.f32.vlgmr.msra.gmra.mxu0 %vm197_vm0, %v1619_v19 }
 0x64b   :  { %v1562_v56 = vpop.f32.mrf.mxu3  ;;  %2569 = vmatmul.msk.f32.gmra.mxu0 %vm197_vm0, %v1620_v36 }
 0x64c   :  { %1601 = vrot.lane.b32.xlu1 %v1562_v56, %s2898_s28 }
 0x651   :  { %v1588_v45 = vpop.permute.xlu1 %1587 }
 0x652   :  { %v1621_v40 = vsel %vm514_vm1, %v3553_v49, %v1588_v45 }
 0x653   :  { %v1565_v15 = vpop.f32.mrf.mxu3  ;;  %2570 = vmatmul.msk.f32.gmra.mxu0 %vm197_vm0, %v1621_v40 }
 0x654   :  { %1603 = vrot.lane.b32.xlu0 %v1565_v15, %s2898_s28  ;;  %91 = vperm.xlu1 %2696, %v86_v8  }
 0x65c   :  { %97 = vperm.xlu0 %2697, %v86_v8   ;;  %110 = vperm.xlu1 %2696, %v105_v24  }
 0x664   :  { %2701 = vset.pattern.permute.xlu0 %v88_v28  ;;  %2700 = vset.pattern.permute.xlu1 %v101_v22 }
 0x66c   :  { %122 = vperm.xlu1 %2700, %v105_v24   ;;  %129 = vperm.xlu0 %2701, %v124_v48  }
 0x670   :  { %v1568_v4 = vpop.f32.mrf.mxu3 }
 0x671   :  { %1605 = vrot.lane.b32.xlu2 %v1568_v4, %s2898_s28  ;;  %s4273_s28 = sld [smem:[#allocation10_spill]] }
 0x674   :  { %141 = vperm.xlu1 %2700, %v124_v48   ;;  %2704 = vset.pattern.permute.xlu0 %v101_v22  ;;  %v2833_v22 = vld [vmem:[%s4267_s2 + $0x20] sm:$0xff] }
 0x679   :  { %103 = vperm.xlu2 %2698, %v86_v8  }
 0x67c   :  { %2703 = vset.pattern.permute.xlu1 %v95_v50  ;;  %160 = vperm.xlu0 %2704, %v143_v0  }
 0x681   :  { %2699 = vset.pattern.permute.xlu2 %v95_v50 }
 0x682   :  { %v1590_v49 = vpop.permute.xlu1 %1589 }
 0x683   :  { %v1622_v30 = vsel %vm514_vm1, %v3571_v1, %v1590_v49 }
 0x684   :  { %2571 = vmatmul.msk.f32.gmra.mxu0 %vm197_vm0, %v1622_v30  ;;  %154 = vperm.xlu1 %2703, %v143_v0   ;;  %v2834_v30 = vld [vmem:[%s4267_s2 + $0x28] sm:$0xff] }
 0x685   :  { %v1596_v33 = vpop.permute.xlu2 %1595 }
 0x686   :  { %v1625_v14 = vsel %vm514_vm1, %v3573_v13, %v1596_v33  ;;  %v1765_v13 = vld [vmem:[%s4239_s11 + $0x8] sm:$0xff] }
 0x689   :  { %116 = vperm.xlu2 %2699, %v105_v24  }
 0x68a   :  { %v1592_v42 = vpop.permute.xlu0 %1591 }
 0x68b   :  { %v1623_v34 = vsel %vm514_vm1, %v3575_v11, %v1592_v42  ;;  %v1767_v11 = vld [vmem:[%s4239_s11 + $0x18] sm:$0xff] }
 0x68c   :  { %2572 = vmatmul.msk.f32.gmra.mxu0 %vm197_vm0, %v1623_v34  ;;  %1820 = vmatpush.msra.mxu1 %v1767_v11 }
 0x691   :  { %135 = vperm.xlu2 %2699, %v124_v48  }
 0x692   :  { %v1594_v12 = vpop.permute.xlu1 %1593 }
 0x693   :  { %v1624_v1 = vsel %vm514_vm1, %v3581_v53, %v1594_v12  ;;  %v1766_v53 = vld [vmem:[%s4239_s11 + $0x10] sm:$0xff] }
 0x694   :  { %2573 = vmatmul.msk.f32.gmra.mxu0 %vm197_vm0, %v1624_v1  ;;  %1821 = vmatpush.msra.mxu1 %v1766_v53 }
 0x695   :  { %v1600_v18 = vpop.permute.xlu2 %1599 }
 0x696   :  { %1822 = vmatpush.msra.mxu1 %v1765_v13 }
 0x698   :  { %1823 = vmatpush.msra.mxu1 %v1764_v38  ;;  %v1876_v38 = vld [vmem:[%s4241_s13 + $0x18] sm:$0xff] }
 0x699   :  { %2702 = vset.pattern.permute.xlu2 %v88_v28  ;;  %1929 = vmatpush.msrb.mxu2 %v1876_v38 }
 0x69c   :  { %2574 = vmatmul.msk.f32.gmra.mxu0 %vm197_vm0, %v1625_v14  ;;  %v2835_v14 = vld [vmem:[%s4267_s2 + $0x30] sm:$0xff] }
 0x6a1   :  { %148 = vperm.xlu2 %2702, %v143_v0  }
 0x6a5   :  { %v1598_v43 = vpop.permute.xlu1 %1597 }
 0x6a6   :  { %v1626_v16 = vsel %vm514_vm1, %v3579_v37, %v1598_v43  ;;  %v1627_v37 = vsel %vm514_vm1, %v3583_v20, %v1600_v18 }
 0x6a7   :  { %2575 = vmatmul.msk.f32.gmra.mxu0 %vm197_vm0, %v1626_v16 }
 0x6af   :  { %2576 = vmatmul.msk.f32.gmra.mxu0 %vm197_vm0, %v1627_v37  ;;  %v2836_v37 = vld [vmem:[%s4267_s2 + $0x38] sm:$0xff] }
 0x6be   :  { %v1602_v59 = vpop.permute.xlu1 %1601 }
 0x6bf   :  { %v1628_v41 = vsel %vm514_vm1, %v3610_v29, %v1602_v59  ;;  %v2829_v29 = vld [vmem:[%s4267_s2] sm:$0xff]  ;;  %v1875_v59 = vld [vmem:[%s4241_s13 + $0x10] sm:$0xff] }
 0x6c0   :  { %v1692_v58 = vpop.f32.mrf.mxu0  ;;  %2577 = vmatmul.msk.f32.gmra.mxu0 %vm197_vm0, %v1628_v41  ;;  %1930 = vmatpush.msrb.mxu2 %v1875_v59 }
 0x6c1   :  { %v1693_v20 = vadd.f32 %v3799_v25, %v1692_v58  ;;  %v1874_v58 = vld [vmem:[%s4241_s13 + $0x8] sm:$0xff] }
 0x6c2   :  { %1931 = vmatpush.msrb.mxu2 %v1874_v58 }
 0x6c6   :  { %v1604_v63 = vpop.permute.xlu0 %1603  ;;  %v3802_v52 = vpop.permute.xlu1 %91 }
 0x6c7   :  { %v1629_v6 = vsel %vm514_vm1, %v3617_v10, %v1604_v63  ;;  %v1728_v55 = vmul.f32 %v1693_v20, %v3802_v52 }
 0x6c8   :  { %v1695_v39 = vpop.f32.mrf.mxu0  ;;  %2578 = vmatmul.msk.f32.gmra.mxu0 %vm197_vm0, %v1629_v6  ;;  %v1873_v6 = vld [vmem:[%s4241_s13] sm:$0xff] }
 0x6c9   :  { %v3811_v3 = vadd.f32 %v2829_v29, %v1728_v55  ;;  %v1696_v9 = vadd.f32 %v3799_v25, %v1695_v39  ;;  %1932 = vmatpush.msrb.mxu2 %v1873_v6  ;;  %v2837_v29 = vld [vmem:[%s4267_s2 + $0x40] sm:$0xff]  ;;  %v2270_v6 = vld [vmem:[%s4273_s28 + $0xc] sm:$0xf] }
 0x6cb   :  { %v1606_v23 = vpop.permute.xlu2 %1605  ;;  %v1752_v61 = vmax.f32 %v3811_v3, 0.0 }
 0x6cc   :  { %v1630_v10 = vsel %vm514_vm1, %v3619_v31, %v1606_v23  ;;  %v2831_v31 = vld [vmem:[%s4267_s2 + $0x10] sm:$0xff] }
 0x6cd   :  { %2580 = vmatmul.msk.f32.vlgmr.msra.gmra.mxu1 %vm197_vm0, %v1752_v61 }
 0x6ce   :  { %v3816_v27 = vpop.permute.xlu0 %97  ;;  %v3841_v26 = vpop.permute.xlu1 %110 }
 0x6cf   :  { %v1729_v44 = vmul.f32 %v1696_v9, %v3816_v27  ;;  %v2267_v9 = vld [vmem:[%s4273_s28] sm:$0xf] }
 0x6d0   :  { %v1698_v5 = vpop.f32.mrf.mxu0  ;;  %2579 = vmatmul.msk.f32.gmra.mxu0 %vm197_vm0, %v1630_v10  ;;  %v2268_v10 = vld [vmem:[%s4273_s28 + $0x4] sm:$0xf] }
 0x6d1   :  { %v3825_v57 = vadd.f32 %v2830_v7, %v1729_v44  ;;  %v1699_v60 = vadd.f32 %v3799_v25, %v1698_v5  ;;  %v2271_v44 = vmax.f32 %v2267_v9, 0.0  ;;  %v2272_v5 = vmax.f32 %v2268_v10, 0.0  ;;  %v2278_v7 = vld [vmem:[%s4247_s19 + $0x18] sm:$0xff] }
 0x6d2   :  { %2312 = vmatpush.msrb.mxu1 %v2278_v7 }
 0x6d3   :  { %v3828_v21 = vpop.permute.xlu2 %103  ;;  %v1753_v54 = vmax.f32 %v3825_v57, 0.0  ;;  %2287 = vst [vmem:[#allocation1] ss:$2 sm:$0xff] %v2271_v44 }
 0x6d4   :  { %v1730_v62 = vmul.f32 %v1699_v60, %v3828_v21  ;;  %v2277_v60 = vld [vmem:[%s4247_s19 + $0x10] sm:$0xff]  ;;  %2289 = vst [vmem:[#allocation1 + $0x1] ss:$2 sm:$0xff] %v2272_v5 }
 0x6d5   :  { %2581 = vmatmul.msk.f32.gmra.mxu1 %vm197_vm0, %v1753_v54  ;;  %v2276_v54 = vld [vmem:[%s4247_s19 + $0x8] sm:$0xff] }
 0x6d6   :  { %v3836_v46 = vadd.f32 %v2831_v31, %v1730_v62  ;;  %2313 = vmatpush.msrb.mxu1 %v2277_v60 }
 0x6d8   :  { %v1754_v47 = vmax.f32 %v3836_v46, 0.0  ;;  %2314 = vmatpush.msrb.mxu1 %v2276_v54 }
 0x6db   :  { %v2294_v58 = vld.sshfl [vmem:[#allocation1] sm:$0xff pattern:$0x75316420] }
 0x6dd   :  { %2582 = vmatmul.msk.f32.gmra.mxu1 %vm197_vm0, %v1754_v47  ;;  %v2275_v47 = vld [vmem:[%s4247_s19] sm:$0xff] }
 0x6de   :  { %v3861_v24 = vpop.permute.xlu1 %122  ;;  %v3872_v12 = vpop.permute.xlu0 %129  ;;  %2315 = vmatpush.msrb.mxu1 %v2275_v47 }
 0x6e3   :  { %v3850_v36 = vpop.permute.xlu2 %116 }
 0x6e6   :  { %v3908_v55 = vpop.permute.xlu1 %141 }
 0x6eb   :  { %v3885_v13 = vpop.permute.xlu2 %135 }
 0x6fb   :  { %v3933_v31 = vpop.permute.xlu2 %148 }
 0x701   :  { %v1701_v32 = vpop.f32.mrf.mxu0 }
 0x702   :  { %v1702_v28 = vadd.f32 %v3799_v25, %v1701_v32 }
 0x704   :  { %v1731_v50 = vmul.f32 %v1702_v28, %v3841_v26 }
 0x706   :  { %v3847_v35 = vadd.f32 %v2832_v51, %v1731_v50  ;;  %v2838_v50 = vld [vmem:[%s4267_s2 + $0x48] sm:$0xff] }
 0x708   :  { %v1755_v19 = vmax.f32 %v3847_v35, 0.0 }
 0x709   :  { %v1704_v2 = vpop.f32.mrf.mxu0 }
 0x70a   :  { %v1705_v56 = vadd.f32 %v3799_v25, %v1704_v2  ;;  %2583 = vmatmul.msk.f32.gmra.mxu1 %vm197_vm0, %v1755_v19 }
 0x70c   :  { %v1732_v8 = vmul.f32 %v1705_v56, %v3850_v36  ;;  %v3946_v56 = vpop.permute.xlu1 %154 }
 0x70e   :  { %v3858_v45 = vadd.f32 %v2833_v22, %v1732_v8  ;;  %v3953_v22 = vld [vmem:[%s4240_s12] ss:$0 sm:$0xff] }
 0x710   :  { %v1756_v40 = vmax.f32 %v3858_v45, 0.0 }
 0x711   :  { %v1707_v15 = vpop.f32.mrf.mxu0 }
 0x712   :  { %v1708_v4 = vadd.f32 %v3799_v25, %v1707_v15  ;;  %2584 = vmatmul.msk.f32.gmra.mxu1 %vm197_vm0, %v1756_v40  ;;  %v2839_v15 = vld [vmem:[%s4267_s2 + $0x50] sm:$0xff] }
 0x714   :  { %v1733_v49 = vmul.f32 %v1708_v4, %v3861_v24 }
 0x716   :  { %v3869_v48 = vadd.f32 %v2834_v30, %v1733_v49 }
 0x718   :  { %v1757_v42 = vmax.f32 %v3869_v48, 0.0 }
 0x719   :  { %v1710_v34 = vpop.f32.mrf.mxu0 }
 0x71a   :  { %v1711_v1 = vadd.f32 %v3799_v25, %v1710_v34  ;;  %2585 = vmatmul.msk.f32.gmra.mxu1 %vm197_vm0, %v1757_v42 }
 0x71c   :  { %v1734_v33 = vmul.f32 %v1711_v1, %v3872_v12 }
 0x71e   :  { %v3880_v11 = vadd.f32 %v2835_v14, %v1734_v33  ;;  %v3963_v33 = vpop.permute.xlu0 %160 }
 0x720   :  { %v1758_v43 = vmax.f32 %v3880_v11, 0.0 }
 0x722   :  { %2586 = vmatmul.msk.f32.gmra.mxu1 %vm197_vm0, %v1758_v43 }
 0x724   :  { %v1713_v16 = vpop.f32.mrf.mxu0 }
 0x725   :  { %v1714_v53 = vadd.f32 %v3799_v25, %v1713_v16  ;;  %v2840_v16 = vld [vmem:[%s4267_s2 + $0x58] sm:$0xff] }
 0x727   :  { %v1735_v18 = vmul.f32 %v1714_v53, %v3885_v13 }
 0x729   :  { %v3894_v0 = vadd.f32 %v2836_v37, %v1735_v18 }
 0x72b   :  { %v1759_v41 = vmax.f32 %v3894_v0, 0.0 }
 0x72c   :  { %v1716_v20 = vpop.f32.mrf.mxu0 }
 0x72d   :  { %v1717_v63 = vadd.f32 %v3799_v25, %v1716_v20  ;;  %2587 = vmatmul.msk.f32.gmra.mxu1 %vm197_vm0, %v1759_v41 }
 0x72f   :  { %v1736_v39 = vmul.f32 %v1717_v63, %v3908_v55  ;;  %v2269_v63 = vld [vmem:[%s4273_s28 + $0x8] sm:$0xf] }
 0x731   :  { %v3914_v23 = vadd.f32 %v2837_v29, %v1736_v39  ;;  %v2273_v39 = vmax.f32 %v2269_v63, 0.0  ;;  %v2274_v29 = vmax.f32 %v2270_v6, 0.0 }
 0x733   :  { %v1760_v61 = vmax.f32 %v3914_v23, 0.0  ;;  %2291 = vst [vmem:[#allocation1 + $0x10] ss:$2 sm:$0xff] %v2273_v39 }
 0x734   :  { %2293 = vst [vmem:[#allocation1 + $0x11] ss:$2 sm:$0xff] %v2274_v29  ;;  %v2711_v29 = vld [vmem:[%s4248_s20] ss:$0 sm:$0xff] }
 0x735   :  { %2588 = vmatmul.msk.f32.gmra.mxu1 %vm197_vm0, %v1760_v61 }
 0x73b   :  { %v2295_v61 = vld.sshfl [vmem:[#allocation1 + $0x10] sm:$0xff pattern:$0x75316420] }
 0x73d   :  { %v1719_v62 = vpop.f32.mrf.mxu0 }
 0x73e   :  { %v1720_v32 = vadd.f32 %v3799_v25, %v1719_v62 }
 0x740   :  { %v1737_v28 = vmul.f32 %v1720_v32, %v3933_v31 }
 0x742   :  { %v3943_v51 = vadd.f32 %v2838_v50, %v1737_v28 }
 0x744   :  { %v1761_v19 = vmax.f32 %v3943_v51, 0.0 }
 0x745   :  { %v1722_v2 = vpop.f32.mrf.mxu0 }
 0x746   :  { %v1723_v8 = vadd.f32 %v3799_v25, %v1722_v2  ;;  %2589 = vmatmul.msk.f32.gmra.mxu1 %vm197_vm0, %v1761_v19 }
 0x748   :  { %v1738_v40 = vmul.f32 %v1723_v8, %v3946_v56 }
 0x74a   :  { %v3959_v4 = vadd.f32 %v2839_v15, %v1738_v40  ;;  %v1825_v49 = vpop.f32.mrf.mxu1 }
 0x74b   :  { %v1826_v30 = vadd.f32 %v3953_v22, %v1825_v49 }
 0x74c   :  { %v1762_v42 = vmax.f32 %v3959_v4, 0.0 }
 0x74d   :  { %v1861_v34 = vmax.f32 %v1826_v30, 0.0  ;;  %v1725_v1 = vpop.f32.mrf.mxu0  ;;  %v2045_v30 = vld [vmem:[%s4243_s15 + $0x18] sm:$0xff] }
 0x74e   :  { %v1726_v14 = vadd.f32 %v3799_v25, %v1725_v1  ;;  %2590 = vmatmul.msk.f32.gmra.mxu1 %vm197_vm0, %v1762_v42  ;;  %2098 = vmatpush.msrb.mxu3 %v2045_v30  ;;  %v2044_v42 = vld [vmem:[%s4243_s15 + $0x10] sm:$0xff]  ;;  %v2042_v1 = vld [vmem:[%s4243_s15] sm:$0xff] }
 0x74f   :  { %2592 = vmatmul.msk.f32.vlgmr.msrb.gmra.mxu2 %vm197_vm0, %v1861_v34  ;;  %v2043_v34 = vld [vmem:[%s4243_s15 + $0x8] sm:$0xff] }
 0x750   :  { %v1739_v43 = vmul.f32 %v1726_v14, %v3963_v33  ;;  %2099 = vmatpush.msrb.mxu3 %v2044_v42 }
 0x752   :  { %v3972_v53 = vadd.f32 %v2840_v16, %v1739_v43  ;;  %v1828_v18 = vpop.f32.mrf.mxu1  ;;  %2100 = vmatpush.msrb.mxu3 %v2043_v34 }
 0x753   :  { %v1829_v38 = vadd.f32 %v3953_v22, %v1828_v18 }
 0x754   :  { %v1763_v37 = vmax.f32 %v3972_v53, 0.0  ;;  %2101 = vmatpush.msrb.mxu3 %v2042_v1 }
 0x755   :  { %v1862_v59 = vmax.f32 %v1829_v38, 0.0 }
 0x756   :  { %2591 = vmatmul.msk.f32.gmra.mxu1 %vm197_vm0, %v1763_v37 }
 0x757   :  { %2593 = vmatmul.msk.f32.gmra.mxu2 %vm197_vm0, %v1862_v59  ;;  %v4018_v59 = vld [vmem:[%s4242_s14] ss:$0 sm:$0xff]  ;;  %s2425_s14 = sshll.u32 %s2901_s9, 4  ;;  %s2426_s14 = int_to_ptr.vmem [resolvable:$true] %s2425_s14 }
 0x75a   :  { %v1831_v25 = vpop.f32.mrf.mxu1 }
 0x75b   :  { %v1832_v41 = vadd.f32 %v3953_v22, %v1831_v25 }
 0x75d   :  { %v1863_v20 = vmax.f32 %v1832_v41, 0.0 }
 0x75e   :  { %2617 = vmatmul.msk.f32.vlgmr.msrb.gmra.mxu1 %vm197_vm0, %v2294_v58 }
 0x75f   :  { %2594 = vmatmul.msk.f32.gmra.mxu2 %vm197_vm0, %v1863_v20 }
 0x766   :  { %2618 = vmatmul.msk.f32.gmra.mxu1 %vm197_vm0, %v2295_v61 }
 0x787   :  { %v1834_v9 = vpop.f32.mrf.mxu1 }
 0x788   :  { %v1835_v10 = vadd.f32 %v3953_v22, %v1834_v9 }
 0x78a   :  { %v1864_v44 = vmax.f32 %v1835_v10, 0.0 }
 0x78c   :  { %2595 = vmatmul.msk.f32.gmra.mxu2 %vm197_vm0, %v1864_v44 }
 0x78f   :  { %v1837_v5 = vpop.f32.mrf.mxu1 }
 0x790   :  { %v1838_v7 = vadd.f32 %v3953_v22, %v1837_v5  ;;  %v2197_v5 = vsel %vm2196_vm3, %v3752_v17, 0.0 }
 0x791   :  { %2198 = vadd.xlane.f32.xlu2 %v2197_v5 }
 0x792   :  { %v1865_v60 = vmax.f32 %v1838_v7, 0.0 }
 0x794   :  { %2596 = vmatmul.msk.f32.gmra.mxu2 %vm197_vm0, %v1865_v60 }
 0x797   :  { %v1840_v54 = vpop.f32.mrf.mxu1 }
 0x798   :  { %v1841_v62 = vadd.f32 %v3953_v22, %v1840_v54 }
 0x79a   :  { %v1866_v47 = vmax.f32 %v1841_v62, 0.0 }
 0x79c   :  { %2597 = vmatmul.msk.f32.gmra.mxu2 %vm197_vm0, %v1866_v47 }
 0x79f   :  { %v1843_v32 = vpop.f32.mrf.mxu1 }
 0x7a0   :  { %v1844_v28 = vadd.f32 %v3953_v22, %v1843_v32 }
 0x7a2   :  { %v1867_v50 = vmax.f32 %v1844_v28, 0.0 }
 0x7a4   :  { %2598 = vmatmul.msk.f32.gmra.mxu2 %vm197_vm0, %v1867_v50 }
 0x7aa   :  { %v1846_v19 = vpop.f32.mrf.mxu1 }
 0x7ab   :  { %v1847_v2 = vadd.f32 %v3953_v22, %v1846_v19 }
 0x7ad   :  { %v1868_v8 = vmax.f32 %v1847_v2, 0.0 }
 0x7af   :  { %2599 = vmatmul.msk.f32.gmra.mxu2 %vm197_vm0, %v1868_v8 }
 0x7b2   :  { %v1849_v40 = vpop.f32.mrf.mxu1 }
 0x7b3   :  { %v1850_v15 = vadd.f32 %v3953_v22, %v1849_v40 }
 0x7b5   :  { %v1869_v49 = vmax.f32 %v1850_v15, 0.0 }
 0x7b7   :  { %2600 = vmatmul.msk.f32.gmra.mxu2 %vm197_vm0, %v1869_v49 }
 0x7c3   :  { %v1852_v14 = vpop.f32.mrf.mxu1 }
 0x7c4   :  { %v1853_v43 = vadd.f32 %v3953_v22, %v1852_v14 }
 0x7c6   :  { %v1870_v16 = vmax.f32 %v1853_v43, 0.0 }
 0x7c8   :  { %2601 = vmatmul.msk.f32.gmra.mxu2 %vm197_vm0, %v1870_v16 }
 0x7cb   :  { %v1855_v18 = vpop.f32.mrf.mxu1 }
 0x7cc   :  { %v1856_v38 = vadd.f32 %v3953_v22, %v1855_v18 }
 0x7ce   :  { %v1871_v37 = vmax.f32 %v1856_v38, 0.0 }
 0x7d0   :  { %2602 = vmatmul.msk.f32.gmra.mxu2 %vm197_vm0, %v1871_v37 }
 0x7d2   :  { %v1934_v25 = vpop.f32.mrf.mxu2 }
 0x7d3   :  { %v1935_v41 = vadd.f32 %v4018_v59, %v1934_v25  ;;  %v1858_v58 = vpop.f32.mrf.mxu1 }
 0x7d4   :  { %v1859_v20 = vadd.f32 %v3953_v22, %v1858_v58 }
 0x7d5   :  { %v1970_v63 = vadd.f32 %v1935_v41, %v3811_v3 }
 0x7d6   :  { %v1872_v6 = vmax.f32 %v1859_v20, 0.0 }
 0x7d7   :  { %v1982_v39 = vmul.f32 %v1970_v63, %v3802_v52 }
 0x7d8   :  { %2603 = vmatmul.msk.f32.gmra.mxu2 %vm197_vm0, %v1872_v6 }
 0x7d9   :  { %v1994_v61 = vadd.f32 %v1982_v39, %v3811_v3 }
 0x7da   :  { %v1937_v9 = vpop.f32.mrf.mxu2 }
 0x7db   :  { %v2006_v10 = vmul.f32 %v1994_v61, %v3802_v52  ;;  %v1938_v44 = vadd.f32 %v4018_v59, %v1937_v9  ;;  %v2317_v22 = vpop.f32.mrf.mxu1 }
 0x7dc   :  { %v2318_v7 = vadd.f32 %v2711_v29, %v2317_v22 }
 0x7dd   :  { %2018 = vst.msk [vmem:[%s4249_s21] sm:$0xff] %vm197_vm0, %v2006_v10  ;;  %v1971_v60 = vadd.f32 %v1938_v44, %v3825_v57  ;;  %v2030_v54 = vmax.f32 %v2006_v10, 0.0  ;;  %v2405_v25 = vperm.slane %v2006_v10, 0 }
 0x7de   :  { %v2619_v3 = vmul.f32 -1.442695, %v2318_v7 }
 0x7df   :  { %v1983_v62 = vmul.f32 %v1971_v60, %v3816_v27  ;;  %2604 = vmatmul.msk.f32.vlgmr.msrb.gmra.mxu3 %vm197_vm0, %v2030_v54 }
 0x7e0   :  { %2810 = vpow2.f32 %v2619_v3 }
 0x7e1   :  { %v1995_v47 = vadd.f32 %v1983_v62, %v3825_v57  ;;  %v2325_v57 = vrot.slane %v2318_v7, 4 }
 0x7e2   :  { %v1940_v32 = vpop.f32.mrf.mxu2 }
 0x7e3   :  { %v1941_v17 = vadd.f32 %v4018_v59, %v1940_v32  ;;  %v2007_v28 = vmul.f32 %v1995_v47, %v3816_v27  ;;  %v2620_v49 = vmul.f32 -1.442695, %v2325_v57  ;;  %v2320_v6 = vpop.f32.mrf.mxu1 }
 0x7e4   :  { %v2321_v39 = vadd.f32 %v2711_v29, %v2320_v6 }
 0x7e5   :  { %v1972_v50 = vadd.f32 %v1941_v17, %v3836_v46  ;;  %2019 = vst.msk [vmem:[%s4249_s21 + $0x8] sm:$0xff] %vm197_vm0, %v2007_v28  ;;  %v2031_v19 = vmax.f32 %v2007_v28, 0.0 }
 0x7e6   :  { %v2811_v2 = vpop.eup %2810  ;;  %v2621_v9 = vmul.f32 -1.442695, %v2321_v39 }
 0x7e7   :  { %v2341_v8 = vadd.f32 1.0, %v2811_v2  ;;  %v1984_v40 = vmul.f32 %v1972_v50, %v3828_v21  ;;  %2605 = vmatmul.msk.f32.gmra.mxu3 %vm197_vm0, %v2031_v19 }
 0x7e9   :  { %2812 = vrcp.f32 %v2341_v8  ;;  %v1996_v15 = vadd.f32 %v1984_v40, %v3836_v46  ;;  %v2356_v14 = vand.u32 2147483648, %v2341_v8  ;;  %vm2350_vm4 = vweird.f32 %v2341_v8 }
 0x7ea   :  { %2814 = vpow2.f32 %v2620_v49  ;;  %v2354_v16 = vand.u32 2147483647, %v2341_v8 }
 0x7eb   :  { %v2008_v30 = vmul.f32 %v1996_v15, %v3828_v21  ;;  %v2357_v18 = vor.u32 1.1754944e-38, %v2356_v14 }
 0x7ec   :  { %vm2355_vm7 = vcmp.eq.f32.partialorder %v2354_v16, 8.507059e+37 }
 0x7ed   :  { %2020 = vst.msk [vmem:[%s4249_s21 + $0x10] sm:$0xff] %vm197_vm0, %v2008_v30  ;;  %v2032_v42 = vmax.f32 %v2008_v30, 0.0 }
 0x7ef   :  { %v2813_v34 = vpop.eup %2812  ;;  %2606 = vmatmul.msk.f32.gmra.mxu3 %vm197_vm0, %v2032_v42 }
 0x7f0   :  { %v2346_v1 = vmul.f32 %v2813_v34, %v2341_v8  ;;  %vm2351_vm5 = vweird.f32 %v2813_v34  ;;  %v2815_v38 = vpop.eup %2814 }
 0x7f1   :  { %vm2352_vm6 = vmor %vm2350_vm4, %vm2351_vm5  ;;  %v2342_v58 = vadd.f32 1.0, %v2815_v38 }
 0x7f2   :  { %v2347_v43 = vsub.f32 1.0, %v2346_v1 }
 0x7f3   :  { %2816 = vrcp.f32 %v2342_v58  ;;  %vm2365_vm9 = vweird.f32 %v2342_v58  ;;  %v2371_v54 = vand.u32 2147483648, %v2342_v58  ;;  %v2369_v47 = vand.u32 2147483647, %v2342_v58 }
 0x7f4   :  { %v2348_v46 = vmul.f32 %v2813_v34, %v2347_v43  ;;  %2818 = vpow2.f32 %v2621_v9 }
 0x7f5   :  { %v2372_v17 = vor.u32 1.1754944e-38, %v2371_v54  ;;  %vm2370_vm12 = vcmp.eq.f32.partialorder %v2369_v47, 8.507059e+37 }
 0x7f6   :  { %v2349_v37 = vadd.f32 %v2813_v34, %v2348_v46 }
 0x7f8   :  { %v2353_v41 = vsel %vm2352_vm6, %v2813_v34, %v2349_v37  ;;  %v2326_v37 = vrot.slane %v2321_v39, 4  ;;  %vm2151_vm6 = vcmask 523264  }
 0x7f9   :  { %v2358_v20 = vsel %vm2355_vm7, %v2357_v18, %v2353_v41  ;;  %v2817_v61 = vpop.eup %2816  ;;  %vm2238_vm7 = vcmask 1042434  }
 0x7fa   :  { %v2409_v63 = vmul.f32 %v2405_v25, %v2358_v20  ;;  %v2361_v44 = vmul.f32 %v2817_v61, %v2342_v58  ;;  %v2819_v5 = vpop.eup %2818  ;;  %vm2366_vm10 = vweird.f32 %v2817_v61  ;;  %v2622_v58 = vmul.f32 -1.442695, %v2326_v37 }
 0x7fb   :  { %v2343_v3 = vadd.f32 1.0, %v2819_v5  ;;  %vm2367_vm11 = vmor %vm2365_vm9, %vm2366_vm10  ;;  %vm2265_vm9 = vcmask 519168  }
 0x7fc   :  { %2414 = vst.msk [vmem:[#allocation4] sm:$0xf] %vm2413_vm8, %v2409_v63  ;;  %v2362_v22 = vsub.f32 1.0, %v2361_v44 }
 0x7fd   :  { %2820 = vrcp.f32 %v2343_v3  ;;  %vm2380_vm13 = vweird.f32 %v2343_v3  ;;  %v2384_v44 = vand.u32 2147483647, %v2343_v3 }
 0x7fe   :  { %v2363_v7 = vmul.f32 %v2817_v61, %v2362_v22  ;;  %2822 = vpow2.f32 %v2622_v58 }
 0x7ff   :  { %vm2385_vm1 = vcmp.eq.f32.partialorder %v2384_v44, 8.507059e+37 }
 0x800   :  { %v2364_v62 = vadd.f32 %v2817_v61, %v2363_v7 }
 0x802   :  { %v2368_v50 = vsel %vm2367_vm11, %v2817_v61, %v2364_v62  ;;  %v2386_v61 = vand.u32 2147483648, %v2343_v3 }
 0x803   :  { %v2373_v40 = vsel %vm2370_vm12, %v2372_v17, %v2368_v50  ;;  %v2821_v30 = vpop.eup %2820 }
 0x804   :  { %v2376_v34 = vmul.f32 %v2821_v30, %v2343_v3  ;;  %vm2381_vm14 = vweird.f32 %v2821_v30  ;;  %v2387_v5 = vor.u32 1.1754944e-38, %v2386_v61  ;;  %v2823_v3 = vpop.eup %2822 }
 0x805   :  { %vm2382_vm15 = vmor %vm2380_vm13, %vm2381_vm14 }
 0x806   :  { %v2377_v46 = vsub.f32 1.0, %v2376_v34 }
 0x80f   :  { %v1943_v60 = vpop.f32.mrf.mxu2 }
 0x810   :  { %v1944_v10 = vadd.f32 %v4018_v59, %v1943_v60 }
 0x812   :  { %v1973_v32 = vadd.f32 %v1944_v10, %v3847_v35 }
 0x814   :  { %v1985_v29 = vmul.f32 %v1973_v32, %v3841_v26 }
 0x816   :  { %v1997_v28 = vadd.f32 %v1985_v29, %v3847_v35 }
 0x817   :  { %v1946_v19 = vpop.f32.mrf.mxu2 }
 0x818   :  { %v2009_v2 = vmul.f32 %v1997_v28, %v3841_v26  ;;  %v1947_v8 = vadd.f32 %v4018_v59, %v1946_v19  ;;  %v2344_v28 = vadd.f32 1.0, %v2823_v3 }
 0x81a   :  { %2021 = vst.msk [vmem:[%s4249_s21 + $0x18] sm:$0xff] %vm197_vm0, %v2009_v2  ;;  %v2406_v57 = vperm.slane %v2009_v2, 0  ;;  %v1974_v15 = vadd.f32 %v1947_v8, %v3858_v45  ;;  %v2033_v49 = vmax.f32 %v2009_v2, 0.0  ;;  %2824 = vrcp.f32 %v2344_v28 }
 0x81b   :  { %vm2395_vm2 = vweird.f32 %v2344_v28 }
 0x81c   :  { %v2410_v42 = vmul.f32 %v2406_v57, %v2373_v40  ;;  %v1986_v35 = vmul.f32 %v1974_v15, %v3850_v36  ;;  %2607 = vmatmul.msk.f32.gmra.mxu3 %vm197_vm0, %v2033_v49 }
 0x81e   :  { %2415 = vst.msk [vmem:[#allocation4 + $0x4] sm:$0xf] %vm2413_vm8, %v2410_v42  ;;  %v1998_v1 = vadd.f32 %v1986_v35, %v3858_v45  ;;  %v2378_v45 = vmul.f32 %v2821_v30, %v2377_v46  ;;  %v2401_v46 = vand.u32 2147483648, %v2344_v28 }
 0x81f   :  { %v1949_v14 = vpop.f32.mrf.mxu2 }
 0x820   :  { %v2010_v43 = vmul.f32 %v1998_v1, %v3850_v36  ;;  %v1950_v16 = vadd.f32 %v4018_v59, %v1949_v14  ;;  %v2379_v9 = vadd.f32 %v2821_v30, %v2378_v45  ;;  %v2825_v49 = vpop.eup %2824 }
 0x821   :  { %v2391_v42 = vmul.f32 %v2825_v49, %v2344_v28  ;;  %vm2396_vm3 = vweird.f32 %v2825_v49 }
 0x822   :  { %2022 = vst.msk [vmem:[%s4249_s21 + $0x20] sm:$0xff] %vm197_vm0, %v2010_v43  ;;  %v1975_v18 = vadd.f32 %v1950_v16, %v3869_v48  ;;  %v2034_v38 = vmax.f32 %v2010_v43, 0.0  ;;  %v2383_v60 = vsel %vm2382_vm15, %v2821_v30, %v2379_v9  ;;  %vm2397_vm4 = vmor %vm2395_vm2, %vm2396_vm3 }
 0x823   :  { %v2388_v54 = vsel %vm2385_vm1, %v2387_v5, %v2383_v60  ;;  %v2392_v34 = vsub.f32 1.0, %v2391_v42  ;;  %v2223_v42 = vld [vmem:[%s4245_s17 + $0x28] sm:$0xff] }
 0x824   :  { %v1987_v25 = vmul.f32 %v1975_v18, %v3861_v24  ;;  %2608 = vmatmul.msk.f32.gmra.mxu3 %vm197_vm0, %v2034_v38 }
 0x825   :  { %v2393_v14 = vmul.f32 %v2825_v49, %v2392_v34  ;;  %v2221_v34 = vld [vmem:[%s4245_s17 + $0x18] sm:$0xff] }
 0x826   :  { %v1999_v41 = vadd.f32 %v1987_v25, %v3869_v48  ;;  %v2402_v25 = vor.u32 1.1754944e-38, %v2401_v46 }
 0x827   :  { %v1952_v20 = vpop.f32.mrf.mxu2  ;;  %v2394_v18 = vadd.f32 %v2825_v49, %v2393_v14 }
 0x828   :  { %v2011_v63 = vmul.f32 %v1999_v41, %v3861_v24  ;;  %v1953_v6 = vadd.f32 %v4018_v59, %v1952_v20 }
 0x829   :  { %v2398_v41 = vsel %vm2397_vm4, %v2825_v49, %v2394_v18 }
 0x82a   :  { %2023 = vst.msk [vmem:[%s4249_s21 + $0x28] sm:$0xff] %vm197_vm0, %v2011_v63  ;;  %v1976_v39 = vadd.f32 %v1953_v6, %v3880_v11  ;;  %v2035_v22 = vmax.f32 %v2011_v63, 0.0 }
 0x82c   :  { %v1988_v48 = vmul.f32 %v1976_v39, %v3872_v12  ;;  %2609 = vmatmul.msk.f32.gmra.mxu3 %vm197_vm0, %v2035_v22 }
 0x82e   :  { %v2000_v7 = vadd.f32 %v1988_v48, %v3880_v11 }
 0x830   :  { %v2012_v10 = vmul.f32 %v2000_v7, %v3872_v12 }
 0x832   :  { %2024 = vst.msk [vmem:[%s4249_s21 + $0x30] sm:$0xff] %vm197_vm0, %v2012_v10  ;;  %v2407_v62 = vperm.slane %v2012_v10, 0  ;;  %v2036_v47 = vmax.f32 %v2012_v10, 0.0  ;;  %v1955_v32 = vpop.f32.mrf.mxu2 }
 0x833   :  { %v1956_v17 = vadd.f32 %v4018_v59, %v1955_v32 }
 0x834   :  { %v2411_v29 = vmul.f32 %v2407_v62, %v2388_v54  ;;  %2610 = vmatmul.msk.f32.gmra.mxu3 %vm197_vm0, %v2036_v47  ;;  %v4148_v62 = vld [vmem:[%s4244_s16] ss:$0 sm:$0xff] }
 0x835   :  { %v1977_v11 = vadd.f32 %v1956_v17, %v3894_v0 }
 0x836   :  { %2416 = vst.msk [vmem:[#allocation4 + $0x8] sm:$0xf] %vm2413_vm8, %v2411_v29 }
 0x837   :  { %v1989_v50 = vmul.f32 %v1977_v11, %v3885_v13 }
 0x839   :  { %v2001_v19 = vadd.f32 %v1989_v50, %v3894_v0 }
 0x83a   :  { %v1958_v2 = vpop.f32.mrf.mxu2 }
 0x83b   :  { %v2013_v8 = vmul.f32 %v2001_v19, %v3885_v13  ;;  %v1959_v40 = vadd.f32 %v4018_v59, %v1958_v2 }
 0x83d   :  { %2025 = vst.msk [vmem:[%s4249_s21 + $0x38] sm:$0xff] %vm197_vm0, %v2013_v8  ;;  %v1978_v57 = vadd.f32 %v1959_v40, %v3914_v23  ;;  %v2037_v15 = vmax.f32 %v2013_v8, 0.0 }
 0x83f   :  { %v1990_v30 = vmul.f32 %v1978_v57, %v3908_v55  ;;  %2611 = vmatmul.msk.f32.gmra.mxu3 %vm197_vm0, %v2037_v15 }
 0x841   :  { %v2002_v0 = vadd.f32 %v1990_v30, %v3914_v23  ;;  %v2399_v23 = vand.u32 2147483647, %v2344_v28 }
 0x843   :  { %v2014_v35 = vmul.f32 %v2002_v0, %v3908_v55  ;;  %vm2400_vm5 = vcmp.eq.f32.partialorder %v2399_v23, 8.507059e+37 }
 0x844   :  { %v2403_v6 = vsel %vm2400_vm5, %v2402_v25, %v2398_v41 }
 0x845   :  { %2026 = vst.msk [vmem:[%s4249_s21 + $0x40] sm:$0xff] %vm197_vm0, %v2014_v35  ;;  %v2038_v1 = vmax.f32 %v2014_v35, 0.0  ;;  %v2222_v35 = vld [vmem:[%s4245_s17 + $0x20] sm:$0xff] }
 0x847   :  { %2612 = vmatmul.msk.f32.gmra.mxu3 %vm197_vm0, %v2038_v1 }
 0x84b   :  { %v1961_v43 = vpop.f32.mrf.mxu2 }
 0x84c   :  { %v1962_v16 = vadd.f32 %v4018_v59, %v1961_v43 }
 0x84e   :  { %v1979_v38 = vadd.f32 %v1962_v16, %v3943_v51 }
 0x850   :  { %v1991_v37 = vmul.f32 %v1979_v38, %v3933_v31 }
 0x852   :  { %v2003_v45 = vadd.f32 %v1991_v37, %v3943_v51 }
 0x853   :  { %v1964_v58 = vpop.f32.mrf.mxu2 }
 0x854   :  { %v2015_v20 = vmul.f32 %v2003_v45, %v3933_v31  ;;  %v1965_v63 = vadd.f32 %v4018_v59, %v1964_v58 }
 0x856   :  { %2027 = vst.msk [vmem:[%s4249_s21 + $0x48] sm:$0xff] %vm197_vm0, %v2015_v20  ;;  %v2408_v61 = vperm.slane %v2015_v20, 0  ;;  %v1980_v9 = vadd.f32 %v1965_v63, %v3959_v4  ;;  %v2039_v44 = vmax.f32 %v2015_v20, 0.0 }
 0x858   :  { %v2412_v39 = vmul.f32 %v2408_v61, %v2403_v6  ;;  %v1992_v51 = vmul.f32 %v1980_v9, %v3946_v56  ;;  %2613 = vmatmul.msk.f32.gmra.mxu3 %vm197_vm0, %v2039_v44 }
 0x85a   :  { %2417 = vst.msk [vmem:[#allocation4 + $0xc] sm:$0xf] %vm2413_vm8, %v2412_v39  ;;  %v2004_v22 = vadd.f32 %v1992_v51, %v3959_v4  ;;  %vm2241_vm8 = vcmask 1043459  }
 0x85b   :  { %v1967_v48 = vpop.f32.mrf.mxu2 }
 0x85c   :  { %v2016_v5 = vmul.f32 %v2004_v22, %v3946_v56  ;;  %v1968_v7 = vadd.f32 %v4018_v59, %v1967_v48  ;;  %v2219_v22 = vld [vmem:[%s4245_s17 + $0x8] sm:$0xff] }
 0x85e   :  { %2028 = vst.msk [vmem:[%s4249_s21 + $0x50] sm:$0xff] %vm197_vm0, %v2016_v5  ;;  %v1981_v60 = vadd.f32 %v1968_v7, %v3972_v53  ;;  %v2040_v10 = vmax.f32 %v2016_v5, 0.0  ;;  %v2218_v5 = vld [vmem:[%s4245_s17] sm:$0xff] }
 0x860   :  { %v1993_v54 = vmul.f32 %v1981_v60, %v3963_v33  ;;  %2614 = vmatmul.msk.f32.gmra.mxu3 %vm197_vm0, %v2040_v10 }
 0x862   :  { %v2005_v3 = vadd.f32 %v1993_v54, %v3972_v53  ;;  %v2103_v4 = vpop.f32.mrf.mxu3 }
 0x863   :  { %v2104_v32 = vadd.f32 %v4148_v62, %v2103_v4  ;;  %v2199_v4 = vpop.xlane.xlu2 %2198 }
 0x864   :  { %v2017_v59 = vmul.f32 %v2005_v3, %v3963_v33 }
 0x865   :  { %v2139_v53 = vmul.f32 %v2104_v32, %v3802_v52  ;;  %v2225_v52 = vld [vmem:[%s4245_s17 + $0x38] sm:$0xff]  ;;  %v2200_v32 = vmax.f32 %v2199_v4, 1.0 }
 0x866   :  { %2029 = vst.msk [vmem:[%s4249_s21 + $0x58] sm:$0xff] %vm197_vm0, %v2017_v59  ;;  %v2041_v47 = vmax.f32 %v2017_v59, 0.0  ;;  %2253 = vmatpush.msrb.mxu0 %v2225_v52  ;;  %s2427_s21 = sshll.u32 %s4250_s22, 4  ;;  %s2428_s21 = int_to_ptr.hbm [resolvable:$true] %s2427_s21 }
 0x867   :  { %v2152_v11 = vsel %vm2151_vm6, %v2139_v53, 0.0  ;;  %2826 = vrcp.f32 %v2200_v32 }
 0x868   :  { %2615 = vmatmul.msk.f32.gmra.mxu3 %vm197_vm0, %v2041_v47  ;;  %vm2235_vm0 = vcmask 1041409  }
 0x86a   :  { %v2106_v29 = vpop.f32.mrf.mxu3 }
 0x86b   :  { %v2107_v17 = vadd.f32 %v4148_v62, %v2106_v29 }
 0x86d   :  { %v2140_v28 = vmul.f32 %v2107_v17, %v3816_v27  ;;  %v2224_v27 = vld [vmem:[%s4245_s17 + $0x30] sm:$0xff] }
 0x86e   :  { %2254 = vmatpush.msrb.mxu0 %v2224_v27 }
 0x86f   :  { %v2153_v50 = vsel %vm2151_vm6, %v2140_v28, 0.0 }
 0x870   :  { %v2154_v19 = vadd.f32 %v2153_v50, %v2152_v11  ;;  %2255 = vmatpush.msrb.mxu0 %v2223_v42  ;;  %v2827_v42 = vpop.eup %2826 }
 0x872   :  { %v2109_v2 = vpop.f32.mrf.mxu3  ;;  %2256 = vmatpush.msrb.mxu0 %v2222_v35 }
 0x873   :  { %v2110_v8 = vadd.f32 %v4148_v62, %v2109_v2 }
 0x874   :  { %2257 = vmatpush.msrb.mxu0 %v2221_v34 }
 0x875   :  { %v2141_v40 = vmul.f32 %v2110_v8, %v3828_v21 }
 0x877   :  { %v2155_v57 = vsel %vm2151_vm6, %v2141_v40, 0.0 }
 0x878   :  { %v2156_v15 = vadd.f32 %v2155_v57, %v2154_v19 }
 0x87a   :  { %v2157_v3 = vrot.slane %v2156_v15, 4 }
 0x87c   :  { %v2158_v17 = vadd.f32 %v2157_v3, %v2156_v15 }
 0x87e   :  { %v2159_v40 = vrot.slane %v2158_v17, 2 }
 0x880   :  { %v2160_v15 = vadd.f32 %v2159_v40, %v2158_v17 }
 0x89f   :  { %v2112_v49 = vpop.f32.mrf.mxu3 }
 0x8a0   :  { %v2113_v46 = vadd.f32 %v4148_v62, %v2112_v49 }
 0x8a2   :  { %v2142_v45 = vmul.f32 %v2113_v46, %v3841_v26 }
 0x8a4   :  { %v2163_v61 = vsel %vm2151_vm6, %v2142_v45, 0.0  ;;  %v2205_v45 = vrot.slane %v2827_v42, 3 }
 0x8a7   :  { %v2115_v30 = vpop.f32.mrf.mxu3 }
 0x8a8   :  { %v2116_v14 = vadd.f32 %v4148_v62, %v2115_v30 }
 0x8aa   :  { %v2143_v37 = vmul.f32 %v2116_v14, %v3850_v36  ;;  %v2161_v14 = vrot.slane %v2160_v15, 1 }
 0x8ac   :  { %v2164_v63 = vsel %vm2151_vm6, %v2143_v37, 0.0 }
 0x8ad   :  { %v2165_v44 = vadd.f32 %v2164_v63, %v2163_v61 }
 0x8af   :  { %v2118_v21 = vpop.f32.mrf.mxu3 }
 0x8b0   :  { %v2119_v18 = vadd.f32 %v4148_v62, %v2118_v21 }
 0x8b2   :  { %v2144_v41 = vmul.f32 %v2119_v18, %v3861_v24  ;;  %v2162_v18 = vadd.f32 %v2161_v14, %v2160_v15 }
 0x8b4   :  { %v2166_v9 = vsel %vm2151_vm6, %v2144_v41, 0.0  ;;  %v2210_v41 = vmul.f32 %v2827_v42, %v2162_v18 }
 0x8b5   :  { %v2167_v39 = vadd.f32 %v2166_v9, %v2165_v44 }
 0x8b7   :  { %v2121_v0 = vpop.f32.mrf.mxu3 }
 0x8b8   :  { %v2122_v23 = vadd.f32 %v4148_v62, %v2121_v0  ;;  %v2203_v0 = vrot.slane %v2827_v42, 1 }
 0x8ba   :  { %v2145_v58 = vmul.f32 %v2122_v23, %v3872_v12  ;;  %v2168_v12 = vrot.slane %v2167_v39, 4 }
 0x8bc   :  { %v2174_v36 = vsel %vm2151_vm6, %v2145_v58, 0.0  ;;  %v2169_v7 = vadd.f32 %v2168_v12, %v2167_v39 }
 0x8be   :  { %v2170_v47 = vrot.slane %v2169_v7, 2 }
 0x8c0   :  { %v2171_v11 = vadd.f32 %v2170_v47, %v2169_v7 }
 0x8c2   :  { %v2124_v1 = vpop.f32.mrf.mxu3  ;;  %v2172_v52 = vrot.slane %v2171_v11, 1 }
 0x8c3   :  { %v2125_v16 = vadd.f32 %v4148_v62, %v2124_v1  ;;  %v2204_v1 = vrot.slane %v2827_v42, 2 }
 0x8c4   :  { %v2173_v21 = vadd.f32 %v2172_v52, %v2171_v11 }
 0x8c5   :  { %v2146_v25 = vmul.f32 %v2125_v16, %v3885_v13 }
 0x8c7   :  { %v2175_v6 = vsel %vm2151_vm6, %v2146_v25, 0.0 }
 0x8c8   :  { %v2176_v26 = vadd.f32 %v2175_v6, %v2174_v36  ;;  %v2214_v6 = vmax.f32 %v2210_v41, 0.0 }
 0x8ca   :  { %v2127_v43 = vpop.f32.mrf.mxu3 }
 0x8cb   :  { %v2128_v38 = vadd.f32 %v4148_v62, %v2127_v43  ;;  %v2211_v43 = vmul.f32 %v2203_v0, %v2173_v21 }
 0x8cd   :  { %v2147_v20 = vmul.f32 %v2128_v38, %v3908_v55  ;;  %v2220_v55 = vld [vmem:[%s4245_s17 + $0x10] sm:$0xff]  ;;  %v2215_v23 = vmax.f32 %v2211_v43, 0.0  ;;  %s2899_s17 = smov [#allocation4]  }
 0x8ce   :  { %2258 = vmatpush.msrb.mxu0 %v2220_v55  ;;  %s2435_s11 = sshll.u32 %s2899_s17, 4  ;;  %s2436_s11 = int_to_ptr.vmem [resolvable:$true] %s2435_s11 }
 0x8cf   :  { %v2177_v13 = vsel %vm2151_vm6, %v2147_v20, 0.0  ;;  %v2234_v58 = vrot.slane %v2215_v23, 7  ;;  %2443 = dma.vmem_to_hbm [thread:$0]  %s2436_s11, 256, %s2438_s10, [#allocation5], %s2894_s8, %s2894_s8, %s2900_s0  }
 0x8d0   :  { %v2178_v51 = vadd.f32 %v2177_v13, %v2176_v26  ;;  %2259 = vmatpush.msrb.mxu0 %v2219_v22  ;;  %v2713_v26 = vld [vmem:[%s4246_s18] ss:$0 sm:$0xff] }
 0x8d1   :  { %v2236_v9 = vsel %vm2235_vm0, %v2234_v58, %v2214_v6 }
 0x8d2   :  { %v2179_v48 = vrot.slane %v2178_v51, 4  ;;  %2260 = vmatpush.msrb.mxu0 %v2218_v5 }
 0x8d4   :  { %v2180_v10 = vadd.f32 %v2179_v48, %v2178_v51 }
 0x8d6   :  { %v2181_v29 = vrot.slane %v2180_v10, 2 }
 0x8d8   :  { %v2182_v19 = vadd.f32 %v2181_v29, %v2180_v10 }
 0x8da   :  { %v2183_v30 = vrot.slane %v2182_v19, 1 }
 0x8db   :  { %v2130_v24 = vpop.f32.mrf.mxu3 }
 0x8dc   :  { %v2131_v59 = vadd.f32 %v4148_v62, %v2130_v24  ;;  %v2184_v34 = vadd.f32 %v2183_v30, %v2182_v19 }
 0x8de   :  { %v2148_v28 = vmul.f32 %v2131_v59, %v3933_v31  ;;  %v2212_v46 = vmul.f32 %v2204_v1, %v2184_v34 }
 0x8e0   :  { %v2185_v57 = vsel %vm2151_vm6, %v2148_v28, 0.0  ;;  %v2216_v37 = vmax.f32 %v2212_v46, 0.0 }
 0x8e2   :  { %v2237_v63 = vrot.slane %v2216_v37, 6 }
 0x8e3   :  { %v2133_v60 = vpop.f32.mrf.mxu3 }
 0x8e4   :  { %v2134_v54 = vadd.f32 %v4148_v62, %v2133_v60  ;;  %v2239_v36 = vsel %vm2238_vm7, %v2237_v63, %v2236_v9 }
 0x8e6   :  { %v2149_v53 = vmul.f32 %v2134_v54, %v3946_v56 }
 0x8e8   :  { %v2186_v2 = vsel %vm2151_vm6, %v2149_v53, 0.0 }
 0x8e9   :  { %v2187_v27 = vadd.f32 %v2186_v2, %v2185_v57 }
 0x8eb   :  { %v2136_v50 = vpop.f32.mrf.mxu3 }
 0x8ec   :  { %v2137_v8 = vadd.f32 %v4148_v62, %v2136_v50 }
 0x8ee   :  { %v2150_v49 = vmul.f32 %v2137_v8, %v3963_v33 }
 0x8f0   :  { %v2188_v56 = vsel %vm2151_vm6, %v2150_v49, 0.0 }
 0x8f1   :  { %v2189_v31 = vadd.f32 %v2188_v56, %v2187_v27 }
 0x8f3   :  { %v2190_v35 = vrot.slane %v2189_v31, 4 }
 0x8f5   :  { %v2191_v62 = vadd.f32 %v2190_v35, %v2189_v31 }
 0x8f7   :  { %v2192_v16 = vrot.slane %v2191_v62, 2 }
 0x8f9   :  { %v2193_v33 = vadd.f32 %v2192_v16, %v2191_v62 }
 0x8fb   :  { %v2194_v38 = vrot.slane %v2193_v33, 1 }
 0x8fd   :  { %v2195_v25 = vadd.f32 %v2194_v38, %v2193_v33 }
 0x8ff   :  { %v2213_v20 = vmul.f32 %v2205_v45, %v2195_v25 }
 0x901   :  { %v2217_v61 = vmax.f32 %v2213_v20, 0.0 }
 0x903   :  { %v2240_v44 = vrot.slane %v2217_v61, 5 }
 0x905   :  { %v2242_v13 = vsel %vm2241_vm8, %v2240_v44, %v2239_v36 }
 0x906   :  { %2616 = vmatmul.msk.f32.vlgmr.msrb.gmra.mxu0 %vm2151_vm6, %v2242_v13 }
 0x983   :  { %v2262_v39 = vpop.f32.mrf.mxu0 }
 0x984   :  { %v2263_v24 = vadd.f32 %v2713_v26, %v2262_v39 }
 0x986   :  { %2266 = vst.msk [vmem:[#allocation2] sm:$0xf] %vm2265_vm9, %v2263_v24 }
 0x987   :  { %2430 = dma.vmem_to_hbm [thread:$0]  %s2426_s14, 64, %s2428_s21, [#allocation3]  }
 0x988   :  { %2889 = dma.done.wait [#allocation3], 64  }
 0x989   :  { %2890 = vsyncadd [#allocation3], 4294967232 }
 0x98a   :  { %2891 = dma.done.wait [#allocation5], 256  }
 0x98b   :  { %2892 = vsyncadd [#allocation5], 4294967040 }
 0x98c   :  { %2454 = vsyncpa [#allocation3], 1 }
 0x98d   :  { %2455 = vsyncpa [#allocation5], 1 }

</bundles_post_ra>
